<compile_context>
chip_gen: v6e
topology: v6e:2x2x1
jax: 0.10.0
libtpu: 0.0.40
codegen_flags: <defaults>
</compile_context>

<pallas_src>
import functools
import math

import jax
import jax.numpy as jnp
from jax.experimental import pallas as pl
from jax.experimental.pallas import tpu as pltpu


def _round_up(x, m):
    return (x + m - 1) // m * m


# ----------------------------------------------------------------------------
# Pallas kernel: fused conv (tap accumulation) + shift (+ ReLU) for one image
# ----------------------------------------------------------------------------
def _conv_kernel(x_ref, w_ref, shift_ref, o_ref, acc_ref, *, k, dilation, Hf, Wf, relu):
    """x_ref:     (1, Hp, Wp, Cin)  bf16 zero-padded input (one batch image)
       w_ref:     (k*k, Cin, Np)    bf16 BN-scale-folded weights, tap-major
       shift_ref: (1, Np)           f32  BN shift / conv bias
       o_ref:     (1, Mp, Np)       f32  dense (stride-1) output; rows [0, Hf*Wf) valid
       acc_ref:   (Hf*Wf, Np)       f32  VMEM accumulator scratch
    """
    M = Hf * Wf
    acc_ref[...] = jnp.zeros_like(acc_ref)
    # Static loop over the k*k taps: slice the shifted window directly from the
    # VMEM-resident padded input (no im2col materialization in HBM).
    for ki in range(k):
        for kj in range(k):
            tap = x_ref[0, pl.ds(ki * dilation, Hf), pl.ds(kj * dilation, Wf), :]
            a = tap.reshape(M, tap.shape[-1])                       # bf16 (M, Cin)
            acc_ref[...] += jnp.dot(a, w_ref[ki * k + kj],
                                    preferred_element_type=jnp.float32)
    out = acc_ref[...] + shift_ref[...]                             # f32 epilogue
    if relu:
        out = jnp.maximum(out, 0.0)
    o_ref[0, pl.ds(0, M), :] = out                                  # lane-dense store


def conv2d_bn_act(x_nhwc, w_eff, shift, *, stride=1, padding=0, dilation=1, relu=True):
    """x_nhwc: (B,H,W,Cin) f32.  w_eff: (k,k,Cin,Cout) f32 (BN scale already folded).
    shift: (Cout,) f32.  Returns (B,Ho,Wo,Cout) f32."""
    B, H, W, Cin = x_nhwc.shape
    k = w_eff.shape[0]
    Cout = w_eff.shape[-1]
    Hf = H + 2 * padding - dilation * (k - 1)       # dense (stride-1) output size
    Wf = W + 2 * padding - dilation * (k - 1)
    assert Hf >= 1 and Wf >= 1
    M = Hf * Wf
    Mp = _round_up(M, 8)
    Np = _round_up(Cout, 128)                       # lane-dense output channels
    Hp, Wp = H + 2 * padding, W + 2 * padding

    x_pad = jnp.pad(x_nhwc, ((0, 0), (padding, padding), (padding, padding), (0, 0)))
    x_pad = x_pad.astype(jnp.bfloat16)              # halve activation DMA bytes
    w_p = jnp.pad(w_eff, ((0, 0), (0, 0), (0, 0), (0, Np - Cout)))
    w_p = w_p.reshape(k * k, Cin, Np).astype(jnp.bfloat16)
    shift_p = jnp.pad(shift, (0, Np - Cout)).reshape(1, Np).astype(jnp.float32)

    kernel = functools.partial(_conv_kernel, k=k, dilation=dilation,
                               Hf=Hf, Wf=Wf, relu=relu)
    out = pl.pallas_call(
        kernel,
        out_shape=jax.ShapeDtypeStruct((B, Mp, Np), jnp.float32),
        grid=(B,),
        in_specs=[
            pl.BlockSpec((1, Hp, Wp, Cin), lambda b: (b, 0, 0, 0)),
            pl.BlockSpec((k * k, Cin, Np), lambda b: (0, 0, 0)),   # fetched once
            pl.BlockSpec((1, Np), lambda b: (0, 0)),               # fetched once
        ],
        out_specs=pl.BlockSpec((1, Mp, Np), lambda b: (b, 0, 0)),
        scratch_shapes=[pltpu.VMEM((M, Np), jnp.float32)],
        compiler_params=pltpu.CompilerParams(
            dimension_semantics=("parallel",),
            vmem_limit_bytes=32 * 1024 * 1024,
        ),
    )(x_pad, w_p, shift_p)

    out = out[:, :M, :Cout].reshape(B, Hf, Wf, Cout)
    if stride > 1:
        # TODO(synk): stride>1 computes the dense stride-1 output and subsamples; a
        # strided in-kernel load (pl.ds(..., stride=s)) would skip the extra compute.
        out = out[:, ::stride, ::stride, :]
    return out


# ----------------------------------------------------------------------------
# Module (deterministic params); BatchNorm is eval-mode (running statistics)
# ----------------------------------------------------------------------------
class _Rng:
    def __init__(self, seed):
        self._key = jax.random.PRNGKey(seed)

    def next(self):
        self._key, k = jax.random.split(self._key)
        return k


class BasicConv2d:
    """Pallas port of PyTorch BasicConv2d: Conv2d -> BatchNorm2d (eval) -> ReLU."""

    def __init__(self, rng, in_channels, out_channels, kernel_size,
                 stride=1, padding=0, dilation=1, bn=True, relu=True):
        self.stride, self.padding, self.dilation = stride, padding, dilation
        self.bn, self.relu = bn, relu
        k = kernel_size
        fan_in = in_channels * k * k
        self.w = jax.random.normal(rng.next(), (k, k, in_channels, out_channels),
                                   jnp.float32) / math.sqrt(fan_in)
        if bn:
            # TODO(synk): training-mode batch statistics are not computed; eval-mode
            # BN with deterministic running stats is folded into the conv weights.
            self.gamma = 1.0 + 0.1 * jax.random.normal(rng.next(), (out_channels,), jnp.float32)
            self.beta = 0.1 * jax.random.normal(rng.next(), (out_channels,), jnp.float32)
            self.rmean = 0.1 * jax.random.normal(rng.next(), (out_channels,), jnp.float32)
            self.rvar = 1.0 + 0.1 * jax.random.uniform(rng.next(), (out_channels,), jnp.float32)
            self.b = None
        else:
            self.b = 0.1 * jax.random.normal(rng.next(), (out_channels,), jnp.float32)

    def folded_params(self):
        cout = self.w.shape[-1]
        if self.bn:
            scale = self.gamma / jnp.sqrt(self.rvar + 1e-5)
            shift = self.beta - self.rmean * scale
        else:
            scale = jnp.ones((cout,), jnp.float32)
            shift = self.b
        return self.w * scale[None, None, None, :], shift

    def __call__(self, x_nchw):
        x = jnp.transpose(x_nchw, (0, 2, 3, 1)).astype(jnp.float32)   # NCHW -> NHWC
        w_eff, shift = self.folded_params()
        y = conv2d_bn_act(x, w_eff, shift, stride=self.stride, padding=self.padding,
                          dilation=self.dilation, relu=self.relu)
        return jnp.transpose(y, (0, 3, 1, 2))                          # NHWC -> NCHW


# ----------------------------------------------------------------------------
# Plain-JAX reference (same bf16-operand / f32-accumulate arithmetic)
# ----------------------------------------------------------------------------
def _reference_nchw(module, x_nchw):
    x = jnp.transpose(x_nchw, (0, 2, 3, 1)).astype(jnp.float32)
    w_eff, shift = module.folded_params()
    y = jax.lax.conv_general_dilated(
        x.astype(jnp.bfloat16), w_eff.astype(jnp.bfloat16),
        window_strides=(module.stride, module.stride),
        padding=[(module.padding, module.padding)] * 2,
        rhs_dilation=(module.dilation, module.dilation),
        dimension_numbers=("NHWC", "HWIO", "NHWC"),
        preferred_element_type=jnp.float32)
    y = y + shift
    if module.relu:
        y = jnp.maximum(y, 0.0)
    return jnp.transpose(y, (0, 3, 1, 2))


if __name__ == "__main__":
    rng = _Rng(42)
    key = jax.random.PRNGKey(0)
    x = jax.random.normal(key, (2, 4, 16, 16), jnp.float32)   # NCHW like PyTorch

    configs = [
        dict(in_channels=4, out_channels=8, kernel_size=3, padding=1),              # bn+relu
        dict(in_channels=4, out_channels=8, kernel_size=1),                         # 1x1
        dict(in_channels=4, out_channels=8, kernel_size=3, padding=3, dilation=3),  # dilated
        dict(in_channels=4, out_channels=8, kernel_size=3, stride=2, padding=1,
             bn=False, relu=False),                                                 # bias path
    ]
    for cfg in configs:
        mod = BasicConv2d(rng, **cfg)
        out = jax.block_until_ready(mod(x))
        ref = jax.block_until_ready(_reference_nchw(mod, x))
        assert out.shape == ref.shape, (cfg, out.shape, ref.shape)
        assert bool(jnp.all(jnp.isfinite(out))), cfg
        err = float(jnp.max(jnp.abs(out - ref)))
        assert err < 1e-3, (cfg, err)
    print("KERNEL_OK")
</pallas_src>

<mosaic_0001>
module attributes {stable_mosaic.version = 11 : i64} {
  func.func @_conv_kernel(%arg0: i32, %arg1: memref<1x18x18x4xbf16, #tpu.memory_space<vmem>>, %arg2: memref<9x4x128xbf16, #tpu.memory_space<vmem>>, %arg3: memref<1x128xf32, #tpu.memory_space<vmem>>, %arg4: memref<1x256x128xf32, #tpu.memory_space<vmem>>, %arg5: memref<256x128xf32, #tpu.memory_space<vmem>>) attributes {dimension_semantics = [#tpu.dimension_semantics<parallel>], iteration_bounds = array<i64: 2>, scalar_prefetch = 0 : i64, scratch_operands = 1 : i64, tpu.core_type = #tpu.core_type<tc>, window_params = [{transform_indices = @transform_0, window_bounds = array<i64: 1, 18, 18, 4>}, {pipeline_mode = #tpu.pipeline_mode<synchronous>, transform_indices = @transform_1, window_bounds = array<i64: 9, 4, 128>}, {pipeline_mode = #tpu.pipeline_mode<synchronous>, transform_indices = @transform_2, window_bounds = array<i64: 1, 128>}, {transform_indices = @transform_3, window_bounds = array<i64: 1, 256, 128>}]} {
    %cst = arith.constant 0.000000e+00 : f32
    %0 = vector.broadcast %cst : f32 to vector<256x128xf32>
    %c0 = arith.constant 0 : index
    %c0_0 = arith.constant 0 : index
    %1 = vector.load %arg5[%c0, %c0_0] : memref<256x128xf32, #tpu.memory_space<vmem>>, vector<256x128xf32>
    tpu.vector_store %arg5[%c0, %c0_0], %0 {strides = array<i32>} : memref<256x128xf32, #tpu.memory_space<vmem>>, vector<256x128xf32>,
    %c0_1 = arith.constant 0 : index
    %c0_2 = arith.constant 0 : index
    %c0_3 = arith.constant 0 : index
    %c0_4 = arith.constant 0 : index
    %2 = vector.load %arg1[%c0_1, %c0_2, %c0_3, %c0_4] : memref<1x18x18x4xbf16, #tpu.memory_space<vmem>>, vector<1x16x16x4xbf16>
    %3 = vector.shape_cast %2 : vector<1x16x16x4xbf16> to vector<16x16x4xbf16>
    %4 = vector.shape_cast %3 : vector<16x16x4xbf16> to vector<256x4xbf16>
    %c0_5 = arith.constant 0 : index
    %c0_6 = arith.constant 0 : index
    %5 = vector.load %arg5[%c0_5, %c0_6] : memref<256x128xf32, #tpu.memory_space<vmem>>, vector<256x128xf32>
    %c0_7 = arith.constant 0 : index
    %c0_8 = arith.constant 0 : index
    %c0_9 = arith.constant 0 : index
    %6 = vector.load %arg2[%c0_7, %c0_8, %c0_9] : memref<9x4x128xbf16, #tpu.memory_space<vmem>>, vector<1x4x128xbf16>
    %7 = vector.shape_cast %6 : vector<1x4x128xbf16> to vector<4x128xbf16>
    %cst_10 = arith.constant dense<0.000000e+00> : vector<256x128xf32>
    %8 = tpu.matmul %4, %7, %cst_10 {dimension_numbers = #tpu.dot_dimension_numbers<[1], [0], [0], [1], [0, 0, 1, 1], [], []>} : vector<256x4xbf16>, vector<4x128xbf16>, vector<256x128xf32> -> vector<256x128xf32>
    %9 = arith.addf %5, %8 : vector<256x128xf32>
    %c0_11 = arith.constant 0 : index
    %c0_12 = arith.constant 0 : index
    %10 = vector.load %arg5[%c0_11, %c0_12] : memref<256x128xf32, #tpu.memory_space<vmem>>, vector<256x128xf32>
    tpu.vector_store %arg5[%c0_11, %c0_12], %9 {strides = array<i32>} : memref<256x128xf32, #tpu.memory_space<vmem>>, vector<256x128xf32>,
    %c0_13 = arith.constant 0 : index
    %c0_14 = arith.constant 0 : index
    %c1 = arith.constant 1 : index
    %c0_15 = arith.constant 0 : index
    %11 = vector.load %arg1[%c0_13, %c0_14, %c1, %c0_15] : memref<1x18x18x4xbf16, #tpu.memory_space<vmem>>, vector<1x16x16x4xbf16>
    %12 = vector.shape_cast %11 : vector<1x16x16x4xbf16> to vector<16x16x4xbf16>
    %13 = vector.shape_cast %12 : vector<16x16x4xbf16> to vector<256x4xbf16>
    %c0_16 = arith.constant 0 : index
    %c0_17 = arith.constant 0 : index
    %14 = vector.load %arg5[%c0_16, %c0_17] : memref<256x128xf32, #tpu.memory_space<vmem>>, vector<256x128xf32>
    %c1_18 = arith.constant 1 : index
    %c0_19 = arith.constant 0 : index
    %c0_20 = arith.constant 0 : index
    %15 = vector.load %arg2[%c1_18, %c0_19, %c0_20] : memref<9x4x128xbf16, #tpu.memory_space<vmem>>, vector<1x4x128xbf16>
    %16 = vector.shape_cast %15 : vector<1x4x128xbf16> to vector<4x128xbf16>
    %cst_21 = arith.constant dense<0.000000e+00> : vector<256x128xf32>
    %17 = tpu.matmul %13, %16, %cst_21 {dimension_numbers = #tpu.dot_dimension_numbers<[1], [0], [0], [1], [0, 0, 1, 1], [], []>} : vector<256x4xbf16>, vector<4x128xbf16>, vector<256x128xf32> -> vector<256x128xf32>
    %18 = arith.addf %14, %17 : vector<256x128xf32>
    %c0_22 = arith.constant 0 : index
    %c0_23 = arith.constant 0 : index
    %19 = vector.load %arg5[%c0_22, %c0_23] : memref<256x128xf32, #tpu.memory_space<vmem>>, vector<256x128xf32>
    tpu.vector_store %arg5[%c0_22, %c0_23], %18 {strides = array<i32>} : memref<256x128xf32, #tpu.memory_space<vmem>>, vector<256x128xf32>,
    %c0_24 = arith.constant 0 : index
    %c0_25 = arith.constant 0 : index
    %c2 = arith.constant 2 : index
    %c0_26 = arith.constant 0 : index
    %20 = vector.load %arg1[%c0_24, %c0_25, %c2, %c0_26] : memref<1x18x18x4xbf16, #tpu.memory_space<vmem>>, vector<1x16x16x4xbf16>
    %21 = vector.shape_cast %20 : vector<1x16x16x4xbf16> to vector<16x16x4xbf16>
    %22 = vector.shape_cast %21 : vector<16x16x4xbf16> to vector<256x4xbf16>
    %c0_27 = arith.constant 0 : index
    %c0_28 = arith.constant 0 : index
    %23 = vector.load %arg5[%c0_27, %c0_28] : memref<256x128xf32, #tpu.memory_space<vmem>>, vector<256x128xf32>
    %c2_29 = arith.constant 2 : index
    %c0_30 = arith.constant 0 : index
    %c0_31 = arith.constant 0 : index
    %24 = vector.load %arg2[%c2_29, %c0_30, %c0_31] : memref<9x4x128xbf16, #tpu.memory_space<vmem>>, vector<1x4x128xbf16>
    %25 = vector.shape_cast %24 : vector<1x4x128xbf16> to vector<4x128xbf16>
    %cst_32 = arith.constant dense<0.000000e+00> : vector<256x128xf32>
    %26 = tpu.matmul %22, %25, %cst_32 {dimension_numbers = #tpu.dot_dimension_numbers<[1], [0], [0], [1], [0, 0, 1, 1], [], []>} : vector<256x4xbf16>, vector<4x128xbf16>, vector<256x128xf32> -> vector<256x128xf32>
    %27 = arith.addf %23, %26 : vector<256x128xf32>
    %c0_33 = arith.constant 0 : index
    %c0_34 = arith.constant 0 : index
    %28 = vector.load %arg5[%c0_33, %c0_34] : memref<256x128xf32, #tpu.memory_space<vmem>>, vector<256x128xf32>
    tpu.vector_store %arg5[%c0_33, %c0_34], %27 {strides = array<i32>} : memref<256x128xf32, #tpu.memory_space<vmem>>, vector<256x128xf32>,
    %c0_35 = arith.constant 0 : index
    %c1_36 = arith.constant 1 : index
    %c0_37 = arith.constant 0 : index
    %c0_38 = arith.constant 0 : index
    %29 = vector.load %arg1[%c0_35, %c1_36, %c0_37, %c0_38] : memref<1x18x18x4xbf16, #tpu.memory_space<vmem>>, vector<1x16x16x4xbf16>
    %30 = vector.shape_cast %29 : vector<1x16x16x4xbf16> to vector<16x16x4xbf16>
    %31 = vector.shape_cast %30 : vector<16x16x4xbf16> to vector<256x4xbf16>
    %c0_39 = arith.constant 0 : index
    %c0_40 = arith.constant 0 : index
    %32 = vector.load %arg5[%c0_39, %c0_40] : memref<256x128xf32, #tpu.memory_space<vmem>>, vector<256x128xf32>
    %c3 = arith.constant 3 : index
    %c0_41 = arith.constant 0 : index
    %c0_42 = arith.constant 0 : index
    %33 = vector.load %arg2[%c3, %c0_41, %c0_42] : memref<9x4x128xbf16, #tpu.memory_space<vmem>>, vector<1x4x128xbf16>
    %34 = vector.shape_cast %33 : vector<1x4x128xbf16> to vector<4x128xbf16>
    %cst_43 = arith.constant dense<0.000000e+00> : vector<256x128xf32>
    %35 = tpu.matmul %31, %34, %cst_43 {dimension_numbers = #tpu.dot_dimension_numbers<[1], [0], [0], [1], [0, 0, 1, 1], [], []>} : vector<256x4xbf16>, vector<4x128xbf16>, vector<256x128xf32> -> vector<256x128xf32>
    %36 = arith.addf %32, %35 : vector<256x128xf32>
    %c0_44 = arith.constant 0 : index
    %c0_45 = arith.constant 0 : index
    %37 = vector.load %arg5[%c0_44, %c0_45] : memref<256x128xf32, #tpu.memory_space<vmem>>, vector<256x128xf32>
    tpu.vector_store %arg5[%c0_44, %c0_45], %36 {strides = array<i32>} : memref<256x128xf32, #tpu.memory_space<vmem>>, vector<256x128xf32>,
    %c0_46 = arith.constant 0 : index
    %c1_47 = arith.constant 1 : index
    %c1_48 = arith.constant 1 : index
    %c0_49 = arith.constant 0 : index
    %38 = vector.load %arg1[%c0_46, %c1_47, %c1_48, %c0_49] : memref<1x18x18x4xbf16, #tpu.memory_space<vmem>>, vector<1x16x16x4xbf16>
    %39 = vector.shape_cast %38 : vector<1x16x16x4xbf16> to vector<16x16x4xbf16>
    %40 = vector.shape_cast %39 : vector<16x16x4xbf16> to vector<256x4xbf16>
    %c0_50 = arith.constant 0 : index
    %c0_51 = arith.constant 0 : index
    %41 = vector.load %arg5[%c0_50, %c0_51] : memref<256x128xf32, #tpu.memory_space<vmem>>, vector<256x128xf32>
    %c4 = arith.constant 4 : index
    %c0_52 = arith.constant 0 : index
    %c0_53 = arith.constant 0 : index
    %42 = vector.load %arg2[%c4, %c0_52, %c0_53] : memref<9x4x128xbf16, #tpu.memory_space<vmem>>, vector<1x4x128xbf16>
    %43 = vector.shape_cast %42 : vector<1x4x128xbf16> to vector<4x128xbf16>
    %cst_54 = arith.constant dense<0.000000e+00> : vector<256x128xf32>
    %44 = tpu.matmul %40, %43, %cst_54 {dimension_numbers = #tpu.dot_dimension_numbers<[1], [0], [0], [1], [0, 0, 1, 1], [], []>} : vector<256x4xbf16>, vector<4x128xbf16>, vector<256x128xf32> -> vector<256x128xf32>
    %45 = arith.addf %41, %44 : vector<256x128xf32>
    %c0_55 = arith.constant 0 : index
    %c0_56 = arith.constant 0 : index
    %46 = vector.load %arg5[%c0_55, %c0_56] : memref<256x128xf32, #tpu.memory_space<vmem>>, vector<256x128xf32>
    tpu.vector_store %arg5[%c0_55, %c0_56], %45 {strides = array<i32>} : memref<256x128xf32, #tpu.memory_space<vmem>>, vector<256x128xf32>,
    %c0_57 = arith.constant 0 : index
    %c1_58 = arith.constant 1 : index
    %c2_59 = arith.constant 2 : index
    %c0_60 = arith.constant 0 : index
    %47 = vector.load %arg1[%c0_57, %c1_58, %c2_59, %c0_60] : memref<1x18x18x4xbf16, #tpu.memory_space<vmem>>, vector<1x16x16x4xbf16>
    %48 = vector.shape_cast %47 : vector<1x16x16x4xbf16> to vector<16x16x4xbf16>
    %49 = vector.shape_cast %48 : vector<16x16x4xbf16> to vector<256x4xbf16>
    %c0_61 = arith.constant 0 : index
    %c0_62 = arith.constant 0 : index
    %50 = vector.load %arg5[%c0_61, %c0_62] : memref<256x128xf32, #tpu.memory_space<vmem>>, vector<256x128xf32>
    %c5 = arith.constant 5 : index
    %c0_63 = arith.constant 0 : index
    %c0_64 = arith.constant 0 : index
    %51 = vector.load %arg2[%c5, %c0_63, %c0_64] : memref<9x4x128xbf16, #tpu.memory_space<vmem>>, vector<1x4x128xbf16>
    %52 = vector.shape_cast %51 : vector<1x4x128xbf16> to vector<4x128xbf16>
    %cst_65 = arith.constant dense<0.000000e+00> : vector<256x128xf32>
    %53 = tpu.matmul %49, %52, %cst_65 {dimension_numbers = #tpu.dot_dimension_numbers<[1], [0], [0], [1], [0, 0, 1, 1], [], []>} : vector<256x4xbf16>, vector<4x128xbf16>, vector<256x128xf32> -> vector<256x128xf32>
    %54 = arith.addf %50, %53 : vector<256x128xf32>
    %c0_66 = arith.constant 0 : index
    %c0_67 = arith.constant 0 : index
    %55 = vector.load %arg5[%c0_66, %c0_67] : memref<256x128xf32, #tpu.memory_space<vmem>>, vector<256x128xf32>
    tpu.vector_store %arg5[%c0_66, %c0_67], %54 {strides = array<i32>} : memref<256x128xf32, #tpu.memory_space<vmem>>, vector<256x128xf32>,
    %c0_68 = arith.constant 0 : index
    %c2_69 = arith.constant 2 : index
    %c0_70 = arith.constant 0 : index
    %c0_71 = arith.constant 0 : index
    %56 = vector.load %arg1[%c0_68, %c2_69, %c0_70, %c0_71] : memref<1x18x18x4xbf16, #tpu.memory_space<vmem>>, vector<1x16x16x4xbf16>
    %57 = vector.shape_cast %56 : vector<1x16x16x4xbf16> to vector<16x16x4xbf16>
    %58 = vector.shape_cast %57 : vector<16x16x4xbf16> to vector<256x4xbf16>
    %c0_72 = arith.constant 0 : index
    %c0_73 = arith.constant 0 : index
    %59 = vector.load %arg5[%c0_72, %c0_73] : memref<256x128xf32, #tpu.memory_space<vmem>>, vector<256x128xf32>
    %c6 = arith.constant 6 : index
    %c0_74 = arith.constant 0 : index
    %c0_75 = arith.constant 0 : index
    %60 = vector.load %arg2[%c6, %c0_74, %c0_75] : memref<9x4x128xbf16, #tpu.memory_space<vmem>>, vector<1x4x128xbf16>
    %61 = vector.shape_cast %60 : vector<1x4x128xbf16> to vector<4x128xbf16>
    %cst_76 = arith.constant dense<0.000000e+00> : vector<256x128xf32>
    %62 = tpu.matmul %58, %61, %cst_76 {dimension_numbers = #tpu.dot_dimension_numbers<[1], [0], [0], [1], [0, 0, 1, 1], [], []>} : vector<256x4xbf16>, vector<4x128xbf16>, vector<256x128xf32> -> vector<256x128xf32>
    %63 = arith.addf %59, %62 : vector<256x128xf32>
    %c0_77 = arith.constant 0 : index
    %c0_78 = arith.constant 0 : index
    %64 = vector.load %arg5[%c0_77, %c0_78] : memref<256x128xf32, #tpu.memory_space<vmem>>, vector<256x128xf32>
    tpu.vector_store %arg5[%c0_77, %c0_78], %63 {strides = array<i32>} : memref<256x128xf32, #tpu.memory_space<vmem>>, vector<256x128xf32>,
    %c0_79 = arith.constant 0 : index
    %c2_80 = arith.constant 2 : index
    %c1_81 = arith.constant 1 : index
    %c0_82 = arith.constant 0 : index
    %65 = vector.load %arg1[%c0_79, %c2_80, %c1_81, %c0_82] : memref<1x18x18x4xbf16, #tpu.memory_space<vmem>>, vector<1x16x16x4xbf16>
    %66 = vector.shape_cast %65 : vector<1x16x16x4xbf16> to vector<16x16x4xbf16>
    %67 = vector.shape_cast %66 : vector<16x16x4xbf16> to vector<256x4xbf16>
    %c0_83 = arith.constant 0 : index
    %c0_84 = arith.constant 0 : index
    %68 = vector.load %arg5[%c0_83, %c0_84] : memref<256x128xf32, #tpu.memory_space<vmem>>, vector<256x128xf32>
    %c7 = arith.constant 7 : index
    %c0_85 = arith.constant 0 : index
    %c0_86 = arith.constant 0 : index
    %69 = vector.load %arg2[%c7, %c0_85, %c0_86] : memref<9x4x128xbf16, #tpu.memory_space<vmem>>, vector<1x4x128xbf16>
    %70 = vector.shape_cast %69 : vector<1x4x128xbf16> to vector<4x128xbf16>
    %cst_87 = arith.constant dense<0.000000e+00> : vector<256x128xf32>
    %71 = tpu.matmul %67, %70, %cst_87 {dimension_numbers = #tpu.dot_dimension_numbers<[1], [0], [0], [1], [0, 0, 1, 1], [], []>} : vector<256x4xbf16>, vector<4x128xbf16>, vector<256x128xf32> -> vector<256x128xf32>
    %72 = arith.addf %68, %71 : vector<256x128xf32>
    %c0_88 = arith.constant 0 : index
    %c0_89 = arith.constant 0 : index
    %73 = vector.load %arg5[%c0_88, %c0_89] : memref<256x128xf32, #tpu.memory_space<vmem>>, vector<256x128xf32>
    tpu.vector_store %arg5[%c0_88, %c0_89], %72 {strides = array<i32>} : memref<256x128xf32, #tpu.memory_space<vmem>>, vector<256x128xf32>,
    %c0_90 = arith.constant 0 : index
    %c2_91 = arith.constant 2 : index
    %c2_92 = arith.constant 2 : index
    %c0_93 = arith.constant 0 : index
    %74 = vector.load %arg1[%c0_90, %c2_91, %c2_92, %c0_93] : memref<1x18x18x4xbf16, #tpu.memory_space<vmem>>, vector<1x16x16x4xbf16>
    %75 = vector.shape_cast %74 : vector<1x16x16x4xbf16> to vector<16x16x4xbf16>
    %76 = vector.shape_cast %75 : vector<16x16x4xbf16> to vector<256x4xbf16>
    %c0_94 = arith.constant 0 : index
    %c0_95 = arith.constant 0 : index
    %77 = vector.load %arg5[%c0_94, %c0_95] : memref<256x128xf32, #tpu.memory_space<vmem>>, vector<256x128xf32>
    %c8 = arith.constant 8 : index
    %c0_96 = arith.constant 0 : index
    %c0_97 = arith.constant 0 : index
    %78 = vector.load %arg2[%c8, %c0_96, %c0_97] : memref<9x4x128xbf16, #tpu.memory_space<vmem>>, vector<1x4x128xbf16>
    %79 = vector.shape_cast %78 : vector<1x4x128xbf16> to vector<4x128xbf16>
    %cst_98 = arith.constant dense<0.000000e+00> : vector<256x128xf32>
    %80 = tpu.matmul %76, %79, %cst_98 {dimension_numbers = #tpu.dot_dimension_numbers<[1], [0], [0], [1], [0, 0, 1, 1], [], []>} : vector<256x4xbf16>, vector<4x128xbf16>, vector<256x128xf32> -> vector<256x128xf32>
    %81 = arith.addf %77, %80 : vector<256x128xf32>
    %c0_99 = arith.constant 0 : index
    %c0_100 = arith.constant 0 : index
    %82 = vector.load %arg5[%c0_99, %c0_100] : memref<256x128xf32, #tpu.memory_space<vmem>>, vector<256x128xf32>
    tpu.vector_store %arg5[%c0_99, %c0_100], %81 {strides = array<i32>} : memref<256x128xf32, #tpu.memory_space<vmem>>, vector<256x128xf32>,
    %c0_101 = arith.constant 0 : index
    %c0_102 = arith.constant 0 : index
    %83 = vector.load %arg5[%c0_101, %c0_102] : memref<256x128xf32, #tpu.memory_space<vmem>>, vector<256x128xf32>
    %c0_103 = arith.constant 0 : index
    %c0_104 = arith.constant 0 : index
    %84 = vector.load %arg3[%c0_103, %c0_104] : memref<1x128xf32, #tpu.memory_space<vmem>>, vector<1x128xf32>
    %85 = vector.broadcast %84 : vector<1x128xf32> to vector<256x128xf32>
    %86 = arith.addf %83, %85 : vector<256x128xf32>
    %cst_105 = arith.constant 0.000000e+00 : f32
    %87 = vector.broadcast %cst_105 : f32 to vector<256x128xf32>
    %88 = arith.maximumf %86, %87 : vector<256x128xf32>
    %c0_106 = arith.constant 0 : index
    %c0_107 = arith.constant 0 : index
    %c0_108 = arith.constant 0 : index
    %89 = vector.load %arg4[%c0_106, %c0_107, %c0_108] : memref<1x256x128xf32, #tpu.memory_space<vmem>>, vector<1x256x128xf32>
    %90 = vector.shape_cast %89 : vector<1x256x128xf32> to vector<256x128xf32>
    %91 = vector.shape_cast %88 : vector<256x128xf32> to vector<1x256x128xf32>
    tpu.vector_store %arg4[%c0_106, %c0_107, %c0_108], %91 {strides = array<i32>} : memref<1x256x128xf32, #tpu.memory_space<vmem>>, vector<1x256x128xf32>,
    return
  }
  func.func @transform_0(%arg0: i32) -> (i32, i32, i32, i32) {
    %c0_i32 = arith.constant 0 : i32
    %c0_i32_0 = arith.constant 0 : i32
    %c0_i32_1 = arith.constant 0 : i32
    %c0_i32_2 = arith.constant 0 : i32
    return %arg0, %c0_i32, %c0_i32_0, %c0_i32_1 : i32, i32, i32, i32
  }
  func.func @transform_1(%arg0: i32) -> (i32, i32, i32) {
    %c0_i32 = arith.constant 0 : i32
    %c0_i32_0 = arith.constant 0 : i32
    %c0_i32_1 = arith.constant 0 : i32
    %c0_i32_2 = arith.constant 0 : i32
    return %c0_i32, %c0_i32_0, %c0_i32_1 : i32, i32, i32
  }
  func.func @transform_2(%arg0: i32) -> (i32, i32) {
    %c0_i32 = arith.constant 0 : i32
    %c0_i32_0 = arith.constant 0 : i32
    %c0_i32_1 = arith.constant 0 : i32
    return %c0_i32, %c0_i32_0 : i32, i32
  }
  func.func @transform_3(%arg0: i32) -> (i32, i32, i32) {
    %c0_i32 = arith.constant 0 : i32
    %c0_i32_0 = arith.constant 0 : i32
    %c0_i32_1 = arith.constant 0 : i32
    return %arg0, %c0_i32, %c0_i32_0 : i32, i32, i32
  }
}

</mosaic_0001>

<bundles_post_ra>
// kernel: tpu_custom_call.1
= control target key start
LH: loop header
LB: loop body
LE: loop exit
PB: predicated region body
PF: predicated region fallthrough
CT: control target
= control target key end

     0   :  { %8 = vsyncpa [#allocation4], 0  ;;  %s8817_s0 = inlined_call_operand.vmem [shape: bf16[2,18,18,4], index: 0, kind: input, shape index: {}]   ;;  %s8818_s1 = inlined_call_operand.vmem [shape: bf16[9,4,128], index: 1, kind: input, shape index: {}]   ;;  %s8819_s2 = inlined_call_operand.vmem [shape: f32[1,128], index: 2, kind: input, shape index: {}]   ;;  %s8820_s3 = inlined_call_operand.hbm [shape: f32[2,256,128], index: 3, kind: output, shape index: {}]  }
   0x1   :  { %10 = vsyncpa [#allocation4 + $0x1], 0  ;;  %s7015_s12 = smov 0   ;;  %s7017_s13 = smov 0  }
   0x2   :  { %s7019_s14 = smov 0   ;;  %s7021_s15 = smov 0  }
   0x3 LB: > { %s7036_s16 = sadd.s32 4294967295, %s6990_s15   ;;  %s5756_s17 = sadd.s32 4294967294, %s6990_s15   ;;  %s6990_s15 = sphi %s7021_s15, %s8930_s15   ;;  %s6986_s14 = sphi %s7019_s14, %s8929_s14   ;;  %s6982_s13 = sphi %s7017_s13, %s8928_s13   ;;  %s6978_s12 = sphi %s7015_s12, %s8927_s12  }
   0x4   : > { %s7040_s18 = sadd.s32 1, %s6990_s15   ;;  %s91_s19 = sadd.s32 1, %s6986_s14 }
   0x5   : > { %s88_s20 = ssub.s32 %s6990_s15, %s7040_s18  ;;  %p101_p0 = scmp.ne.s32.totalorder %s6986_s14, %s6982_s13 }
   0x6   : > { %p89_p1 = scmp.eq.s32.totalorder %s88_s20, 0  ;;  %p102_p2 = scmp.eq.s32.totalorder %s7036_s16, 1 }
   0x7   : > { %p107_p3 = scmp.ne.s32.totalorder %s6982_s13, %s6978_s12  ;;  %p108_p4 = scmp.eq.s32.totalorder %s5756_s17, 1 }
   0x8   : > { %s7051_s21 = scalar_select %p89_p1, %s6986_s14, %s91_s19  }
   0x9   : > { %p7053_p5 = por %p102_p2, %p101_p0  ;;  %p7057_p6 = por %p108_p4, %p107_p3 }
   0xa   : > { %p5759_p7 = scmp.ge.s32.totalorder %s6990_s15, 1  ;;  %p140_p8 = scmp.lt.s32.totalorder %s6990_s15, 3 }
   0xc   : > { %p141_p9 = pnand %p5759_p7, %p140_p8 }
   0xe   : > { %144 = sbr.rel (%p141_p9) target bundleno = 570 (0x23a), region = 32 }
  0x13   : > { %v266_v0 = vld [vmem:[%s8818_s1] sm:$0x3]  ;;  %vm396_vm0 = vcmask 1041408   ;;  %p164_p10 = scmp.lt.s32.totalorder %s7036_s16, 1  ;;  %v5794_v2 = vld [vmem:[%s8818_s1 + $0x2] sm:$0x3] }
  0x14   : > { %6831 = vmatprep.subr.msk.bf16.mxu1 %vm396_vm0, %v266_v0  ;;  %6830 = vmatprep.subr.msk.bf16.mxu0 %vm396_vm0, %v266_v0  ;;  %v398_v1 = vsel %vm396_vm0, %v266_v0, 0  ;;  %v5843_v3 = vld [vmem:[%s8818_s1 + $0x4] sm:$0x3]  ;;  %vm347_vm1 = vcmask 31744   ;;  %v5908_v8 = vld [vmem:[%s8818_s1 + $0x6] sm:$0x3] }
  0x15   : > { %6829 = vmatpush3.bf16.msra.mxu1 %v398_v1  ;;  %6523 = vmatpush3.bf16.msra.mxu0 %v398_v1  ;;  %s165_s30 = scalar_select %p164_p10, %s7036_s16, 1  ;;  %v1760_v7 = vsel %vm396_vm0, %v5843_v3, 0  ;;  %v1191_v10 = vsel %vm396_vm0, %v5794_v2, 0  ;;  %v5989_v11 = vld [vmem:[%s8818_s1 + $0x8] sm:$0x3]  ;;  %vm1514_vm2 = vcmask 1042432  }
  0x16   : > { %6832 = vmatprep.subr.msk.bf16.mxu1 %vm396_vm0, %v5794_v2  ;;  %6833 = vmatprep.subr.msk.bf16.mxu0 %vm396_vm0, %v5843_v3  ;;  %vm673_vm3 = vsmask.f32 3328  ;;  %vm674_vm4 = vsmask.f32 7440  ;;  %v7114_v18 = vld [vmem:[%s8818_s1 + $0xa] sm:$0x3] }
  0x17   : > { %s6840_s4 = smul.u32 216, %s165_s30  ;;  %vm1515_vm5 = vcmask 1046532   ;;  %v7119_v19 = vsel %vm396_vm0, %v5908_v8, 0  ;;  %v7124_v21 = vsel %vm396_vm0, %v5989_v11, 0  ;;  %v7130_v24 = vsel %vm396_vm0, %v7114_v18, 0  ;;  %vm7155_vm7 = vmor %vm673_vm3, %vm674_vm4  ;;  %s161_s29 = sand.u32 1, %s6982_s13  }
  0x18   : > { %vm7141_vm6 = vmor %vm1514_vm2, %vm1515_vm5  ;;  %s5760_s5 = sshll.u32 %s161_s29, 8  ;;  %s6992_s19 = smov [#allocation3]  }
  0x19   : > { %s7082_s7 = scalar_lea.vmem %s8817_s0, %s6840_s4  ;;  %s8647_s6 = scalar_lea.vmem [#allocation3], %s5760_s5 }
  0x1a   : > { %v6882_v4 = vld [vmem:[%s7082_s7] sm:$0xff]   ;;  %v6884_v6 = vld [vmem:[%s7082_s7 + $0xc] sm:$0xff]   ;;  %v6886_v12 = vld [vmem:[%s7082_s7 + $0x18] sm:$0xff]   ;;  %s5694_s8 = sshll.u32 %s8647_s6, 4  ;;  %s6934_s20 = sshll.u32 %s6992_s19, 4  ;;  %s8771_s8 = int_to_ptr.vmem [resolvable:$true] %s5694_s8  ;;  %s6935_s20 = int_to_ptr.vmem [resolvable:$false] %s6934_s20 }
  0x1b   : > { %v6883_v5 = vld [vmem:[%s7082_s7 + $0x60] sm:$0xff]   ;;  %6524 = vmatprep.mubr.msk.bf16.mxu0 %vm347_vm1, %v6882_v4  ;;  %v6885_v9 = vld [vmem:[%s7082_s7 + $0x6c] sm:$0xff]   ;;  %v6887_v13 = vld [vmem:[%s7082_s7 + $0x78] sm:$0xff]   ;;  %s6930_s17 = scalar_lea.vmem %s8771_s8, 4096  ;;  %s6936_s24 = scalar_lea.vmem %s6935_s20, 8192 }
  0x1c   : > { %6540 = vmatprep.mubr.msk.bf16.mxu1 %vm347_vm1, %v6883_v5  ;;  %6525 = vmatmul.mubr.msk.bf16.vlgmr.msra.gmra.mxu0 %vm347_vm1, %v6884_v6  ;;  %v6888_v14 = vld [vmem:[%s7082_s7 + $0x24] sm:$0xff]   ;;  %v6890_v16 = vld [vmem:[%s7082_s7 + $0x30] sm:$0xff]   ;;  %v6892_v20 = vld [vmem:[%s7082_s7 + $0x3c] sm:$0xff]   ;;  %p6931_p11 = scmp.ne.s32.totalorder %s8771_s8, %s6930_s17  ;;  %p6937_p0 = scmp.lt.s32.totalorder %s8771_s8, %s6935_s20 }
  0x1d   : > { %6541 = vmatmul.mubr.msk.bf16.vlgmr.msra.gmra.mxu1 %vm347_vm1, %v6885_v9  ;;  %6591 = vmatpush3.bf16.msra.mxu0 %v1760_v7  ;;  %v6889_v15 = vld [vmem:[%s7082_s7 + $0x84] sm:$0xff]   ;;  %v6891_v17 = vld [vmem:[%s7082_s7 + $0x90] sm:$0xff]   ;;  %v6893_v22 = vld [vmem:[%s7082_s7 + $0x9c] sm:$0xff]   ;;  %p6938_p1 = scmp.lt.s32.totalorder %s6936_s24, %s6930_s17 }
  0x1e   : > { %6557 = vmatpush3.bf16.msra.mxu1 %v1191_v10  ;;  %6528 = vmatprep.mubr.msk.bf16.mxu0 %vm347_vm1, %v6886_v12  ;;  %v6894_v23 = vld [vmem:[%s7082_s7 + $0x48] sm:$0xff]   ;;  %v625_v26 = vld [vmem:[%s7082_s7] sm:$0xf]  ;;  %v626_v27 = vld [vmem:[%s7082_s7 + $0x4] sm:$0xf]  ;;  %p6932_p12 = pnand %p6931_p11, %p7053_p5 }
  0x1f   : > { %6544 = vmatprep.mubr.msk.bf16.mxu1 %vm347_vm1, %v6887_v13  ;;  %6834 = vmatprep.subr.msk.bf16.mxu1 %vm396_vm0, %v5908_v8  ;;  %v6895_v25 = vld [vmem:[%s7082_s7 + $0xa8] sm:$0xff]   ;;  %v677_v29 = vshrl.u32 %v625_v26, 16  ;;  %v680_v30 = vshll.u32 %v625_v26, 16  ;;  %v686_v31 = vshll.u32 %v626_v27, 16  ;;  %v690_v32 = vshrl.u32 %v626_v27, 16  ;;  %v6896_v2 = vld [vmem:[%s7082_s7 + $0x54] sm:$0xff]   ;;  %p6939_p2 = por %p6938_p1, %p6937_p0 }
  0x20   : > { %6835 = vmatprep.subr.msk.bf16.mxu0 %vm396_vm0, %v5989_v11  ;;  %v627_v28 = vld [vmem:[%s7082_s7 + $0x8] sm:$0x1]  ;;  %v1418_v33 = vld [vmem:[%s7082_s7] sm:$0xe]  ;;  %v1419_v35 = vld [vmem:[%s7082_s7 + $0x4] sm:$0xf]  ;;  %p6933_p13 = pneg %p6932_p12 }
  0x21   : > { %v696_v34 = vshll.u32 %v627_v28, 16  ;;  %v1420_v36 = vld [vmem:[%s7082_s7 + $0x8] sm:$0x1]  ;;  %v5827_v37 = vrot.slane %v1418_v33, 9  ;;  %v679_v38 = vrot.slane %v677_v29, 4  ;;  %v682_v39 = vrot.slane %v680_v30, 5 }
  0x22   : > { %v688_v40 = vrot.slane %v686_v31, 5  ;;  %v692_v41 = vrot.slane %v690_v32, 4  ;;  %v628_v43 = vld [vmem:[%s7082_s7 + $0xc] sm:$0xf]  ;;  %v1519_v45 = vrot.slane %v1419_v35, 5  ;;  %v1522_v46 = vrot.slane %v1420_v36, 5  ;;  %p6940_p3 = pnand %p6939_p2, %p6933_p13 }
  0x23   : > { %v698_v44 = vrot.slane %v696_v34, 5  ;;  %v629_v47 = vld [vmem:[%s7082_s7 + $0x10] sm:$0xf]  ;;  %v701_v48 = vshrl.u32 %v628_v43, 16  ;;  %v683_v49 = vor.u32 %v682_v39, %v679_v38  ;;  %v630_v51 = vld [vmem:[%s7082_s7 + $0x14] sm:$0x1] }
  0x24   : > { %6529 = vmatmul.mubr.msk.bf16.gmra.mxu0 %vm347_vm1, %v6888_v14  ;;  %v693_v50 = vor.u32 %v692_v41, %v688_v40  ;;  %v704_v52 = vshll.u32 %v628_v43, 16  ;;  %v710_v53 = vshll.u32 %v629_v47, 16  ;;  %v1421_v54 = vld [vmem:[%s7082_s7 + $0xc] sm:$0xe]  ;;  %v1520_v56 = vsel %vm7141_vm6, %v5827_v37, %v1519_v45  ;;  %v1422_v60 = vld [vmem:[%s7082_s7 + $0x10] sm:$0xf] }
  0x25   : > { %6545 = vmatmul.mubr.msk.bf16.gmra.mxu1 %vm347_vm1, %v6889_v15  ;;  %6532 = vmatprep.mubr.msk.bf16.mxu0 %vm347_vm1, %v6890_v16  ;;  %v1521_v57 = vrot.slane %v1519_v45, 4  ;;  %v703_v58 = vrot.slane %v701_v48, 4  ;;  %v714_v59 = vshrl.u32 %v629_v47, 16  ;;  %v684_v61 = vrot.slane %v683_v49, 4  ;;  %v1423_v1 = vld [vmem:[%s7082_s7 + $0x14] sm:$0x1] }
  0x26   : > { %6548 = vmatprep.mubr.msk.bf16.mxu1 %vm347_vm1, %v6891_v17  ;;  %v694_v62 = vrot.slane %v693_v50, 4  ;;  %v706_v63 = vrot.slane %v704_v52, 5  ;;  %v712_v0 = vrot.slane %v710_v53, 5  ;;  %v720_v5 = vshll.u32 %v630_v51, 16  ;;  %v631_v7 = vld [vmem:[%s7082_s7 + $0x18] sm:$0xf] }
  0x27   : > { %v1523_v3 = vsel %vm7141_vm6, %v1521_v57, %v1522_v46  ;;  %v716_v4 = vrot.slane %v714_v59, 4  ;;  %v5828_v6 = vrot.slane %v1421_v54, 9  ;;  %v6897_v8 = vld [vmem:[%s7082_s7 + $0xb4] sm:$0xff]   ;;  %v689_v9 = vsel %vm7155_vm7, %v684_v61, %v688_v40  ;;  %v632_v13 = vld [vmem:[%s7082_s7 + $0x1c] sm:$0xf] }
  0x28   : > { %v699_v10 = vsel %vm7155_vm7, %v694_v62, %v698_v44  ;;  %v5844_v11 = vcombine.low %v1520_v56, %v1523_v3  ;;  %v707_v12 = vor.u32 %v706_v63, %v703_v58  ;;  %v722_v16 = vrot.slane %v720_v5, 5  ;;  %v1424_v27 = vld [vmem:[%s7082_s7 + $0x18] sm:$0xe]  ;;  %v1425_v32 = vld [vmem:[%s7082_s7 + $0x1c] sm:$0xf] }
  0x29   : > { %v5795_v14 = vcombine.low %v689_v9, %v699_v10  ;;  %v717_v15 = vor.u32 %v716_v4, %v712_v0  ;;  %v1526_v17 = vrot.slane %v1422_v60, 5  ;;  %v728_v26 = vshll.u32 %v631_v7, 16  ;;  %v1426_v37 = vld [vmem:[%s7082_s7 + $0x20] sm:$0x1]  ;;  %v634_v43 = vld [vmem:[%s7082_s7 + $0x24] sm:$0xf] }
  0x2a   : > { %v734_v31 = vshll.u32 %v632_v13, 16  ;;  %v738_v36 = vshrl.u32 %v632_v13, 16  ;;  %v635_v48 = vld [vmem:[%s7082_s7 + $0x28] sm:$0xf]  ;;  %v5829_v50 = vrot.slane %v1424_v27, 9  ;;  %v1533_v51 = vrot.slane %v1425_v32, 5 }
  0x2b   : > { %v718_v28 = vrot.slane %v717_v15, 4  ;;  %v1527_v29 = vsel %vm7141_vm6, %v5828_v6, %v1526_v17  ;;  %v1528_v30 = vrot.slane %v1526_v17, 4  ;;  %v730_v35 = vrot.slane %v728_v26, 5  ;;  %v636_v53 = vld [vmem:[%s7082_s7 + $0x2c] sm:$0x1] }
  0x2c   : > { %6533 = vmatmul.mubr.msk.bf16.gmra.mxu0 %vm347_vm1, %v6892_v20  ;;  %v633_v20 = vld [vmem:[%s7082_s7 + $0x20] sm:$0x1]  ;;  %v736_v40 = vrot.slane %v734_v31, 5  ;;  %v740_v47 = vrot.slane %v738_v36, 4  ;;  %v1536_v52 = vrot.slane %v1426_v37, 5  ;;  %v749_v57 = vshrl.u32 %v634_v43, 16 }
  0x2d   : > { %6549 = vmatmul.mubr.msk.bf16.gmra.mxu1 %vm347_vm1, %v6893_v22  ;;  %6536 = vmatprep.mubr.msk.bf16.mxu0 %vm347_vm1, %v6894_v23  ;;  %v708_v22 = vrot.slane %v707_v12, 4  ;;  %v1529_v23 = vrot.slane %v1423_v1, 5  ;;  %v723_v38 = vsel %vm7155_vm7, %v718_v28, %v722_v16  ;;  %v744_v41 = vshll.u32 %v633_v20, 16  ;;  %v1427_v59 = vld [vmem:[%s7082_s7 + $0x24] sm:$0xe] }
  0x2e   : > { %6552 = vmatprep.mubr.msk.bf16.mxu1 %vm347_vm1, %v6895_v25  ;;  %v725_v25 = vshrl.u32 %v631_v7, 16  ;;  %v741_v56 = vor.u32 %v740_v47, %v736_v40  ;;  %v752_v58 = vshll.u32 %v634_v43, 16  ;;  %v1534_v60 = vsel %vm7141_vm6, %v5829_v50, %v1533_v51  ;;  %v1429_v5 = vld [vmem:[%s7082_s7 + $0x2c] sm:$0x1]  ;;  %v637_v10 = vld [vmem:[%s7082_s7 + $0x30] sm:$0xf] }
  0x2f   : > { %v713_v33 = vsel %vm7155_vm7, %v708_v22, %v712_v0  ;;  %v1530_v39 = vsel %vm7141_vm6, %v1528_v30, %v1529_v23  ;;  %v746_v49 = vrot.slane %v744_v41, 5  ;;  %v1535_v61 = vrot.slane %v1533_v51, 4  ;;  %v1428_v0 = vld [vmem:[%s7082_s7 + $0x28] sm:$0xf]  ;;  %v638_v15 = vld [vmem:[%s7082_s7 + $0x34] sm:$0xf] }
  0x30   : > { %v727_v34 = vrot.slane %v725_v25, 4  ;;  %v5796_v44 = vcombine.low %v713_v33, %v723_v38  ;;  %v5845_v45 = vcombine.low %v1527_v29, %v1530_v39  ;;  %v758_v62 = vshll.u32 %v635_v48, 16  ;;  %v639_v23 = vld [vmem:[%s7082_s7 + $0x38] sm:$0x1]  ;;  %v1430_v28 = vld [vmem:[%s7082_s7 + $0x30] sm:$0xe] }
  0x31   : > { %v762_v63 = vshrl.u32 %v635_v48, 16  ;;  %v751_v3 = vrot.slane %v749_v57, 4  ;;  %v754_v4 = vrot.slane %v752_v58, 5  ;;  %v1537_v6 = vsel %vm7141_vm6, %v1535_v61, %v1536_v52  ;;  %v1431_v32 = vld [vmem:[%s7082_s7 + $0x34] sm:$0xf] }
  0x32   : > { %v731_v46 = vor.u32 %v730_v35, %v727_v34  ;;  %v760_v7 = vrot.slane %v758_v62, 5  ;;  %v768_v9 = vshll.u32 %v636_v53, 16  ;;  %v5846_v12 = vcombine.low %v1534_v60, %v1537_v6  ;;  %v1432_v37 = vld [vmem:[%s7082_s7 + $0x38] sm:$0x1]  ;;  %v640_v41 = vld [vmem:[%s7082_s7 + $0x3c] sm:$0xf] }
  0x33   : > { %v755_v13 = vor.u32 %v754_v4, %v751_v3  ;;  %v1540_v22 = vrot.slane %v1428_v0, 5  ;;  %v773_v26 = vshrl.u32 %v637_v10, 16  ;;  %v776_v27 = vshll.u32 %v637_v10, 16  ;;  %v641_v47 = vld [vmem:[%s7082_s7 + $0x40] sm:$0xf] }
  0x34   : > { %6537 = vmatmul.mubr.msk.bf16.gmra.mxu0 %vm347_vm1, %v6896_v2  ;;  %v732_v54 = vrot.slane %v731_v46, 4  ;;  %v742_v2 = vrot.slane %v741_v56, 4  ;;  %v770_v20 = vrot.slane %v768_v9, 5  ;;  %v782_v31 = vshll.u32 %v638_v15, 16  ;;  %v642_v52 = vld [vmem:[%s7082_s7 + $0x44] sm:$0x1] }
  0x35   : > { %6553 = vmatmul.mubr.msk.bf16.gmra.mxu1 %vm347_vm1, %v6897_v8  ;;  %6592 = vmatprep.mubr.msk.bf16.mxu0 %vm347_vm1, %v5844_v11  ;;  %v764_v8 = vrot.slane %v762_v63, 4  ;;  %v756_v25 = vrot.slane %v755_v13, 4  ;;  %v1542_v30 = vrot.slane %v1540_v22, 4  ;;  %v775_v34 = vrot.slane %v773_v26, 4  ;;  %v1433_v58 = vld [vmem:[%s7082_s7 + $0x3c] sm:$0xe] }
  0x36   : > { %6558 = vmatprep.mubr.msk.bf16.mxu1 %vm347_vm1, %v5795_v14  ;;  %v737_v1 = vsel %vm7155_vm7, %v732_v54, %v736_v40  ;;  %v747_v11 = vsel %vm7155_vm7, %v742_v2, %v746_v49  ;;  %v5830_v14 = vrot.slane %v1427_v59, 9  ;;  %v778_v35 = vrot.slane %v776_v27, 5  ;;  %v1434_v63 = vld [vmem:[%s7082_s7 + $0x40] sm:$0xf]  ;;  %v1435_v4 = vld [vmem:[%s7082_s7 + $0x44] sm:$0x1] }
  0x37   : > { %v5797_v16 = vcombine.low %v737_v1, %v747_v11  ;;  %v765_v17 = vor.u32 %v764_v8, %v760_v7  ;;  %v761_v33 = vsel %vm7155_vm7, %v756_v25, %v760_v7  ;;  %v786_v36 = vshrl.u32 %v638_v15, 16  ;;  %v643_v9 = vld [vmem:[%s7082_s7 + $0x48] sm:$0xf] }
  0x38   : > { %v1541_v29 = vsel %vm7141_vm6, %v5830_v14, %v1540_v22  ;;  %v784_v39 = vrot.slane %v782_v31, 5  ;;  %v792_v40 = vshll.u32 %v639_v23, 16  ;;  %v5831_v49 = vrot.slane %v1430_v28, 9  ;;  %v644_v14 = vld [vmem:[%s7082_s7 + $0x4c] sm:$0xf] }
  0x39   : > { %v788_v46 = vrot.slane %v786_v36, 4  ;;  %v1547_v50 = vrot.slane %v1431_v32, 5  ;;  %v1550_v51 = vrot.slane %v1432_v37, 5  ;;  %v797_v56 = vshrl.u32 %v640_v41, 16  ;;  %v645_v22 = vld [vmem:[%s7082_s7 + $0x50] sm:$0x1] }
  0x3a   : > { %v794_v48 = vrot.slane %v792_v40, 5  ;;  %v800_v57 = vshll.u32 %v640_v41, 16  ;;  %v806_v61 = vshll.u32 %v641_v47, 16  ;;  %v810_v62 = vshrl.u32 %v641_v47, 16  ;;  %v1436_v27 = vld [vmem:[%s7082_s7 + $0x48] sm:$0xe] }
  0x3b   : > { %v789_v54 = vor.u32 %v788_v46, %v784_v39  ;;  %v1548_v59 = vsel %vm7141_vm6, %v5831_v49, %v1547_v50  ;;  %v1549_v60 = vrot.slane %v1547_v50, 4  ;;  %v799_v2 = vrot.slane %v797_v56, 4  ;;  %v1437_v31 = vld [vmem:[%s7082_s7 + $0x4c] sm:$0xf]  ;;  %v1438_v36 = vld [vmem:[%s7082_s7 + $0x50] sm:$0x1] }
  0x3c   : > { %6593 = vmatmul.mubr.msk.bf16.vlgmr.msra.gmra.mxu0 %vm347_vm1, %v5845_v45  ;;  %v779_v45 = vor.u32 %v778_v35, %v775_v34  ;;  %v802_v3 = vrot.slane %v800_v57, 5  ;;  %v808_v6 = vrot.slane %v806_v61, 5  ;;  %v812_v7 = vrot.slane %v810_v62, 4  ;;  %v646_v40 = vld [vmem:[%s7082_s7 + $0x54] sm:$0xf] }
  0x3d   : > { %6559 = vmatmul.mubr.msk.bf16.vlgmr.msra.gmra.mxu1 %vm347_vm1, %v5796_v44  ;;  %6659 = vmatpush3.bf16.msra.mxu0 %v7124_v21  ;;  %v1543_v21 = vrot.slane %v1429_v5, 5  ;;  %v790_v1 = vrot.slane %v789_v54, 4  ;;  %v1551_v5 = vsel %vm7141_vm6, %v1549_v60, %v1550_v51  ;;  %v816_v8 = vshll.u32 %v642_v52, 16  ;;  %v647_v46 = vld [vmem:[%s7082_s7 + $0x58] sm:$0xf] }
  0x3e   : > { %6625 = vmatpush3.bf16.msra.mxu1 %v7119_v19  ;;  %6596 = vmatprep.mubr.msk.bf16.mxu0 %vm347_vm1, %v5846_v12  ;;  %v766_v19 = vrot.slane %v765_v17, 4  ;;  %v780_v53 = vrot.slane %v779_v45, 4  ;;  %v5848_v11 = vcombine.low %v1548_v59, %v1551_v5  ;;  %v803_v12 = vor.u32 %v802_v3, %v799_v2  ;;  %v648_v51 = vld [vmem:[%s7082_s7 + $0x5c] sm:$0x1]  ;;  %v1439_v57 = vld [vmem:[%s7082_s7 + $0x54] sm:$0xe] }
  0x3f   : > { %6836 = vmatprep.subr.msk.bf16.mxu1 %vm396_vm0, %v7114_v18  ;;  %6562 = vmatprep.mubr.msk.bf16.mxu1 %vm347_vm1, %v5797_v16  ;;  %v1544_v38 = vsel %vm7141_vm6, %v1542_v30, %v1543_v21  ;;  %v795_v10 = vsel %vm7155_vm7, %v790_v1, %v794_v48  ;;  %v5832_v13 = vrot.slane %v1433_v58, 9  ;;  %v813_v16 = vor.u32 %v812_v7, %v808_v6  ;;  %v1440_v62 = vld [vmem:[%s7082_s7 + $0x58] sm:$0xf]  ;;  %v1441_v3 = vld [vmem:[%s7082_s7 + $0x5c] sm:$0x1] }
  0x40   : > { %v771_v18 = vsel %vm7155_vm7, %v766_v19, %v770_v20  ;;  %v5847_v44 = vcombine.low %v1541_v29, %v1544_v38  ;;  %v785_v0 = vsel %vm7155_vm7, %v780_v53, %v784_v39  ;;  %v818_v17 = vrot.slane %v816_v8, 5  ;;  %v649_v8 = vld [vmem:[%s7082_s7 + $0x60] sm:$0xf] }
  0x41   : > { %v5798_v43 = vcombine.low %v761_v33, %v771_v18  ;;  %v5799_v15 = vcombine.low %v785_v0, %v795_v10  ;;  %v1554_v20 = vrot.slane %v1434_v63, 5  ;;  %v804_v23 = vrot.slane %v803_v12, 4 }
  0x42   : > { %v1557_v25 = vrot.slane %v1435_v4, 5  ;;  %v821_v21 = vshrl.u32 %v643_v9, 16  ;;  %v824_v26 = vshll.u32 %v643_v9, 16  ;;  %v814_v28 = vrot.slane %v813_v16, 4 }
  0x43   : > { %v1555_v19 = vsel %vm7141_vm6, %v5832_v13, %v1554_v20  ;;  %v1556_v29 = vrot.slane %v1554_v20, 4  ;;  %v830_v30 = vshll.u32 %v644_v14, 16  ;;  %v809_v32 = vsel %vm7155_vm7, %v804_v23, %v808_v6  ;;  %v650_v13 = vld [vmem:[%s7082_s7 + $0x64] sm:$0xf]  ;;  %v651_v20 = vld [vmem:[%s7082_s7 + $0x68] sm:$0x1] }
  0x44   : > { %6597 = vmatmul.mubr.msk.bf16.gmra.mxu0 %vm347_vm1, %v5847_v44  ;;  %v823_v33 = vrot.slane %v821_v21, 4  ;;  %v826_v34 = vrot.slane %v824_v26, 5  ;;  %v834_v35 = vshrl.u32 %v644_v14, 16  ;;  %v819_v37 = vsel %vm7155_vm7, %v814_v28, %v818_v17  ;;  %v1442_v26 = vld [vmem:[%s7082_s7 + $0x60] sm:$0xe] }
  0x45   : > { %6563 = vmatmul.mubr.msk.bf16.gmra.mxu1 %vm347_vm1, %v5798_v43  ;;  %6600 = vmatprep.mubr.msk.bf16.mxu0 %vm347_vm1, %v5848_v11  ;;  %v1558_v18 = vsel %vm7141_vm6, %v1556_v29, %v1557_v25  ;;  %v832_v38 = vrot.slane %v830_v30, 5  ;;  %v840_v39 = vshll.u32 %v645_v22, 16  ;;  %v5800_v41 = vcombine.low %v809_v32, %v819_v37  ;;  %v1443_v30 = vld [vmem:[%s7082_s7 + $0x64] sm:$0xf] }
  0x46   : > { %6566 = vmatprep.mubr.msk.bf16.mxu1 %vm347_vm1, %v5799_v15  ;;  %v5849_v43 = vcombine.low %v1555_v19, %v1558_v18  ;;  %v827_v44 = vor.u32 %v826_v34, %v823_v33  ;;  %v836_v45 = vrot.slane %v834_v35, 4  ;;  %v5833_v48 = vrot.slane %v1436_v27, 9  ;;  %v1444_v35 = vld [vmem:[%s7082_s7 + $0x68] sm:$0x1] }
  0x47   : > { %v842_v47 = vrot.slane %v840_v39, 5  ;;  %v1561_v49 = vrot.slane %v1437_v31, 5  ;;  %v1564_v50 = vrot.slane %v1438_v36, 5  ;;  %v845_v54 = vshrl.u32 %v646_v40, 16  ;;  %v652_v39 = vld [vmem:[%s7082_s7 + $0x6c] sm:$0xf] }
  0x48   : > { %v828_v52 = vrot.slane %v827_v44, 4  ;;  %v837_v53 = vor.u32 %v836_v45, %v832_v38  ;;  %v848_v56 = vshll.u32 %v646_v40, 16  ;;  %v854_v60 = vshll.u32 %v647_v46, 16  ;;  %v653_v45 = vld [vmem:[%s7082_s7 + $0x70] sm:$0xf] }
  0x49   : > { %v1562_v58 = vsel %vm7141_vm6, %v5833_v48, %v1561_v49  ;;  %v1563_v59 = vrot.slane %v1561_v49, 4  ;;  %v858_v61 = vshrl.u32 %v647_v46, 16  ;;  %v847_v1 = vrot.slane %v845_v54, 4 }
  0x4a   : > { %v833_v63 = vsel %vm7155_vm7, %v828_v52, %v832_v38  ;;  %v838_v0 = vrot.slane %v837_v53, 4  ;;  %v850_v2 = vrot.slane %v848_v56, 5  ;;  %v856_v5 = vrot.slane %v854_v60, 5  ;;  %v1445_v56 = vld [vmem:[%s7082_s7 + $0x6c] sm:$0xe] }
  0x4b   : > { %v1565_v4 = vsel %vm7141_vm6, %v1563_v59, %v1564_v50  ;;  %v860_v6 = vrot.slane %v858_v61, 4  ;;  %v864_v7 = vshll.u32 %v648_v51, 16  ;;  %v5834_v12 = vrot.slane %v1439_v57, 9  ;;  %v654_v50 = vld [vmem:[%s7082_s7 + $0x74] sm:$0x1] }
  0x4c   : > { %6601 = vmatmul.mubr.msk.bf16.gmra.mxu0 %vm347_vm1, %v5849_v43  ;;  %v843_v9 = vsel %vm7155_vm7, %v838_v0, %v842_v47  ;;  %v5850_v10 = vcombine.low %v1562_v58, %v1565_v4  ;;  %v851_v11 = vor.u32 %v850_v2, %v847_v1  ;;  %v1568_v17 = vrot.slane %v1440_v62, 5  ;;  %v1446_v61 = vld [vmem:[%s7082_s7 + $0x70] sm:$0xf]  ;;  %v1447_v2 = vld [vmem:[%s7082_s7 + $0x74] sm:$0x1] }
  0x4d   : > { %6567 = vmatmul.mubr.msk.bf16.gmra.mxu1 %vm347_vm1, %v5800_v41  ;;  %v5801_v14 = vcombine.low %v833_v63, %v843_v9  ;;  %v861_v15 = vor.u32 %v860_v6, %v856_v5  ;;  %v866_v16 = vrot.slane %v864_v7, 5  ;;  %v1571_v23 = vrot.slane %v1441_v3, 5  ;;  %v655_v7 = vld [vmem:[%s7082_s7 + $0x78] sm:$0xf] }
  0x4e   : > { %6604 = vmatprep.mubr.msk.bf16.mxu0 %vm347_vm1, %v5850_v10  ;;  %v852_v22 = vrot.slane %v851_v11, 4  ;;  %v869_v25 = vshrl.u32 %v649_v8, 16  ;;  %v872_v21 = vshll.u32 %v649_v8, 16  ;;  %v1569_v28 = vsel %vm7141_vm6, %v5834_v12, %v1568_v17  ;;  %v656_v12 = vld [vmem:[%s7082_s7 + $0x7c] sm:$0xf] }
  0x4f   : > { %6570 = vmatprep.mubr.msk.bf16.mxu1 %vm347_vm1, %v5801_v14  ;;  %v862_v27 = vrot.slane %v861_v15, 4  ;;  %v1570_v19 = vrot.slane %v1568_v17, 4  ;;  %v878_v29 = vshll.u32 %v650_v13, 16  ;;  %v882_v34 = vshrl.u32 %v650_v13, 16  ;;  %v657_v17 = vld [vmem:[%s7082_s7 + $0x80] sm:$0x1] }
  0x50   : > { %v857_v31 = vsel %vm7155_vm7, %v852_v22, %v856_v5  ;;  %v871_v32 = vrot.slane %v869_v25, 4  ;;  %v874_v33 = vrot.slane %v872_v21, 5  ;;  %v888_v38 = vshll.u32 %v651_v20, 16  ;;  %v1448_v21 = vld [vmem:[%s7082_s7 + $0x78] sm:$0xe] }
  0x51   : > { %v867_v36 = vsel %vm7155_vm7, %v862_v27, %v866_v16  ;;  %v1572_v37 = vsel %vm7141_vm6, %v1570_v19, %v1571_v23  ;;  %v880_v18 = vrot.slane %v878_v29, 5  ;;  %v884_v44 = vrot.slane %v882_v34, 4  ;;  %v1449_v29 = vld [vmem:[%s7082_s7 + $0x7c] sm:$0xf]  ;;  %v1450_v34 = vld [vmem:[%s7082_s7 + $0x80] sm:$0x1] }
  0x52   : > { %v5802_v40 = vcombine.low %v857_v31, %v867_v36  ;;  %v5851_v41 = vcombine.low %v1569_v28, %v1572_v37  ;;  %v875_v43 = vor.u32 %v874_v33, %v871_v32  ;;  %v890_v46 = vrot.slane %v888_v38, 5  ;;  %v658_v38 = vld [vmem:[%s7082_s7 + $0x84] sm:$0xf] }
  0x53   : > { %v5835_v47 = vrot.slane %v1442_v26, 9  ;;  %v1575_v48 = vrot.slane %v1443_v30, 5  ;;  %v1578_v49 = vrot.slane %v1444_v35, 5  ;;  %v885_v52 = vor.u32 %v884_v44, %v880_v18  ;;  %v659_v44 = vld [vmem:[%s7082_s7 + $0x88] sm:$0xf] }
  0x54   : > { %6605 = vmatmul.mubr.msk.bf16.gmra.mxu0 %vm347_vm1, %v5851_v41  ;;  %v876_v51 = vrot.slane %v875_v43, 4  ;;  %v893_v53 = vshrl.u32 %v652_v39, 16  ;;  %v896_v54 = vshll.u32 %v652_v39, 16  ;;  %v902_v59 = vshll.u32 %v653_v45, 16 }
  0x55   : > { %6571 = vmatmul.mubr.msk.bf16.gmra.mxu1 %vm347_vm1, %v5802_v40  ;;  %v1576_v57 = vsel %vm7141_vm6, %v5835_v47, %v1575_v48  ;;  %v1577_v58 = vrot.slane %v1575_v48, 4  ;;  %v906_v60 = vshrl.u32 %v653_v45, 16  ;;  %v886_v63 = vrot.slane %v885_v52, 4 }
  0x56   : > { %v881_v62 = vsel %vm7155_vm7, %v876_v51, %v880_v18  ;;  %v895_v0 = vrot.slane %v893_v53, 4  ;;  %v898_v1 = vrot.slane %v896_v54, 5  ;;  %v904_v4 = vrot.slane %v902_v59, 5  ;;  %v1451_v54 = vld [vmem:[%s7082_s7 + $0x84] sm:$0xe] }
  0x57   : > { %v1579_v3 = vsel %vm7141_vm6, %v1577_v58, %v1578_v49  ;;  %v908_v5 = vrot.slane %v906_v60, 4  ;;  %v912_v6 = vshll.u32 %v654_v50, 16  ;;  %v891_v8 = vsel %vm7155_vm7, %v886_v63, %v890_v46  ;;  %v660_v49 = vld [vmem:[%s7082_s7 + $0x8c] sm:$0x1]  ;;  %v1452_v60 = vld [vmem:[%s7082_s7 + $0x88] sm:$0xf] }
  0x58   : > { %v5852_v9 = vcombine.low %v1576_v57, %v1579_v3  ;;  %v899_v10 = vor.u32 %v898_v1, %v895_v0  ;;  %v5836_v11 = vrot.slane %v1445_v56, 9  ;;  %v5803_v13 = vcombine.low %v881_v62, %v891_v8  ;;  %v1453_v1 = vld [vmem:[%s7082_s7 + $0x8c] sm:$0x1] }
  0x59   : > { %v909_v14 = vor.u32 %v908_v5, %v904_v4  ;;  %v914_v15 = vrot.slane %v912_v6, 5  ;;  %v1582_v16 = vrot.slane %v1446_v61, 5  ;;  %v1585_v22 = vrot.slane %v1447_v2, 5  ;;  %v661_v6 = vld [vmem:[%s7082_s7 + $0x90] sm:$0xf] }
  0x5a   : > { %6608 = vmatprep.mubr.msk.bf16.mxu0 %vm347_vm1, %v5852_v9  ;;  %v900_v20 = vrot.slane %v899_v10, 4  ;;  %v917_v23 = vshrl.u32 %v655_v7, 16  ;;  %v920_v25 = vshll.u32 %v655_v7, 16  ;;  %6574 = vmatprep.mubr.msk.bf16.mxu1 %vm347_vm1, %v5803_v13  ;;  %v926_v19 = vshll.u32 %v656_v12, 16 }
  0x5b   : > { %v910_v26 = vrot.slane %v909_v14, 4  ;;  %v1583_v27 = vsel %vm7141_vm6, %v5836_v11, %v1582_v16  ;;  %v1584_v28 = vrot.slane %v1582_v16, 4  ;;  %v930_v33 = vshrl.u32 %v656_v12, 16  ;;  %v662_v11 = vld [vmem:[%s7082_s7 + $0x94] sm:$0xf] }
  0x5c   : > { %v905_v30 = vsel %vm7155_vm7, %v900_v20, %v904_v4  ;;  %v919_v31 = vrot.slane %v917_v23, 4  ;;  %v922_v32 = vrot.slane %v920_v25, 5  ;;  %v928_v37 = vrot.slane %v926_v19, 5  ;;  %v663_v12 = vld [vmem:[%s7082_s7 + $0x98] sm:$0x1] }
  0x5d   : > { %v915_v35 = vsel %vm7155_vm7, %v910_v26, %v914_v15  ;;  %v1586_v36 = vsel %vm7141_vm6, %v1584_v28, %v1585_v22  ;;  %v936_v18 = vshll.u32 %v657_v17, 16  ;;  %v932_v43 = vrot.slane %v930_v33, 4  ;;  %v1454_v25 = vld [vmem:[%s7082_s7 + $0x90] sm:$0xe] }
  0x5e   : > { %v5804_v39 = vcombine.low %v905_v30, %v915_v35  ;;  %v5853_v40 = vcombine.low %v1583_v27, %v1586_v36  ;;  %v923_v41 = vor.u32 %v922_v32, %v919_v31  ;;  %v5837_v46 = vrot.slane %v1448_v21, 9  ;;  %v1455_v21 = vld [vmem:[%s7082_s7 + $0x94] sm:$0xf] }
  0x5f   : > { %v938_v45 = vrot.slane %v936_v18, 5  ;;  %v1589_v47 = vrot.slane %v1449_v29, 5  ;;  %v1592_v48 = vrot.slane %v1450_v34, 5  ;;  %v933_v51 = vor.u32 %v932_v43, %v928_v37  ;;  %v1456_v29 = vld [vmem:[%s7082_s7 + $0x98] sm:$0x1] }
  0x60   : > { %6575 = vmatmul.mubr.msk.bf16.gmra.mxu1 %vm347_vm1, %v5804_v39  ;;  %6609 = vmatmul.mubr.msk.bf16.gmra.mxu0 %vm347_vm1, %v5853_v40  ;;  %v924_v50 = vrot.slane %v923_v41, 4  ;;  %v941_v52 = vshrl.u32 %v658_v38, 16  ;;  %v944_v53 = vshll.u32 %v658_v38, 16  ;;  %v950_v58 = vshll.u32 %v659_v44, 16  ;;  %v664_v34 = vld [vmem:[%s7082_s7 + $0x9c] sm:$0xf] }
  0x61   : > { %v1590_v56 = vsel %vm7141_vm6, %v5837_v46, %v1589_v47  ;;  %v1591_v57 = vrot.slane %v1589_v47, 4  ;;  %v954_v59 = vshrl.u32 %v659_v44, 16  ;;  %v934_v62 = vrot.slane %v933_v51, 4  ;;  %v665_v43 = vld [vmem:[%s7082_s7 + $0xa0] sm:$0xf] }
  0x62   : > { %v929_v61 = vsel %vm7155_vm7, %v924_v50, %v928_v37  ;;  %v943_v63 = vrot.slane %v941_v52, 4  ;;  %v946_v0 = vrot.slane %v944_v53, 5  ;;  %v952_v3 = vrot.slane %v950_v58, 5  ;;  %v666_v44 = vld [vmem:[%s7082_s7 + $0xa4] sm:$0x1] }
  0x63   : > { %v1593_v2 = vsel %vm7141_vm6, %v1591_v57, %v1592_v48  ;;  %v956_v4 = vrot.slane %v954_v59, 4  ;;  %v960_v5 = vshll.u32 %v660_v49, 16  ;;  %v939_v7 = vsel %vm7155_vm7, %v934_v62, %v938_v45  ;;  %v1457_v49 = vld [vmem:[%s7082_s7 + $0x9c] sm:$0xe] }
  0x64   : > { %v5854_v8 = vcombine.low %v1590_v56, %v1593_v2  ;;  %v947_v9 = vor.u32 %v946_v0, %v943_v63  ;;  %v5838_v10 = vrot.slane %v1451_v54, 9  ;;  %v5805_v13 = vcombine.low %v929_v61, %v939_v7  ;;  %v1458_v54 = vld [vmem:[%s7082_s7 + $0xa0] sm:$0xf]  ;;  %v7363_v56 = vld [vmem:[%s8818_s1 + $0xc] sm:$0x3] }
  0x65   : > { %v957_v14 = vor.u32 %v956_v4, %v952_v3  ;;  %v962_v15 = vrot.slane %v960_v5, 5  ;;  %v1596_v16 = vrot.slane %v1452_v60, 5  ;;  %v1599_v20 = vrot.slane %v1453_v1, 5  ;;  %v1459_v61 = vld [vmem:[%s7082_s7 + $0xa4] sm:$0x1]  ;;  %6837 = vmatprep.subr.msk.bf16.mxu0 %vm396_vm0, %v7363_v56 }
  0x66   : > { %6612 = vmatprep.mubr.msk.bf16.mxu0 %vm347_vm1, %v5854_v8  ;;  %v948_v17 = vrot.slane %v947_v9, 4  ;;  %v965_v22 = vshrl.u32 %v661_v6, 16  ;;  %v968_v23 = vshll.u32 %v661_v6, 16  ;;  %6578 = vmatprep.mubr.msk.bf16.mxu1 %vm347_vm1, %v5805_v13  ;;  %v974_v19 = vshll.u32 %v662_v11, 16  ;;  %v667_v6 = vld [vmem:[%s7082_s7 + $0xa8] sm:$0xf] }
  0x67   : > { %v958_v26 = vrot.slane %v957_v14, 4  ;;  %v1597_v27 = vsel %vm7141_vm6, %v5838_v10, %v1596_v16  ;;  %v1598_v28 = vrot.slane %v1596_v16, 4  ;;  %v978_v33 = vshrl.u32 %v662_v11, 16  ;;  %v668_v11 = vld [vmem:[%s7082_s7 + $0xac] sm:$0xf] }
  0x68   : > { %v953_v30 = vsel %vm7155_vm7, %v948_v17, %v952_v3  ;;  %v967_v31 = vrot.slane %v965_v22, 4  ;;  %v970_v32 = vrot.slane %v968_v23, 5  ;;  %v976_v37 = vrot.slane %v974_v19, 5 }
  0x69   : > { %v963_v35 = vsel %vm7155_vm7, %v958_v26, %v962_v15  ;;  %v1600_v36 = vsel %vm7141_vm6, %v1598_v28, %v1599_v20  ;;  %v984_v18 = vshll.u32 %v663_v12, 16  ;;  %v980_v41 = vrot.slane %v978_v33, 4  ;;  %v669_v12 = vld [vmem:[%s7082_s7 + $0xb0] sm:$0x1] }
  0x6a   : > { %v5806_v38 = vcombine.low %v953_v30, %v963_v35  ;;  %v5855_v39 = vcombine.low %v1597_v27, %v1600_v36  ;;  %v971_v40 = vor.u32 %v970_v32, %v967_v31  ;;  %v5839_v46 = vrot.slane %v1454_v25, 9  ;;  %v1460_v25 = vld [vmem:[%s7082_s7 + $0xa8] sm:$0xe] }
  0x6b   : > { %v986_v45 = vrot.slane %v984_v18, 5  ;;  %v1603_v47 = vrot.slane %v1455_v21, 5  ;;  %v1606_v48 = vrot.slane %v1456_v29, 5  ;;  %v981_v51 = vor.u32 %v980_v41, %v976_v37  ;;  %v1461_v21 = vld [vmem:[%s7082_s7 + $0xac] sm:$0xf] }
  0x6c   : > { %6579 = vmatmul.mubr.msk.bf16.gmra.mxu1 %vm347_vm1, %v5806_v38  ;;  %6613 = vmatmul.mubr.msk.bf16.gmra.mxu0 %vm347_vm1, %v5855_v39  ;;  %v972_v50 = vrot.slane %v971_v40, 4  ;;  %v989_v52 = vshrl.u32 %v664_v34, 16  ;;  %v992_v53 = vshll.u32 %v664_v34, 16  ;;  %v998_v59 = vshll.u32 %v665_v43, 16  ;;  %v1462_v29 = vld [vmem:[%s7082_s7 + $0xb0] sm:$0x1] }
  0x6d   : > { %v1604_v57 = vsel %vm7141_vm6, %v5839_v46, %v1603_v47  ;;  %v1605_v58 = vrot.slane %v1603_v47, 4  ;;  %v1002_v60 = vshrl.u32 %v665_v43, 16  ;;  %v982_v63 = vrot.slane %v981_v51, 4  ;;  %v670_v34 = vld [vmem:[%s7082_s7 + $0xb4] sm:$0xf] }
  0x6e   : > { %v977_v62 = vsel %vm7155_vm7, %v972_v50, %v976_v37  ;;  %v991_v0 = vrot.slane %v989_v52, 4  ;;  %v994_v1 = vrot.slane %v992_v53, 5  ;;  %v1000_v3 = vrot.slane %v998_v59, 5  ;;  %v671_v43 = vld [vmem:[%s7082_s7 + $0xb8] sm:$0xf] }
  0x6f   : > { %v1607_v2 = vsel %vm7141_vm6, %v1605_v58, %v1606_v48  ;;  %v1004_v4 = vrot.slane %v1002_v60, 4  ;;  %v1008_v5 = vshll.u32 %v666_v44, 16  ;;  %v987_v7 = vsel %vm7155_vm7, %v982_v63, %v986_v45  ;;  %v672_v44 = vld [vmem:[%s7082_s7 + $0xbc] sm:$0x1] }
  0x70   : > { %v5856_v8 = vcombine.low %v1604_v57, %v1607_v2  ;;  %v995_v9 = vor.u32 %v994_v1, %v991_v0  ;;  %v5840_v10 = vrot.slane %v1457_v49, 9  ;;  %v5807_v13 = vcombine.low %v977_v62, %v987_v7  ;;  %v1463_v49 = vld [vmem:[%s7082_s7 + $0xb4] sm:$0xe]  ;;  %v1465_v1 = vld [vmem:[%s7082_s7 + $0xbc] sm:$0x1] }
  0x71   : > { %v1005_v14 = vor.u32 %v1004_v4, %v1000_v3  ;;  %v1010_v15 = vrot.slane %v1008_v5, 5  ;;  %v1610_v16 = vrot.slane %v1458_v54, 5  ;;  %v1613_v20 = vrot.slane %v1459_v61, 5  ;;  %v1464_v54 = vld [vmem:[%s7082_s7 + $0xb8] sm:$0xf] }
  0x72   : > { %6616 = vmatprep.mubr.msk.bf16.mxu0 %vm347_vm1, %v5856_v8  ;;  %v996_v17 = vrot.slane %v995_v9, 4  ;;  %v1013_v22 = vshrl.u32 %v667_v6, 16  ;;  %v1016_v23 = vshll.u32 %v667_v6, 16  ;;  %6582 = vmatprep.mubr.msk.bf16.mxu1 %vm347_vm1, %v5807_v13  ;;  %v1022_v19 = vshll.u32 %v668_v11, 16  ;;  %v5941_v6 = vld [vmem:[%s7082_s7 + $0xc] sm:$0xf] }
  0x73   : > { %v1006_v26 = vrot.slane %v1005_v14, 4  ;;  %v1611_v27 = vsel %vm7141_vm6, %v5840_v10, %v1610_v16  ;;  %v1612_v28 = vrot.slane %v1610_v16, 4  ;;  %v1026_v33 = vshrl.u32 %v668_v11, 16  ;;  %v5942_v11 = vld [vmem:[%s7082_s7 + $0x10] sm:$0xf] }
  0x74   : > { %v1001_v30 = vsel %vm7155_vm7, %v996_v17, %v1000_v3  ;;  %v1015_v31 = vrot.slane %v1013_v22, 4  ;;  %v1018_v32 = vrot.slane %v1016_v23, 5  ;;  %v1024_v37 = vrot.slane %v1022_v19, 5  ;;  %v5943_v16 = vld [vmem:[%s7082_s7 + $0x14] sm:$0x1] }
  0x75   : > { %v1011_v35 = vsel %vm7155_vm7, %v1006_v26, %v1010_v15  ;;  %v1614_v36 = vsel %vm7141_vm6, %v1612_v28, %v1613_v20  ;;  %v1032_v18 = vshll.u32 %v669_v12, 16  ;;  %v1028_v41 = vrot.slane %v1026_v33, 4  ;;  %v5945_v19 = vld [vmem:[%s7082_s7 + $0x1c] sm:$0xf] }
  0x76   : > { %v5808_v38 = vcombine.low %v1001_v30, %v1011_v35  ;;  %v5857_v39 = vcombine.low %v1611_v27, %v1614_v36  ;;  %v1019_v40 = vor.u32 %v1018_v32, %v1015_v31  ;;  %v5841_v46 = vrot.slane %v1460_v25, 9  ;;  %v5944_v25 = vld [vmem:[%s7082_s7 + $0x18] sm:$0xf]  ;;  %v6898_v30 = vld [vmem:[%s7082_s7 + $0xc] sm:$0xff]  }
  0x77   : > { %v1034_v45 = vrot.slane %v1032_v18, 5  ;;  %v1617_v47 = vrot.slane %v1461_v21, 5  ;;  %v1620_v48 = vrot.slane %v1462_v29, 5  ;;  %v1029_v51 = vor.u32 %v1028_v41, %v1024_v37  ;;  %v5946_v18 = vld [vmem:[%s7082_s7 + $0x20] sm:$0x1] }
  0x78   : > { %6583 = vmatmul.mubr.msk.bf16.gmra.mxu1 %vm347_vm1, %v5808_v38  ;;  %6617 = vmatmul.mubr.msk.bf16.gmra.mxu0 %vm347_vm1, %v5857_v39  ;;  %v1020_v50 = vrot.slane %v1019_v40, 4  ;;  %v1037_v52 = vshrl.u32 %v670_v34, 16  ;;  %v1040_v53 = vshll.u32 %v670_v34, 16  ;;  %v1046_v59 = vshll.u32 %v671_v43, 16 }
  0x79   : > { %v1618_v57 = vsel %vm7141_vm6, %v5841_v46, %v1617_v47  ;;  %v1619_v58 = vrot.slane %v1617_v47, 4  ;;  %v1050_v60 = vshrl.u32 %v671_v43, 16  ;;  %v1030_v62 = vrot.slane %v1029_v51, 4  ;;  %v5947_v43 = vld [vmem:[%s7082_s7 + $0x24] sm:$0xf] }
  0x7a   : > { %v1025_v61 = vsel %vm7155_vm7, %v1020_v50, %v1024_v37  ;;  %v1039_v63 = vrot.slane %v1037_v52, 4  ;;  %v1042_v0 = vrot.slane %v1040_v53, 5  ;;  %v1048_v3 = vrot.slane %v1046_v59, 5  ;;  %v5949_v59 = vld [vmem:[%s7082_s7 + $0x2c] sm:$0x1] }
  0x7b   : > { %v1621_v2 = vsel %vm7141_vm6, %v1619_v58, %v1620_v48  ;;  %v1052_v4 = vrot.slane %v1050_v60, 4  ;;  %v1056_v5 = vshll.u32 %v672_v44, 16  ;;  %v1035_v7 = vsel %vm7155_vm7, %v1030_v62, %v1034_v45  ;;  %v5948_v44 = vld [vmem:[%s7082_s7 + $0x28] sm:$0xf] }
  0x7c   : > { %v5858_v8 = vcombine.low %v1618_v57, %v1621_v2  ;;  %v1043_v9 = vor.u32 %v1042_v0, %v1039_v63  ;;  %v5842_v10 = vrot.slane %v1463_v49, 9  ;;  %v5809_v12 = vcombine.low %v1025_v61, %v1035_v7  ;;  %v6899_v0 = vld [vmem:[%s7082_s7 + $0x18] sm:$0xff]  }
  0x7d   : > { %v1053_v13 = vor.u32 %v1052_v4, %v1048_v3  ;;  %v1058_v14 = vrot.slane %v1056_v5, 5  ;;  %v1624_v15 = vrot.slane %v1464_v54, 5  ;;  %v1627_v20 = vrot.slane %v1465_v1, 5  ;;  %v5950_v5 = vld [vmem:[%s7082_s7 + $0x30] sm:$0xf] }
  0x7e   : > { %6620 = vmatprep.mubr.msk.bf16.mxu0 %vm347_vm1, %v5858_v8  ;;  %v1044_v17 = vrot.slane %v1043_v9, 4  ;;  %v2459_v22 = vshrl.u32 %v5941_v6, 16  ;;  %v2462_v23 = vshll.u32 %v5941_v6, 16  ;;  %6586 = vmatprep.mubr.msk.bf16.mxu1 %vm347_vm1, %v5809_v12  ;;  %v2468_v28 = vshll.u32 %v5942_v11, 16 }
  0x7f   : > { %v1054_v21 = vrot.slane %v1053_v13, 4  ;;  %v1625_v26 = vsel %vm7141_vm6, %v5842_v10, %v1624_v15  ;;  %v1626_v27 = vrot.slane %v1624_v15, 4  ;;  %v2472_v33 = vshrl.u32 %v5942_v11, 16  ;;  %v6900_v11 = vld [vmem:[%s7082_s7 + $0x24] sm:$0xff]  }
  0x80   : > { %v1049_v29 = vsel %vm7155_vm7, %v1044_v17, %v1048_v3  ;;  %v2461_v31 = vrot.slane %v2459_v22, 4  ;;  %v2464_v32 = vrot.slane %v2462_v23, 5  ;;  %v2470_v36 = vrot.slane %v2468_v28, 5 }
  0x81   : > { %v1059_v34 = vsel %vm7155_vm7, %v1054_v21, %v1058_v14  ;;  %v1628_v35 = vsel %vm7141_vm6, %v1626_v27, %v1627_v20  ;;  %v2478_v37 = vshll.u32 %v5943_v16, 16  ;;  %v2474_v41 = vrot.slane %v2472_v33, 4  ;;  %v5951_v14 = vld [vmem:[%s7082_s7 + $0x34] sm:$0xf] }
  0x82   : > { %v5810_v38 = vcombine.low %v1049_v29, %v1059_v34  ;;  %v5859_v39 = vcombine.low %v1625_v26, %v1628_v35  ;;  %v2465_v40 = vor.u32 %v2464_v32, %v2461_v31  ;;  %v2483_v46 = vshrl.u32 %v5944_v25, 16  ;;  %v5954_v35 = vld [vmem:[%s7082_s7 + $0x40] sm:$0xf] }
  0x83   : > { %v2480_v45 = vrot.slane %v2478_v37, 5  ;;  %v2486_v47 = vshll.u32 %v5944_v25, 16  ;;  %v2492_v48 = vshll.u32 %v5945_v19, 16  ;;  %v2475_v50 = vor.u32 %v2474_v41, %v2470_v36  ;;  %v5952_v25 = vld [vmem:[%s7082_s7 + $0x38] sm:$0x1] }
  0x84   : > { %6587 = vmatmul.mubr.msk.bf16.gmra.mxu1 %vm347_vm1, %v5810_v38  ;;  %6621 = vmatmul.mubr.msk.bf16.gmra.mxu0 %vm347_vm1, %v5859_v39  ;;  %v2466_v49 = vrot.slane %v2465_v40, 4  ;;  %v2496_v51 = vshrl.u32 %v5945_v19, 16  ;;  %v2502_v52 = vshll.u32 %v5946_v18, 16  ;;  %v2485_v53 = vrot.slane %v2483_v46, 4  ;;  %v5955_v39 = vld [vmem:[%s7082_s7 + $0x44] sm:$0x1] }
  0x85   : > { %6626 = vmatprep.mubr.msk.bf16.mxu1 %vm347_vm1, %v6898_v30  ;;  %v2488_v54 = vrot.slane %v2486_v47, 5  ;;  %v2494_v57 = vrot.slane %v2492_v48, 5  ;;  %v3962_v58 = vsel %vm396_vm0, %v7363_v56, 0  ;;  %v2476_v61 = vrot.slane %v2475_v50, 4  ;;  %v5953_v30 = vld [vmem:[%s7082_s7 + $0x3c] sm:$0xf] }
  0x86   : > { %v2471_v60 = vsel %vm7155_vm7, %v2466_v49, %v2470_v36  ;;  %v2498_v62 = vrot.slane %v2496_v51, 4  ;;  %v2504_v63 = vrot.slane %v2502_v52, 5  ;;  %v2507_v2 = vshrl.u32 %v5947_v43, 16  ;;  %v5956_v49 = vld [vmem:[%s7082_s7 + $0x48] sm:$0xf]  ;;  %v6902_v52 = vld [vmem:[%s7082_s7 + $0x3c] sm:$0xff]  }
  0x87   : > { %v2489_v1 = vor.u32 %v2488_v54, %v2485_v53  ;;  %v2510_v3 = vshll.u32 %v5947_v43, 16  ;;  %v2516_v4 = vshll.u32 %v5948_v44, 16  ;;  %v2481_v6 = vsel %vm7155_vm7, %v2476_v61, %v2480_v45  ;;  %v6901_v45 = vld [vmem:[%s7082_s7 + $0x30] sm:$0xff]  }
  0x88   : > { %v2499_v7 = vor.u32 %v2498_v62, %v2494_v57  ;;  %v2520_v56 = vshrl.u32 %v5948_v44, 16  ;;  %v2526_v8 = vshll.u32 %v5949_v59, 16  ;;  %v5990_v9 = vcombine.low %v2471_v60, %v2481_v6 }
  0x89   : > { %v2490_v10 = vrot.slane %v2489_v1, 4  ;;  %v2509_v12 = vrot.slane %v2507_v2, 4  ;;  %v2512_v13 = vrot.slane %v2510_v3, 5  ;;  %v2518_v16 = vrot.slane %v2516_v4, 5 }
  0x8a   : > { %v2500_v15 = vrot.slane %v2499_v7, 4  ;;  %v2522_v17 = vrot.slane %v2520_v56, 4  ;;  %v2528_v20 = vrot.slane %v2526_v8, 5  ;;  %6660 = vmatprep.mubr.msk.bf16.mxu0 %vm347_vm1, %v5990_v9  ;;  %v2531_v21 = vshrl.u32 %v5950_v5, 16  ;;  %v5959_v7 = vld [vmem:[%s7082_s7 + $0x54] sm:$0xf] }
  0x8b   : > { %v2495_v22 = vsel %vm7155_vm7, %v2490_v10, %v2494_v57  ;;  %v2513_v23 = vor.u32 %v2512_v13, %v2509_v12  ;;  %v2534_v26 = vshll.u32 %v5950_v5, 16  ;;  %v2540_v19 = vshll.u32 %v5951_v14, 16  ;;  %v5957_v57 = vld [vmem:[%s7082_s7 + $0x4c] sm:$0xf] }
  0x8c   : > { %6627 = vmatmul.mubr.msk.bf16.vlgmr.msra.gmra.mxu1 %vm347_vm1, %v6899_v0  ;;  %v2505_v27 = vsel %vm7155_vm7, %v2500_v15, %v2504_v63  ;;  %v2523_v28 = vor.u32 %v2522_v17, %v2518_v16  ;;  %v2544_v29 = vshrl.u32 %v5951_v14, 16  ;;  %v2533_v33 = vrot.slane %v2531_v21, 4  ;;  %v5958_v0 = vld [vmem:[%s7082_s7 + $0x50] sm:$0x1]  ;;  %v6903_v13 = vld [vmem:[%s7082_s7 + $0x48] sm:$0xff]  }
  0x8d   : > { %v5991_v31 = vcombine.low %v2495_v22, %v2505_v27  ;;  %6693 = vmatpush3.bf16.msra.mxu1 %v7130_v24  ;;  %6630 = vmatprep.mubr.msk.bf16.mxu1 %vm347_vm1, %v6900_v11  ;;  %v2514_v32 = vrot.slane %v2513_v23, 4  ;;  %v2536_v34 = vrot.slane %v2534_v26, 5  ;;  %v2542_v37 = vrot.slane %v2540_v19, 5  ;;  %v5960_v11 = vld [vmem:[%s7082_s7 + $0x58] sm:$0xf] }
  0x8e   : > { %v2524_v36 = vrot.slane %v2523_v28, 4  ;;  %v2546_v18 = vrot.slane %v2544_v29, 4  ;;  %v2550_v38 = vshll.u32 %v5952_v25, 16  ;;  %v2555_v41 = vshrl.u32 %v5953_v30, 16  ;;  %v6904_v22 = vld [vmem:[%s7082_s7 + $0x54] sm:$0xff]  }
  0x8f   : > { %6661 = vmatmul.mubr.msk.bf16.vlgmr.msra.gmra.mxu0 %vm347_vm1, %v5991_v31  ;;  %v2519_v40 = vsel %vm7155_vm7, %v2514_v32, %v2518_v16  ;;  %v2537_v24 = vor.u32 %v2536_v34, %v2533_v33  ;;  %v2558_v43 = vshll.u32 %v5953_v30, 16  ;;  %v2564_v48 = vshll.u32 %v5954_v35, 16  ;;  %v5961_v23 = vld [vmem:[%s7082_s7 + $0x5c] sm:$0x1]  ;;  %v5962_v29 = vld [vmem:[%s7082_s7 + $0x60] sm:$0xf] }
  0x90   : > { %6727 = vmatpush3.bf16.msra.mxu0 %v3962_v58  ;;  %v2529_v44 = vsel %vm7155_vm7, %v2524_v36, %v2528_v20  ;;  %v2547_v46 = vor.u32 %v2546_v18, %v2542_v37  ;;  %v2552_v47 = vrot.slane %v2550_v38, 5  ;;  %v2557_v53 = vrot.slane %v2555_v41, 4  ;;  %v5963_v34 = vld [vmem:[%s7082_s7 + $0x64] sm:$0xf]  ;;  %v5964_v41 = vld [vmem:[%s7082_s7 + $0x68] sm:$0x1] }
  0x91   : > { %v5992_v50 = vcombine.low %v2519_v40, %v2529_v44  ;;  %v2538_v51 = vrot.slane %v2537_v24, 4  ;;  %v2560_v54 = vrot.slane %v2558_v43, 5  ;;  %v2566_v60 = vrot.slane %v2564_v48, 5  ;;  %v5965_v43 = vld [vmem:[%s7082_s7 + $0x6c] sm:$0xf] }
  0x92   : > { %v2548_v59 = vrot.slane %v2547_v46, 4  ;;  %v2568_v61 = vshrl.u32 %v5954_v35, 16  ;;  %v2574_v58 = vshll.u32 %v5955_v39, 16  ;;  %v2579_v1 = vshrl.u32 %v5956_v49, 16  ;;  %v5966_v48 = vld [vmem:[%s7082_s7 + $0x70] sm:$0xf] }
  0x93   : > { %6664 = vmatprep.mubr.msk.bf16.mxu0 %vm347_vm1, %v5992_v50  ;;  %v2543_v62 = vsel %vm7155_vm7, %v2538_v51, %v2542_v37  ;;  %v2561_v63 = vor.u32 %v2560_v54, %v2557_v53  ;;  %v2582_v2 = vshll.u32 %v5956_v49, 16  ;;  %v2588_v6 = vshll.u32 %v5957_v57, 16 }
  0x94   : > { %6631 = vmatmul.mubr.msk.bf16.gmra.mxu1 %vm347_vm1, %v6901_v45  ;;  %v2553_v3 = vsel %vm7155_vm7, %v2548_v59, %v2552_v47  ;;  %v2570_v4 = vrot.slane %v2568_v61, 4  ;;  %v2576_v5 = vrot.slane %v2574_v58, 5  ;;  %v2581_v9 = vrot.slane %v2579_v1, 4 }
  0x95   : > { %v5993_v56 = vcombine.low %v2543_v62, %v2553_v3  ;;  %6634 = vmatprep.mubr.msk.bf16.mxu1 %vm347_vm1, %v6902_v52  ;;  %v2562_v8 = vrot.slane %v2561_v63, 4  ;;  %v2584_v10 = vrot.slane %v2582_v2, 5  ;;  %v2590_v14 = vrot.slane %v2588_v6, 5  ;;  %v6905_v63 = vld [vmem:[%s7082_s7 + $0x60] sm:$0xff]   ;;  %v5967_v3 = vld [vmem:[%s7082_s7 + $0x74] sm:$0x1] }
  0x96   : > { %v2571_v12 = vor.u32 %v2570_v4, %v2566_v60  ;;  %v2592_v15 = vshrl.u32 %v5957_v57, 16  ;;  %v2598_v16 = vshll.u32 %v5958_v0, 16  ;;  %v2603_v25 = vshrl.u32 %v5959_v7, 16  ;;  %v6906_v6 = vld [vmem:[%s7082_s7 + $0x6c] sm:$0xff]  }
  0x97   : > { %6665 = vmatmul.mubr.msk.bf16.gmra.mxu0 %vm347_vm1, %v5993_v56  ;;  %v2567_v17 = vsel %vm7155_vm7, %v2562_v8, %v2566_v60  ;;  %v2585_v20 = vor.u32 %v2584_v10, %v2581_v9  ;;  %v2606_v21 = vshll.u32 %v5959_v7, 16  ;;  %v2612_v19 = vshll.u32 %v5960_v11, 16  ;;  %v5968_v9 = vld [vmem:[%s7082_s7 + $0x78] sm:$0xf] }
  0x98   : > { %v2572_v26 = vrot.slane %v2571_v12, 4  ;;  %v2594_v27 = vrot.slane %v2592_v15, 4  ;;  %v2600_v28 = vrot.slane %v2598_v16, 5  ;;  %v2605_v31 = vrot.slane %v2603_v25, 4 }
  0x99   : > { %v2586_v30 = vrot.slane %v2585_v20, 4  ;;  %v2608_v32 = vrot.slane %v2606_v21, 5  ;;  %v2616_v33 = vshrl.u32 %v5960_v11, 16  ;;  %v2614_v37 = vrot.slane %v2612_v19, 5 }
  0x9a   : > { %v2577_v35 = vsel %vm7155_vm7, %v2572_v26, %v2576_v5  ;;  %v2595_v36 = vor.u32 %v2594_v27, %v2590_v14  ;;  %v2622_v18 = vshll.u32 %v5961_v23, 16  ;;  %v2627_v46 = vshrl.u32 %v5962_v29, 16 }
  0x9b   : > { %v5994_v38 = vcombine.low %v2567_v17, %v2577_v35  ;;  %v2591_v39 = vsel %vm7155_vm7, %v2586_v30, %v2590_v14  ;;  %v2609_v40 = vor.u32 %v2608_v32, %v2605_v31  ;;  %v2618_v24 = vrot.slane %v2616_v33, 4  ;;  %v5969_v14 = vld [vmem:[%s7082_s7 + $0x7c] sm:$0xf]  ;;  %v5971_v30 = vld [vmem:[%s7082_s7 + $0x84] sm:$0xf] }
  0x9c   : > { %6635 = vmatmul.mubr.msk.bf16.gmra.mxu1 %vm347_vm1, %v6903_v13  ;;  %v2596_v44 = vrot.slane %v2595_v36, 4  ;;  %v2624_v45 = vrot.slane %v2622_v18, 5  ;;  %v2630_v47 = vshll.u32 %v5962_v29, 16  ;;  %v2636_v51 = vshll.u32 %v5963_v34, 16  ;;  %v7512_v31 = vld [vmem:[%s8818_s1 + $0xe] sm:$0x3] }
  0x9d   : > { %6668 = vmatprep.mubr.msk.bf16.mxu0 %vm347_vm1, %v5994_v38  ;;  %6638 = vmatprep.mubr.msk.bf16.mxu1 %vm347_vm1, %v6904_v22  ;;  %v2610_v49 = vrot.slane %v2609_v40, 4  ;;  %v2619_v50 = vor.u32 %v2618_v24, %v2614_v37  ;;  %v2640_v52 = vshrl.u32 %v5963_v34, 16  ;;  %v2629_v54 = vrot.slane %v2627_v46, 4  ;;  %v5970_v22 = vld [vmem:[%s7082_s7 + $0x80] sm:$0x1]  ;;  %v6908_v46 = vld [vmem:[%s7082_s7 + $0x84] sm:$0xff]  }
  0x9e   : > { %v2601_v53 = vsel %vm7155_vm7, %v2596_v44, %v2600_v28  ;;  %v2632_v57 = vrot.slane %v2630_v47, 5  ;;  %v2646_v59 = vshll.u32 %v5964_v41, 16  ;;  %v2638_v62 = vrot.slane %v2636_v51, 5  ;;  %v5972_v36 = vld [vmem:[%s7082_s7 + $0x88] sm:$0xf]  ;;  %6838 = vmatprep.subr.msk.bf16.mxu1 %vm396_vm0, %v7512_v31 }
  0x9f   : > { %v5995_v60 = vcombine.low %v2591_v39, %v2601_v53  ;;  %v2615_v61 = vsel %vm7155_vm7, %v2610_v49, %v2614_v37  ;;  %v2620_v58 = vrot.slane %v2619_v50, 4  ;;  %v2642_v1 = vrot.slane %v2640_v52, 4  ;;  %v6907_v39 = vld [vmem:[%s7082_s7 + $0x78] sm:$0xff]   ;;  %v5973_v24 = vld [vmem:[%s7082_s7 + $0x8c] sm:$0x1] }
  0xa0   : > { %v2633_v0 = vor.u32 %v2632_v57, %v2629_v54  ;;  %v2648_v2 = vrot.slane %v2646_v59, 5  ;;  %v2651_v4 = vshrl.u32 %v5965_v43, 16  ;;  %v2654_v7 = vshll.u32 %v5965_v43, 16  ;;  %v5974_v41 = vld [vmem:[%s7082_s7 + $0x90] sm:$0xf] }
  0xa1   : > { %6669 = vmatmul.mubr.msk.bf16.gmra.mxu0 %vm347_vm1, %v5995_v60  ;;  %v2625_v5 = vsel %vm7155_vm7, %v2620_v58, %v2624_v45  ;;  %v2660_v56 = vshll.u32 %v5966_v48, 16  ;;  %v2664_v8 = vshrl.u32 %v5966_v48, 16  ;;  %v2643_v12 = vor.u32 %v2642_v1, %v2638_v62  ;;  %v7531_v52 = vld [vmem:[%s8818_s1 + $0x10] sm:$0x3]  ;;  %v5975_v60 = vld [vmem:[%s7082_s7 + $0x94] sm:$0xf] }
  0xa2   : > { %v5996_v10 = vcombine.low %v2615_v61, %v2625_v5  ;;  %v2634_v11 = vrot.slane %v2633_v0, 4  ;;  %v2653_v13 = vrot.slane %v2651_v4, 4  ;;  %v2656_v15 = vrot.slane %v2654_v7, 5  ;;  %6839 = vmatprep.subr.msk.bf16.mxu0 %vm396_vm0, %v7531_v52  ;;  %v5976_v0 = vld [vmem:[%s7082_s7 + $0x98] sm:$0x1] }
  0xa3   : > { %v2662_v16 = vrot.slane %v2660_v56, 5  ;;  %v2666_v17 = vrot.slane %v2664_v8, 4  ;;  %v2670_v20 = vshll.u32 %v5967_v3, 16  ;;  %v2644_v25 = vrot.slane %v2643_v12, 4  ;;  %v5977_v1 = vld [vmem:[%s7082_s7 + $0x9c] sm:$0xf] }
  0xa4   : > { %6672 = vmatprep.mubr.msk.bf16.mxu0 %vm347_vm1, %v5996_v10  ;;  %6639 = vmatmul.mubr.msk.bf16.gmra.mxu1 %vm347_vm1, %v6905_v63  ;;  %v2639_v23 = vsel %vm7155_vm7, %v2634_v11, %v2638_v62  ;;  %v2675_v21 = vshrl.u32 %v5968_v9, 16  ;;  %v2678_v26 = vshll.u32 %v5968_v9, 16  ;;  %v2657_v27 = vor.u32 %v2656_v15, %v2653_v13 }
  0xa5   : > { %6642 = vmatprep.mubr.msk.bf16.mxu1 %vm347_vm1, %v6906_v6  ;;  %v2667_v28 = vor.u32 %v2666_v17, %v2662_v16  ;;  %v2672_v19 = vrot.slane %v2670_v20, 5  ;;  %v2684_v29 = vshll.u32 %v5969_v14, 16  ;;  %v2649_v32 = vsel %vm7155_vm7, %v2644_v25, %v2648_v2  ;;  %v6910_v20 = vld [vmem:[%s7082_s7 + $0x9c] sm:$0xff]  }
  0xa6   : > { %v2677_v33 = vrot.slane %v2675_v21, 4  ;;  %v2680_v34 = vrot.slane %v2678_v26, 5  ;;  %v2688_v35 = vshrl.u32 %v5969_v14, 16  ;;  %v5997_v37 = vcombine.low %v2639_v23, %v2649_v32 }
  0xa7   : > { %v2658_v18 = vrot.slane %v2657_v27, 4  ;;  %v2668_v38 = vrot.slane %v2667_v28, 4  ;;  %v2686_v40 = vrot.slane %v2684_v29, 5  ;;  %v2694_v45 = vshll.u32 %v5970_v22, 16  ;;  %v5978_v22 = vld [vmem:[%s7082_s7 + $0xa0] sm:$0xf] }
  0xa8   : > { %v2681_v43 = vor.u32 %v2680_v34, %v2677_v33  ;;  %v2690_v44 = vrot.slane %v2688_v35, 4  ;;  %v2699_v47 = vshrl.u32 %v5971_v30, 16  ;;  %v2702_v50 = vshll.u32 %v5971_v30, 16  ;;  %v5979_v29 = vld [vmem:[%s7082_s7 + $0xa4] sm:$0x1] }
  0xa9   : > { %6673 = vmatmul.mubr.msk.bf16.gmra.mxu0 %vm347_vm1, %v5997_v37  ;;  %v2663_v48 = vsel %vm7155_vm7, %v2658_v18, %v2662_v16  ;;  %v2673_v49 = vsel %vm7155_vm7, %v2668_v38, %v2672_v19  ;;  %v2708_v51 = vshll.u32 %v5972_v36, 16  ;;  %v2696_v59 = vrot.slane %v2694_v45, 5  ;;  %v6909_v16 = vld [vmem:[%s7082_s7 + $0x90] sm:$0xff]  }
  0xaa   : > { %v5998_v53 = vcombine.low %v2663_v48, %v2673_v49  ;;  %v2682_v54 = vrot.slane %v2681_v43, 4  ;;  %v2691_v57 = vor.u32 %v2690_v44, %v2686_v40  ;;  %v2701_v61 = vrot.slane %v2699_v47, 4  ;;  %v5982_v48 = vld [vmem:[%s7082_s7 + $0xb0] sm:$0x1] }
  0xab   : > { %v2704_v58 = vrot.slane %v2702_v50, 5  ;;  %v2710_v62 = vrot.slane %v2708_v51, 5  ;;  %v2712_v63 = vshrl.u32 %v5972_v36, 16  ;;  %v2718_v4 = vshll.u32 %v5973_v24, 16  ;;  %v5980_v36 = vld [vmem:[%s7082_s7 + $0xa8] sm:$0xf] }
  0xac   : > { %6676 = vmatprep.mubr.msk.bf16.mxu0 %vm347_vm1, %v5998_v53  ;;  %6643 = vmatmul.mubr.msk.bf16.gmra.mxu1 %vm347_vm1, %v6907_v39  ;;  %v2687_v2 = vsel %vm7155_vm7, %v2682_v54, %v2686_v40  ;;  %v2692_v3 = vrot.slane %v2691_v57, 4  ;;  %v2723_v5 = vshrl.u32 %v5974_v41, 16  ;;  %v2726_v56 = vshll.u32 %v5974_v41, 16  ;;  %v5981_v40 = vld [vmem:[%s7082_s7 + $0xac] sm:$0xf] }
  0xad   : > { %6646 = vmatprep.mubr.msk.bf16.mxu1 %vm347_vm1, %v6908_v46  ;;  %v2705_v6 = vor.u32 %v2704_v58, %v2701_v61  ;;  %v2714_v7 = vrot.slane %v2712_v63, 4  ;;  %v2732_v8 = vshll.u32 %v5975_v60, 16  ;;  %v2720_v10 = vrot.slane %v2718_v4, 5  ;;  %v6911_v53 = vld [vmem:[%s7082_s7 + $0xa8] sm:$0xff]   ;;  %v5984_v63 = vld [vmem:[%s7082_s7 + $0xb8] sm:$0xf] }
  0xae   : > { %v2697_v9 = vsel %vm7155_vm7, %v2692_v3, %v2696_v59  ;;  %v2725_v11 = vrot.slane %v2723_v5, 4  ;;  %v2736_v12 = vshrl.u32 %v5975_v60, 16  ;;  %v2728_v17 = vrot.slane %v2726_v56, 5  ;;  %v5983_v59 = vld [vmem:[%s7082_s7 + $0xb4] sm:$0xf] }
  0xaf   : > { %v5999_v13 = vcombine.low %v2687_v2, %v2697_v9  ;;  %v2706_v14 = vrot.slane %v2705_v6, 4  ;;  %v2715_v15 = vor.u32 %v2714_v7, %v2710_v62  ;;  %v2734_v23 = vrot.slane %v2732_v8, 5  ;;  %v6912_v6 = vld [vmem:[%s7082_s7 + $0xb4] sm:$0xff]   ;;  %v5985_v7 = vld [vmem:[%s7082_s7 + $0xbc] sm:$0x1] }
  0xb0   : > { %v2738_v25 = vrot.slane %v2736_v12, 4  ;;  %v2742_v21 = vshll.u32 %v5976_v0, 16  ;;  %v2747_v26 = vshrl.u32 %v5977_v1, 16  ;;  %v2729_v19 = vor.u32 %v2728_v17, %v2725_v11 }
  0xb1   : > { %6677 = vmatmul.mubr.msk.bf16.gmra.mxu0 %vm347_vm1, %v5999_v13  ;;  %v2711_v27 = vsel %vm7155_vm7, %v2706_v14, %v2710_v62  ;;  %v2716_v28 = vrot.slane %v2715_v15, 4  ;;  %v2750_v30 = vshll.u32 %v5977_v1, 16  ;;  %v2756_v35 = vshll.u32 %v5978_v22, 16  ;;  %v5986_v13 = vld [vmem:[%s7082_s7 + $0xc0] sm:$0xf] }
  0xb2   : > { %v2739_v32 = vor.u32 %v2738_v25, %v2734_v23  ;;  %v2744_v33 = vrot.slane %v2742_v21, 5  ;;  %v2749_v34 = vrot.slane %v2747_v26, 4  ;;  %v2730_v18 = vrot.slane %v2729_v19, 4  ;;  %v5988_v26 = vld [vmem:[%s7082_s7 + $0xc8] sm:$0x1] }
  0xb3   : > { %v2721_v37 = vsel %vm7155_vm7, %v2716_v28, %v2720_v10  ;;  %v2752_v38 = vrot.slane %v2750_v30, 5  ;;  %v2760_v39 = vshrl.u32 %v5978_v22, 16  ;;  %v2758_v43 = vrot.slane %v2756_v35, 5  ;;  %v6022_v30 = vld [vmem:[%s7082_s7 + $0xc] sm:$0xe] }
  0xb4   : > { %v6000_v24 = vcombine.low %v2711_v27, %v2721_v37  ;;  %6647 = vmatmul.mubr.msk.bf16.gmra.mxu1 %vm347_vm1, %v6909_v16  ;;  %v2740_v41 = vrot.slane %v2739_v32, 4  ;;  %v2766_v44 = vshll.u32 %v5979_v29, 16  ;;  %v2735_v45 = vsel %vm7155_vm7, %v2730_v18, %v2734_v23  ;;  %v6023_v32 = vld [vmem:[%s7082_s7 + $0x10] sm:$0xf]  ;;  %v6024_v37 = vld [vmem:[%s7082_s7 + $0x14] sm:$0x1] }
  0xb5   : > { %6650 = vmatprep.mubr.msk.bf16.mxu1 %vm347_vm1, %v6910_v20  ;;  %v2753_v46 = vor.u32 %v2752_v38, %v2749_v34  ;;  %v2762_v47 = vrot.slane %v2760_v39, 4  ;;  %v2771_v49 = vshrl.u32 %v5980_v36, 16  ;;  %v2774_v54 = vshll.u32 %v5980_v36, 16  ;;  %v5987_v20 = vld [vmem:[%s7082_s7 + $0xc4] sm:$0xf] }
  0xb6   : > { %6680 = vmatprep.mubr.msk.bf16.mxu0 %vm347_vm1, %v6000_v24  ;;  %v2745_v50 = vsel %vm7155_vm7, %v2740_v41, %v2744_v33  ;;  %v2768_v51 = vrot.slane %v2766_v44, 5  ;;  %v2780_v57 = vshll.u32 %v5981_v40, 16  ;;  %v2784_v2 = vshrl.u32 %v5981_v40, 16  ;;  %v6025_v24 = vld [vmem:[%s7082_s7 + $0x18] sm:$0xe] }
  0xb7   : > { %v6001_v60 = vcombine.low %v2735_v45, %v2745_v50  ;;  %v2754_v61 = vrot.slane %v2753_v46, 4  ;;  %v2763_v58 = vor.u32 %v2762_v47, %v2758_v43  ;;  %v2773_v62 = vrot.slane %v2771_v49, 4  ;;  %v6026_v47 = vld [vmem:[%s7082_s7 + $0x1c] sm:$0xf] }
  0xb8   : > { %v2776_v0 = vrot.slane %v2774_v54, 5  ;;  %v2782_v1 = vrot.slane %v2780_v57, 5  ;;  %v2790_v3 = vshll.u32 %v5982_v48, 16  ;;  %v2795_v56 = vshrl.u32 %v5983_v59, 16  ;;  %v6027_v48 = vld [vmem:[%s7082_s7 + $0x20] sm:$0x1] }
  0xb9   : > { %6681 = vmatmul.mubr.msk.bf16.gmra.mxu0 %vm347_vm1, %v6001_v60  ;;  %v2759_v4 = vsel %vm7155_vm7, %v2754_v61, %v2758_v43  ;;  %v2764_v5 = vrot.slane %v2763_v58, 4  ;;  %v2798_v8 = vshll.u32 %v5983_v59, 16  ;;  %v2786_v10 = vrot.slane %v2784_v2, 4  ;;  %v6913_v43 = vld [vmem:[%s7082_s7 + $0xc0] sm:$0xff]   ;;  %v6029_v58 = vld [vmem:[%s7082_s7 + $0x28] sm:$0xf] }
  0xba   : > { %v2777_v9 = vor.u32 %v2776_v0, %v2773_v62  ;;  %v2792_v11 = vrot.slane %v2790_v3, 5  ;;  %v2804_v12 = vshll.u32 %v5984_v63, 16  ;;  %v2797_v15 = vrot.slane %v2795_v56, 4  ;;  %v6028_v54 = vld [vmem:[%s7082_s7 + $0x24] sm:$0xe] }
  0xbb   : > { %v2769_v14 = vsel %vm7155_vm7, %v2764_v5, %v2768_v51  ;;  %v2800_v16 = vrot.slane %v2798_v8, 5  ;;  %v2808_v17 = vshrl.u32 %v5984_v63, 16  ;;  %v2787_v25 = vor.u32 %v2786_v10, %v2782_v1  ;;  %v6030_v2 = vld [vmem:[%s7082_s7 + $0x2c] sm:$0x1]  ;;  %v6031_v3 = vld [vmem:[%s7082_s7 + $0x30] sm:$0xe] }
  0xbc   : > { %v6002_v22 = vcombine.low %v2759_v4, %v2769_v14  ;;  %6651 = vmatmul.mubr.msk.bf16.gmra.mxu1 %vm347_vm1, %v6911_v53  ;;  %v2778_v23 = vrot.slane %v2777_v9, 4  ;;  %v2806_v21 = vrot.slane %v2804_v12, 5  ;;  %v2814_v19 = vshll.u32 %v5985_v7, 16  ;;  %v6033_v12 = vld [vmem:[%s7082_s7 + $0x38] sm:$0x1] }
  0xbd   : > { %6654 = vmatprep.mubr.msk.bf16.mxu1 %vm347_vm1, %v6912_v6  ;;  %v2801_v27 = vor.u32 %v2800_v16, %v2797_v15  ;;  %v2810_v28 = vrot.slane %v2808_v17, 4  ;;  %v2819_v29 = vshrl.u32 %v5986_v13, 16  ;;  %v2788_v34 = vrot.slane %v2787_v25, 4  ;;  %v6914_v16 = vld [vmem:[%s7082_s7 + $0x18] sm:$0xff]  }
  0xbe   : > { %6684 = vmatprep.mubr.msk.bf16.mxu0 %vm347_vm1, %v6002_v22  ;;  %v2783_v33 = vsel %vm7155_vm7, %v2778_v23, %v2782_v1  ;;  %v2822_v35 = vshll.u32 %v5986_v13, 16  ;;  %v2828_v36 = vshll.u32 %v5987_v20, 16  ;;  %v2816_v39 = vrot.slane %v2814_v19, 5  ;;  %v6034_v13 = vld [vmem:[%s7082_s7 + $0x3c] sm:$0xe] }
  0xbf   : > { %v2802_v18 = vrot.slane %v2801_v27, 4  ;;  %v2811_v38 = vor.u32 %v2810_v28, %v2806_v21  ;;  %v2821_v40 = vrot.slane %v2819_v29, 4  ;;  %v2793_v41 = vsel %vm7155_vm7, %v2788_v34, %v2792_v11  ;;  %v6032_v11 = vld [vmem:[%s7082_s7 + $0x34] sm:$0xf]  ;;  %v6035_v22 = vld [vmem:[%s7082_s7 + $0x40] sm:$0xf] }
  0xc0   : > { %v2824_v44 = vrot.slane %v2822_v35, 5  ;;  %v2830_v45 = vrot.slane %v2828_v36, 5  ;;  %v2832_v46 = vshrl.u32 %v5987_v20, 16  ;;  %v6003_v49 = vcombine.low %v2783_v33, %v2793_v41  ;;  %v6036_v23 = vld [vmem:[%s7082_s7 + $0x44] sm:$0x1] }
  0xc1   : > { %v2807_v50 = vsel %vm7155_vm7, %v2802_v18, %v2806_v21  ;;  %v2812_v51 = vrot.slane %v2811_v38, 4  ;;  %v2838_v53 = vshll.u32 %v5988_v26, 16  ;;  %v6070_v60 = vrot.slane %v6022_v30, 9  ;;  %v6038_v28 = vld [vmem:[%s7082_s7 + $0x4c] sm:$0xf] }
  0xc2   : > { %v2825_v57 = vor.u32 %v2824_v44, %v2821_v40  ;;  %v2834_v59 = vrot.slane %v2832_v46, 4  ;;  %v3298_v61 = vrot.slane %v6023_v32, 5  ;;  %6685 = vmatmul.mubr.msk.bf16.gmra.mxu0 %vm347_vm1, %v6003_v49  ;;  %v3301_v0 = vrot.slane %v6024_v37, 5  ;;  %v6039_v32 = vld [vmem:[%s7082_s7 + $0x50] sm:$0x1] }
  0xc3   : > { %v2817_v62 = vsel %vm7155_vm7, %v2812_v51, %v2816_v39  ;;  %v2840_v63 = vrot.slane %v2838_v53, 5  ;;  %v6071_v1 = vrot.slane %v6025_v24, 9  ;;  %v3305_v8 = vrot.slane %v6026_v47, 5  ;;  %v6040_v37 = vld [vmem:[%s7082_s7 + $0x54] sm:$0xe] }
  0xc4   : > { %v6004_v4 = vcombine.low %v2807_v50, %v2817_v62  ;;  %6655 = vmatmul.mubr.msk.bf16.gmra.mxu1 %vm347_vm1, %v6913_v43  ;;  %v2826_v5 = vrot.slane %v2825_v57, 4  ;;  %v2835_v6 = vor.u32 %v2834_v59, %v2830_v45  ;;  %v3299_v7 = vsel %vm7141_vm6, %v6070_v60, %v3298_v61  ;;  %v6041_v18 = vld [vmem:[%s7082_s7 + $0x58] sm:$0xf]  ;;  %v6042_v41 = vld [vmem:[%s7082_s7 + $0x5c] sm:$0x1]  ;;  %v6915_v59 = vld [vmem:[%s7082_s7 + $0x24] sm:$0xff]  }
  0xc5   : > { %v3300_v56 = vrot.slane %v3298_v61, 4  ;;  %v3308_v9 = vrot.slane %v6027_v48, 5  ;;  %v4752_v10 = vsel %vm396_vm0, %v7512_v31, 0  ;;  %v7614_v17 = vsel %vm396_vm0, %v7531_v52, 0  ;;  %v6037_v31 = vld [vmem:[%s7082_s7 + $0x48] sm:$0xe] }
  0xc6   : > { %6688 = vmatprep.mubr.msk.bf16.mxu0 %vm347_vm1, %v6004_v4  ;;  %v2831_v14 = vsel %vm7155_vm7, %v2826_v5, %v2830_v45  ;;  %v2836_v15 = vrot.slane %v2835_v6, 4  ;;  %v6072_v20 = vrot.slane %v6028_v54, 9  ;;  %v3306_v21 = vsel %vm7141_vm6, %v6071_v1, %v3305_v8  ;;  %v6043_v43 = vld [vmem:[%s7082_s7 + $0x60] sm:$0xe]  ;;  %v6044_v53 = vld [vmem:[%s7082_s7 + $0x64] sm:$0xf] }
  0xc7   : > { %v3302_v25 = vsel %vm7141_vm6, %v3300_v56, %v3301_v0  ;;  %v3307_v26 = vrot.slane %v3305_v8, 4  ;;  %v3312_v27 = vrot.slane %v6029_v58, 5  ;;  %v3315_v29 = vrot.slane %v6030_v2, 5  ;;  %v6045_v54 = vld [vmem:[%s7082_s7 + $0x68] sm:$0x1] }
  0xc8   : > { %v2841_v19 = vsel %vm7155_vm7, %v2836_v15, %v2840_v63  ;;  %v6087_v52 = vcombine.low %v3299_v7, %v3302_v25  ;;  %v6073_v30 = vrot.slane %v6031_v3, 9  ;;  %v3319_v39 = vrot.slane %v6032_v11, 5  ;;  %v6046_v57 = vld [vmem:[%s7082_s7 + $0x6c] sm:$0xe]  ;;  %v6047_v63 = vld [vmem:[%s7082_s7 + $0x70] sm:$0xf] }
  0xc9   : > { %v6005_v33 = vcombine.low %v2831_v14, %v2841_v19  ;;  %v3309_v34 = vsel %vm7141_vm6, %v3307_v26, %v3308_v9  ;;  %v3313_v35 = vsel %vm7141_vm6, %v6072_v20, %v3312_v27  ;;  %v3314_v36 = vrot.slane %v3312_v27, 4  ;;  %v6048_v0 = vld [vmem:[%s7082_s7 + $0x74] sm:$0x1]  ;;  %v6049_v1 = vld [vmem:[%s7082_s7 + $0x78] sm:$0xe] }
  0xca   : > { %6694 = vmatprep.mubr.msk.bf16.mxu1 %vm347_vm1, %v6087_v52  ;;  %v6088_v38 = vcombine.low %v3306_v21, %v3309_v34  ;;  %v3322_v40 = vrot.slane %v6033_v12, 5  ;;  %v6074_v24 = vrot.slane %v6034_v13, 9  ;;  %v3326_v45 = vrot.slane %v6035_v22, 5  ;;  %v6050_v6 = vld [vmem:[%s7082_s7 + $0x7c] sm:$0xf]  ;;  %v6916_v12 = vld [vmem:[%s7082_s7 + $0x30] sm:$0xff]  }
  0xcb   : > { %6689 = vmatmul.mubr.msk.bf16.gmra.mxu0 %vm347_vm1, %v6005_v33  ;;  %v3316_v44 = vsel %vm7141_vm6, %v3314_v36, %v3315_v29  ;;  %v3329_v46 = vrot.slane %v6036_v23, 5  ;;  %v6075_v47 = vrot.slane %v6037_v31, 9  ;;  %v7643_v49 = vsel %vm7141_vm6, %v6073_v30, %v3319_v39  ;;  %v6052_v11 = vld [vmem:[%s7082_s7 + $0x84] sm:$0xe]  ;;  %v6053_v20 = vld [vmem:[%s7082_s7 + $0x88] sm:$0xf] }
  0xcc   : > { %6728 = vmatprep.mubr.msk.bf16.mxu0 %vm347_vm1, %v6914_v16  ;;  %6695 = vmatmul.mubr.msk.bf16.vlgmr.msra.gmra.mxu1 %vm347_vm1, %v6088_v38  ;;  %v6089_v48 = vcombine.low %v3313_v35, %v3316_v44  ;;  %v3321_v50 = vrot.slane %v3319_v39, 4  ;;  %v3333_v51 = vrot.slane %v6038_v28, 5  ;;  %v3327_v60 = vsel %vm7141_vm6, %v6074_v24, %v3326_v45  ;;  %v6054_v21 = vld [vmem:[%s7082_s7 + $0x8c] sm:$0x1]  ;;  %v6055_v52 = vld [vmem:[%s7082_s7 + $0x90] sm:$0xe] }
  0xcd   : > { %6761 = vmatpush3.bf16.msra.mxu1 %v4752_v10  ;;  %v3328_v61 = vrot.slane %v3326_v45, 4  ;;  %v3336_v58 = vrot.slane %v6039_v32, 5  ;;  %v6076_v62 = vrot.slane %v6040_v37, 9  ;;  %v3340_v5 = vrot.slane %v6041_v18, 5  ;;  %v6051_v10 = vld [vmem:[%s7082_s7 + $0x80] sm:$0x1] }
  0xce   : > { %6698 = vmatprep.mubr.msk.bf16.mxu1 %vm347_vm1, %v6089_v48  ;;  %v3323_v2 = vsel %vm7141_vm6, %v3321_v50, %v3322_v40  ;;  %v7659_v3 = vsel %vm7141_vm6, %v6075_v47, %v3333_v51  ;;  %v3335_v4 = vrot.slane %v3333_v51, 4  ;;  %v3343_v8 = vrot.slane %v6042_v41, 5  ;;  %v6056_v35 = vld [vmem:[%s7082_s7 + $0x94] sm:$0xf]  ;;  %v7696_v36 = vld [vmem:[%s7082_s7 + $0x98] sm:$0x1] }
  0xcf   : > { %v6090_v7 = vcombine.low %v7643_v49, %v3323_v2  ;;  %v3330_v56 = vsel %vm7141_vm6, %v3328_v61, %v3329_v46  ;;  %v6077_v9 = vrot.slane %v6043_v43, 9  ;;  %v7674_v15 = vsel %vm7141_vm6, %v6076_v62, %v3340_v5  ;;  %v6058_v37 = vld [vmem:[%s7082_s7 + $0x9c] sm:$0xe]  ;;  %v6059_v41 = vld [vmem:[%s7082_s7 + $0xa0] sm:$0xf] }
  0xd0   : > { %v6091_v13 = vcombine.low %v3327_v60, %v3330_v56  ;;  %v7670_v14 = vsel %vm7141_vm6, %v3335_v4, %v3336_v58  ;;  %v3342_v16 = vrot.slane %v3340_v5, 4  ;;  %v3347_v23 = vrot.slane %v6044_v53, 5  ;;  %v6060_v43 = vld [vmem:[%s7082_s7 + $0xa4] sm:$0x1]  ;;  %v6061_v44 = vld [vmem:[%s7082_s7 + $0xa8] sm:$0xe] }
  0xd1   : > { %v6092_v22 = vcombine.low %v7659_v3, %v7670_v14  ;;  %v3350_v31 = vrot.slane %v6045_v54, 5  ;;  %v6078_v25 = vrot.slane %v6046_v57, 9  ;;  %v3354_v27 = vrot.slane %v6047_v63, 5  ;;  %v6062_v49 = vld [vmem:[%s7082_s7 + $0xac] sm:$0xf]  ;;  %v6917_v61 = vld [vmem:[%s7082_s7 + $0x3c] sm:$0xff]  }
  0xd2   : > { %v7682_v26 = vsel %vm7141_vm6, %v3342_v16, %v3343_v8  ;;  %v3357_v28 = vrot.slane %v6048_v0, 5  ;;  %v6079_v19 = vrot.slane %v6049_v1, 9  ;;  %v7690_v30 = vsel %vm7141_vm6, %v6077_v9, %v3347_v23  ;;  %v6064_v60 = vld [vmem:[%s7082_s7 + $0xb4] sm:$0xe]  ;;  %v6065_v2 = vld [vmem:[%s7082_s7 + $0xb8] sm:$0xf] }
  0xd3   : > { %6729 = vmatmul.mubr.msk.bf16.vlgmr.msra.gmra.mxu0 %vm347_vm1, %v6915_v59  ;;  %v6093_v29 = vcombine.low %v7674_v15, %v7682_v26  ;;  %v3349_v32 = vrot.slane %v3347_v23, 4  ;;  %v3361_v34 = vrot.slane %v6050_v6, 5  ;;  %v7703_v18 = vsel %vm7141_vm6, %v6078_v25, %v3354_v27  ;;  %v6063_v59 = vld [vmem:[%s7082_s7 + $0xb0] sm:$0x1]  ;;  %v6918_v4 = vld [vmem:[%s7082_s7 + $0x48] sm:$0xff]   ;;  %v6919_v26 = vld [vmem:[%s7082_s7 + $0x54] sm:$0xff]  }
  0xd4   : > { %6795 = vmatpush3.bf16.msra.mxu0 %v7614_v17  ;;  %6732 = vmatprep.mubr.msk.bf16.mxu0 %vm347_vm1, %v6916_v12  ;;  %v3356_v38 = vrot.slane %v3354_v27, 4  ;;  %v3364_v40 = vrot.slane %v6051_v10, 5  ;;  %v6080_v24 = vrot.slane %v6052_v11, 9  ;;  %v3368_v48 = vrot.slane %v6053_v20, 5  ;;  %v6066_v9 = vld [vmem:[%s7082_s7 + $0xbc] sm:$0x1] }
  0xd5   : > { %6699 = vmatmul.mubr.msk.bf16.gmra.mxu1 %vm347_vm1, %v6090_v7  ;;  %v7713_v17 = vsel %vm7141_vm6, %v3349_v32, %v3350_v31  ;;  %v7717_v45 = vsel %vm7141_vm6, %v6079_v19, %v3361_v34  ;;  %v3363_v46 = vrot.slane %v3361_v34, 4  ;;  %v3371_v54 = vrot.slane %v6054_v21, 5  ;;  %v6067_v20 = vld [vmem:[%s7082_s7 + $0xc0] sm:$0xe]  ;;  %v6265_v15 = vld [vmem:[%s7082_s7 + $0x18] sm:$0xe] }
  0xd6   : > { %6702 = vmatprep.mubr.msk.bf16.mxu1 %vm347_vm1, %v6091_v13  ;;  %v6094_v50 = vcombine.low %v7690_v30, %v7713_v17  ;;  %v7727_v51 = vsel %vm7141_vm6, %v3356_v38, %v3357_v28  ;;  %v6081_v57 = vrot.slane %v6055_v52, 9  ;;  %v7744_v0 = vsel %vm7141_vm6, %v6080_v24, %v3368_v48  ;;  %v6068_v28 = vld [vmem:[%s7082_s7 + $0xc4] sm:$0xf]  ;;  %v6189_v14 = vld [vmem:[%s7082_s7 + $0x2c] sm:$0x1] }
  0xd7   : > { %v6095_v58 = vcombine.low %v7703_v18, %v7727_v51  ;;  %v7738_v62 = vsel %vm7141_vm6, %v3363_v46, %v3364_v40  ;;  %v3370_v1 = vrot.slane %v3368_v48, 4  ;;  %v3375_v7 = vrot.slane %v6056_v35, 5  ;;  %v6190_v51 = vld [vmem:[%s7082_s7 + $0x30] sm:$0xf] }
  0xd8   : > { %v3378_v56 = vrot.slane %v7696_v36, 5  ;;  %v6082_v8 = vrot.slane %v6058_v37, 9  ;;  %v3382_v12 = vrot.slane %v6059_v41, 5  ;;  %v3385_v13 = vrot.slane %v6060_v43, 5  ;;  %v6069_v41 = vld [vmem:[%s7082_s7 + $0xc8] sm:$0x1] }
  0xd9   : > { %v7758_v11 = vsel %vm7141_vm6, %v3370_v1, %v3371_v54  ;;  %v6083_v16 = vrot.slane %v6061_v44, 9  ;;  %v7767_v25 = vsel %vm7141_vm6, %v6081_v57, %v3375_v7  ;;  %v3377_v21 = vrot.slane %v3375_v7, 4  ;;  %v6184_v43 = vld [vmem:[%s7082_s7 + $0x18] sm:$0xf]  ;;  %v6185_v57 = vld [vmem:[%s7082_s7 + $0x1c] sm:$0xf] }
  0xda   : > { %v3389_v27 = vrot.slane %v6062_v49, 5  ;;  %v7775_v52 = vsel %vm7141_vm6, %v6082_v8, %v3382_v12  ;;  %v3384_v32 = vrot.slane %v3382_v12, 4  ;;  %v3392_v34 = vrot.slane %v6063_v59, 5  ;;  %v6920_v8 = vld [vmem:[%s7082_s7 + $0x60] sm:$0xff]  }
  0xdb   : > { %6733 = vmatmul.mubr.msk.bf16.gmra.mxu0 %vm347_vm1, %v6917_v61  ;;  %v6084_v35 = vrot.slane %v6064_v60, 9  ;;  %v7782_v37 = vsel %vm7141_vm6, %v3377_v21, %v3378_v56  ;;  %v3396_v24 = vrot.slane %v6065_v2, 5  ;;  %v3399_v49 = vrot.slane %v6066_v9, 5  ;;  %v6186_v61 = vld [vmem:[%s7082_s7 + $0x20] sm:$0x1] }
  0xdc   : > { %v7692_v33 = vpop.f32.mrf.mxu0  ;;  %6736 = vmatprep.mubr.msk.bf16.mxu0 %vm347_vm1, %v6918_v4  ;;  %v7786_v38 = vsel %vm7141_vm6, %v6083_v16, %v3389_v27  ;;  %v3391_v40 = vrot.slane %v3389_v27, 4  ;;  %v7800_v48 = vsel %vm7141_vm6, %v3384_v32, %v3385_v13  ;;  %v6085_v54 = vrot.slane %v6067_v20, 9  ;;  %v6266_v56 = vld [vmem:[%s7082_s7 + $0x1c] sm:$0xf]  ;;  %v6267_v21 = vld [vmem:[%s7082_s7 + $0x20] sm:$0x1] }
  0xdd   : > { %v7705_v39 = vpop.f32.mrf.mxu1  ;;  %6703 = vmatmul.mubr.msk.bf16.gmra.mxu1 %vm347_vm1, %v6092_v22  ;;  %v7817_v59 = vsel %vm7141_vm6, %v6084_v35, %v3396_v24  ;;  %v3398_v60 = vrot.slane %v3396_v24, 4  ;;  %v3403_v2 = vrot.slane %v6068_v28, 5  ;;  %v3406_v4 = vrot.slane %v6069_v41, 5 }
  0xde   : > { %v7719_v47 = vpop.f32.mrf.mxu0  ;;  %6706 = vmatprep.mubr.msk.bf16.mxu1 %vm347_vm1, %v6093_v29  ;;  %v7813_v22 = vsel %vm7141_vm6, %v3391_v40, %v3392_v34  ;;  %v4238_v7 = vshrl.u32 %v6184_v43, 16  ;;  %v4241_v13 = vshll.u32 %v6184_v43, 16  ;;  %v4247_v16 = vshll.u32 %v6185_v57, 16 }
  0xdf   : > { %v7729_v53 = vpop.f32.mrf.mxu1  ;;  %v7832_v12 = vsel %vm7141_vm6, %v3398_v60, %v3399_v49  ;;  %v4251_v20 = vshrl.u32 %v6185_v57, 16  ;;  %v7841_v32 = vsel %vm7141_vm6, %v6085_v54, %v3403_v2  ;;  %v3405_v34 = vrot.slane %v3403_v2, 4  ;;  %v6187_v57 = vld [vmem:[%s7082_s7 + $0x24] sm:$0xf] }
  0xe0   : > { %v7740_v63 = vpop.f32.mrf.mxu0  ;;  %v4240_v35 = vrot.slane %v4238_v7, 4  ;;  %v4243_v24 = vrot.slane %v4241_v13, 5  ;;  %v4249_v41 = vrot.slane %v4247_v16, 5  ;;  %v4257_v49 = vshll.u32 %v6186_v61, 16  ;;  %v6188_v7 = vld [vmem:[%s7082_s7 + $0x28] sm:$0xf] }
  0xe1   : > { %v7750_v6 = vpop.f32.mrf.mxu1  ;;  %v4253_v43 = vrot.slane %v4251_v20, 4  ;;  %v7851_v28 = vsel %vm7141_vm6, %v3405_v34, %v3406_v4  ;;  %v6313_v54 = vrot.slane %v6265_v15, 9  ;;  %v5077_v29 = vrot.slane %v6266_v56, 5  ;;  %v6268_v34 = vld [vmem:[%s7082_s7 + $0x24] sm:$0xe] }
  0xe2   : > { %v7754_v10 = vpop.f32.mrf.mxu0  ;;  %v5080_v2 = vrot.slane %v6267_v21, 5  ;;  %v4259_v20 = vrot.slane %v4257_v49, 5  ;;  %v4265_v21 = vshll.u32 %v6187_v57, 16  ;;  %v6270_v49 = vld [vmem:[%s7082_s7 + $0x2c] sm:$0x1]  ;;  %v4281_v18 = vshll.u32 %v6189_v14, 16 }
  0xe3   : > { %v7761_v23 = vpop.f32.mrf.mxu1  ;;  %6737 = vmatmul.mubr.msk.bf16.gmra.mxu0 %vm347_vm1, %v6919_v26  ;;  %v4244_v26 = vor.u32 %v4243_v24, %v4240_v35  ;;  %v4254_v16 = vor.u32 %v4253_v43, %v4249_v41  ;;  %v7868_v4 = vsel %vm7141_vm6, %v6313_v54, %v5077_v29  ;;  %v5079_v56 = vrot.slane %v5077_v29, 4  ;;  %v6269_v35 = vld [vmem:[%s7082_s7 + $0x28] sm:$0xf]  ;;  %v6921_v29 = vld [vmem:[%s7082_s7 + $0x6c] sm:$0xff]  }
  0xe4   : > { %8827 = vst [vmem:[#allocation6_spill] sm:$0xff] %v7761_v23  ;;  %v7771_v19 = vpop.f32.mrf.mxu0  ;;  %6740 = vmatprep.mubr.msk.bf16.mxu0 %vm347_vm1, %v6920_v8  ;;  %v4262_v8 = vshrl.u32 %v6187_v57, 16  ;;  %v4271_v24 = vshll.u32 %v6188_v7, 16  ;;  %v4275_v43 = vshrl.u32 %v6188_v7, 16  ;;  %v4267_v44 = vrot.slane %v4265_v21, 5 }
  0xe5   : > { %v7778_v36 = vpop.f32.mrf.mxu1  ;;  %6707 = vmatmul.mubr.msk.bf16.gmra.mxu1 %vm347_vm1, %v6094_v50  ;;  %v4245_v17 = vrot.slane %v4244_v26, 4  ;;  %v4255_v50 = vrot.slane %v4254_v16, 4  ;;  %v7884_v57 = vsel %vm7141_vm6, %v5079_v56, %v5080_v2  ;;  %v6191_v2 = vld [vmem:[%s7082_s7 + $0x34] sm:$0xf] }
  0xe6   : > { %8828 = vst [vmem:[#allocation7_spill] sm:$0xff] %v7778_v36  ;;  %v7796_v46 = vpop.f32.mrf.mxu0  ;;  %6710 = vmatprep.mubr.msk.bf16.mxu1 %vm347_vm1, %v6095_v58  ;;  %v4264_v61 = vrot.slane %v4262_v8, 4  ;;  %v6922_v58 = vld [vmem:[%s7082_s7 + $0x78] sm:$0xff]   ;;  %v4273_v5 = vrot.slane %v4271_v24, 5  ;;  %v4277_v21 = vrot.slane %v4275_v43, 4 }
  0xe7   : > { %v7807_v3 = vpop.f32.mrf.mxu1  ;;  %v4250_v26 = vsel %vm7155_vm7, %v4245_v17, %v4249_v41  ;;  %v4260_v7 = vsel %vm7155_vm7, %v4255_v50, %v4259_v20  ;;  %v5084_v41 = vrot.slane %v6269_v35, 5  ;;  %v5087_v17 = vrot.slane %v6270_v49, 5  ;;  %v6192_v20 = vld [vmem:[%s7082_s7 + $0x38] sm:$0x1] }
  0xe8   : > { %8829 = vst [vmem:[#allocation8_spill] sm:$0xff] %v7807_v3  ;;  %v7822_v1 = vpop.f32.mrf.mxu0  ;;  %v7899_v8 = vcombine.low %v4250_v26, %v4260_v7  ;;  %v4268_v14 = vor.u32 %v4267_v44, %v4264_v61  ;;  %v4286_v50 = vshrl.u32 %v6190_v51, 16  ;;  %v4289_v26 = vshll.u32 %v6190_v51, 16  ;;  %v6271_v44 = vld [vmem:[%s7082_s7 + $0x30] sm:$0xe] }
  0xe9   : > { %v7828_v9 = vpop.f32.mrf.mxu1  ;;  %v4295_v7 = vshll.u32 %v6191_v2, 16  ;;  %v5086_v35 = vrot.slane %v5084_v41, 4  ;;  %v4299_v49 = vshrl.u32 %v6191_v2, 16  ;;  %v8838_v2 = vcombine.low %v7744_v0, %v7758_v11 }
  0xea   : > { %8830 = vst [vmem:[#allocation9_spill] sm:$0xff] %v7828_v9  ;;  %v7835_v27 = vpop.f32.mrf.mxu0  ;;  %v4269_v16 = vrot.slane %v4268_v14, 4  ;;  %v4288_v43 = vrot.slane %v4286_v50, 4 }
  0xeb   : > { %v7843_v40 = vpop.f32.mrf.mxu1  ;;  %6741 = vmatmul.mubr.msk.bf16.gmra.mxu0 %vm347_vm1, %v6921_v29  ;;  %v6272_v29 = vld [vmem:[%s7082_s7 + $0x34] sm:$0xf] }
  0xec   : > { %8831 = vst [vmem:[#allocation10_spill] sm:$0xff] %v7843_v40  ;;  %v7847_v60 = vpop.f32.mrf.mxu0  ;;  %v4278_v40 = vor.u32 %v4277_v21, %v4273_v5  ;;  %6744 = vmatprep.mubr.msk.bf16.mxu0 %vm347_vm1, %v6922_v58  ;;  %v4274_v58 = vsel %vm7155_vm7, %v4269_v16, %v4273_v5  ;;  %v4291_v21 = vrot.slane %v4289_v26, 5  ;;  %v6315_v5 = vrot.slane %v6271_v44, 9  ;;  %v6923_v16 = vld [vmem:[%s7082_s7 + $0x84] sm:$0xff]  }
  0xed   : > { %v7855_v13 = vpop.f32.mrf.mxu1 }
  0xee   : > { %8832 = vst [vmem:[#allocation11_spill] sm:$0xff] %v7855_v13  ;;  %v7864_v15 = vpop.f32.mrf.mxu0  ;;  %v6314_v13 = vrot.slane %v6268_v34, 9  ;;  %v4279_v14 = vrot.slane %v4278_v40, 4  ;;  %v6193_v40 = vld [vmem:[%s7082_s7 + $0x3c] sm:$0xf]  ;;  %v4292_v11 = vor.u32 %v4291_v21, %v4288_v43 }
  0xef   : > { %v7876_v30 = vpop.f32.mrf.mxu1 }
  0xf0   : > { %8833 = vst [vmem:[#allocation12_spill] sm:$0xff] %v7876_v30  ;;  %v7880_v54 = vpop.f32.mrf.mxu0  ;;  %v4283_v30 = vrot.slane %v4281_v18, 5  ;;  %v7913_v34 = vsel %vm7141_vm6, %v6314_v13, %v5084_v41  ;;  %v8837_v18 = vcombine.low %v7717_v45, %v7738_v62  ;;  %v4297_v13 = vrot.slane %v4295_v7, 5  ;;  %v6273_v41 = vld [vmem:[%s7082_s7 + $0x38] sm:$0x1] }
  0xf1   : > { %v7888_v31 = vpop.f32.mrf.mxu1  ;;  %v7933_v45 = vsel %vm7141_vm6, %v5086_v35, %v5087_v17  ;;  %v4301_v62 = vrot.slane %v4299_v49, 4  ;;  %v5094_v49 = vrot.slane %v6273_v41, 5  ;;  %v4293_v3 = vrot.slane %v4292_v11, 4  ;;  %v6274_v41 = vld [vmem:[%s7082_s7 + $0x3c] sm:$0xe] }
  0xf2   : > { %8834 = vst [vmem:[#allocation13_spill] sm:$0xff] %v7888_v31  ;;  %v7897_v56 = vpop.f32.mrf.mxu0  ;;  %6711 = vmatmul.mubr.msk.bf16.gmra.mxu1 %vm347_vm1, %v8837_v18  ;;  %v4305_v18 = vshll.u32 %v6192_v20, 16  ;;  %v4284_v7 = vsel %vm7155_vm7, %v4279_v14, %v4283_v30 }
  0xf3   : > { %v7901_v31 = vpop.f32.mrf.mxu1  ;;  %6714 = vmatprep.mubr.msk.bf16.mxu1 %vm347_vm1, %v8838_v2  ;;  %v5091_v2 = vrot.slane %v6272_v29, 5  ;;  %v7947_v20 = vcombine.low %v4274_v58, %v4284_v7  ;;  %v4302_v44 = vor.u32 %v4301_v62, %v4297_v13  ;;  %v4310_v29 = vshrl.u32 %v6193_v40, 16  ;;  %6745 = vmatmul.mubr.msk.bf16.gmra.mxu0 %vm347_vm1, %v6923_v16 }
  0xf4   : > { %8835 = vst [vmem:[#allocation14_spill] sm:$0xff] %v7901_v31  ;;  %v7905_v24 = vpop.f32.mrf.mxu0  ;;  %v4307_v35 = vrot.slane %v4305_v18, 5  ;;  %v6195_v31 = vld [vmem:[%s7082_s7 + $0x44] sm:$0x1]  ;;  %v4313_v58 = vshll.u32 %v6193_v40, 16  ;;  %v4298_v11 = vsel %vm7155_vm7, %v4293_v3, %v4297_v13  ;;  %v6316_v16 = vrot.slane %v6274_v41, 9 }
  0xf5   : > { %v7909_v61 = vpop.f32.mrf.mxu1  ;;  %v7954_v30 = vsel %vm7141_vm6, %v6315_v5, %v5091_v2  ;;  %v5093_v43 = vrot.slane %v5091_v2, 4  ;;  %v4303_v21 = vrot.slane %v4302_v44, 4  ;;  %v4312_v2 = vrot.slane %v4310_v29, 4  ;;  %v6196_v13 = vld [vmem:[%s7082_s7 + $0x48] sm:$0xf] }
  0xf6   : > { %8836 = vst [vmem:[#allocation15_spill] sm:$0xff] %v7909_v61  ;;  %v7920_v51 = vpop.f32.mrf.mxu0  ;;  %v6924_v61 = vld [vmem:[%s7082_s7 + $0x90] sm:$0xff]   ;;  %v4329_v0 = vshll.u32 %v6195_v31, 16  ;;  %v4315_v44 = vrot.slane %v4313_v58, 5 }
  0xf7   : > { %v7929_v50 = vpop.f32.mrf.mxu1  ;;  %v7964_v5 = vsel %vm7141_vm6, %v5093_v43, %v5094_v49  ;;  %6748 = vmatprep.mubr.msk.bf16.mxu0 %vm347_vm1, %v6924_v61  ;;  %v8842_v49 = vcombine.low %v7767_v25, %v7782_v37 }
  0xf8   : > { %8839 = vst [vmem:[#allocation16_spill] sm:$0xff] %v7929_v50  ;;  %v7937_v26 = vpop.f32.mrf.mxu0  ;;  %v6194_v50 = vld [vmem:[%s7082_s7 + $0x40] sm:$0xf]  ;;  %v4331_v29 = vrot.slane %v4329_v0, 5  ;;  %v4334_v0 = vshrl.u32 %v6196_v13, 16 }
  0xf9   : > { %v7945_v17 = vpop.f32.mrf.mxu1  ;;  %v4319_v7 = vshll.u32 %v6194_v50, 16  ;;  %v4323_v62 = vshrl.u32 %v6194_v50, 16  ;;  %v4308_v50 = vsel %vm7155_vm7, %v4303_v21, %v4307_v35  ;;  %v8843_v21 = vcombine.low %v7775_v52, %v7800_v48 }
  0xfa   : > { %8840 = vst [vmem:[#allocation17_spill] sm:$0xff] %v7945_v17  ;;  %v7950_v9 = vpop.f32.mrf.mxu0  ;;  %v6275_v17 = vld [vmem:[%s7082_s7 + $0x40] sm:$0xf]  ;;  %6715 = vmatmul.mubr.msk.bf16.gmra.mxu1 %vm347_vm1, %v8842_v49  ;;  %v7979_v43 = vcombine.low %v4298_v11, %v4308_v50  ;;  %v6197_v50 = vld [vmem:[%s7082_s7 + $0x4c] sm:$0xf] }
  0xfb   : > { %v7956_v14 = vpop.f32.mrf.mxu1  ;;  %v4321_v3 = vrot.slane %v4319_v7, 5  ;;  %v4325_v35 = vrot.slane %v4323_v62, 4  ;;  %6718 = vmatprep.mubr.msk.bf16.mxu1 %vm347_vm1, %v8843_v21  ;;  %v4316_v7 = vor.u32 %v4315_v44, %v4312_v2  ;;  %v5098_v25 = vrot.slane %v6275_v17, 5  ;;  %v6925_v49 = vld [vmem:[%s7082_s7 + $0x9c] sm:$0xff]   ;;  %v6926_v62 = vld [vmem:[%s7082_s7 + $0xa8] sm:$0xff]  }
  0xfc   : > { %8841 = vst [vmem:[#allocation18_spill] sm:$0xff] %v7956_v14  ;;  %v6594_v18 = vpop.f32.mrf.mxu0  ;;  %v6276_v14 = vld [vmem:[%s7082_s7 + $0x44] sm:$0x1]  ;;  %v4336_v44 = vrot.slane %v4334_v0, 4  ;;  %6749 = vmatmul.mubr.msk.bf16.gmra.mxu0 %vm347_vm1, %v6925_v49 }
  0xfd   : > { %v6560_v40 = vpop.f32.mrf.mxu1  ;;  %v5101_v37 = vrot.slane %v6276_v14, 5  ;;  %v4317_v52 = vrot.slane %v4316_v7, 4  ;;  %v7993_v48 = vsel %vm7141_vm6, %v6316_v16, %v5098_v25  ;;  %v5100_v17 = vrot.slane %v5098_v25, 4  ;;  %v6198_v16 = vld [vmem:[%s7082_s7 + $0x50] sm:$0x1]  ;;  %6752 = vmatprep.mubr.msk.bf16.mxu0 %vm347_vm1, %v6926_v62 }
  0xfe   : > { %v1356_v31 = vadd.f32 %v6560_v40, %v7692_v33  ;;  %v1796_v61 = vpop.f32.mrf.mxu0  ;;  %v4326_v40 = vor.u32 %v4325_v35, %v4321_v3  ;;  %v4337_v14 = vshll.u32 %v6196_v13, 16  ;;  %v4343_v13 = vshll.u32 %v6197_v50, 16  ;;  %v6278_v25 = vld [vmem:[%s7082_s7 + $0x4c] sm:$0xf] }
  0xff   : > { %v1227_v58 = vpop.f32.mrf.mxu1  ;;  %v4322_v35 = vsel %vm7155_vm7, %v4317_v52, %v4321_v3  ;;  %v8002_v21 = vsel %vm7141_vm6, %v5100_v17, %v5101_v37  ;;  %v6279_v37 = vld [vmem:[%s7082_s7 + $0x50] sm:$0x1]  ;;  %v6199_v17 = vld [vmem:[%s7082_s7 + $0x54] sm:$0xf]  ;;  %v4353_v62 = vshll.u32 %v6198_v16, 16 }
 0x100   : > { %v7986_v36 = vadd.f32 %v6594_v18, %v1356_v31  ;;  %v1354_v33 = vadd.f32 %v1227_v58, %v7719_v47  ;;  %v6595_v11 = vpop.f32.mrf.mxu0  ;;  %v4327_v2 = vrot.slane %v4326_v40, 4  ;;  %v4339_v58 = vrot.slane %v4337_v14, 5 }
 0x101   : > { %v6561_v23 = vpop.f32.mrf.mxu1  ;;  %v6333_v3 = vcombine.low %v7993_v48, %v8002_v21  ;;  %v4345_v49 = vrot.slane %v4343_v13, 5  ;;  %v4355_v16 = vrot.slane %v4353_v62, 5  ;;  %v6200_v13 = vld [vmem:[%s7082_s7 + $0x58] sm:$0xf] }
 0x102   : > { %v7995_v41 = vadd.f32 %v1796_v61, %v1354_v33  ;;  %v1357_v18 = vadd.f32 %v6561_v23, %v7740_v63  ;;  %v1799_v47 = vpop.f32.mrf.mxu0  ;;  %v6277_v61 = vld [vmem:[%s7082_s7 + $0x48] sm:$0xe]  ;;  %v4332_v7 = vsel %vm7155_vm7, %v4327_v2, %v4331_v29  ;;  %v4340_v52 = vor.u32 %v4339_v58, %v4336_v44  ;;  %v6927_v58 = vld [vmem:[%s7082_s7 + $0xb4] sm:$0xff]  }
 0x103   : > { %v1230_v31 = vpop.f32.mrf.mxu1  ;;  %v8017_v0 = vcombine.low %v4322_v35, %v4332_v7  ;;  %v8845_v2 = vcombine.low %v7817_v59, %v7832_v12 }
 0x104   : > { %v8007_v63 = vadd.f32 %v6595_v11, %v1357_v18  ;;  %v1355_v23 = vadd.f32 %v1230_v31, %v7754_v10  ;;  %v6598_v40 = vpop.f32.mrf.mxu0  ;;  %v4347_v11 = vshrl.u32 %v6197_v50, 16  ;;  %v8844_v10 = vcombine.low %v7786_v38, %v7813_v22  ;;  %6753 = vmatmul.mubr.msk.bf16.gmra.mxu0 %vm347_vm1, %v6927_v58 }
 0x105   : > { %v6564_v33 = vpop.f32.mrf.mxu1  ;;  %v6317_v18 = vrot.slane %v6277_v61, 9  ;;  %v4341_v31 = vrot.slane %v4340_v52, 4  ;;  %v5105_v38 = vrot.slane %v6278_v25, 5  ;;  %v5108_v22 = vrot.slane %v6279_v37, 5  ;;  %v6201_v52 = vld [vmem:[%s7082_s7 + $0x5c] sm:$0x1] }
 0x106   : > { %6719 = vmatmul.mubr.msk.bf16.gmra.mxu1 %vm347_vm1, %v8844_v10  ;;  %v8024_v29 = vadd.f32 %v1799_v47, %v1355_v23  ;;  %v1360_v14 = vadd.f32 %v6564_v33, %v7771_v19  ;;  %v1812_v44 = vpop.f32.mrf.mxu0  ;;  %v4349_v35 = vrot.slane %v4347_v11, 4  ;;  %v4358_v61 = vshrl.u32 %v6199_v17, 16  ;;  %v6928_v23 = vld [vmem:[%s7082_s7 + $0xc0] sm:$0xff]  }
 0x107   : > { %6722 = vmatprep.mubr.msk.bf16.mxu1 %vm347_vm1, %v8845_v2  ;;  %v1243_v50 = vpop.f32.mrf.mxu1  ;;  %v4346_v7 = vsel %vm7155_vm7, %v4341_v31, %v4345_v49  ;;  %v8041_v25 = vsel %vm7141_vm6, %v6317_v18, %v5105_v38  ;;  %v5107_v37 = vrot.slane %v5105_v38, 4  ;;  %v4361_v10 = vshll.u32 %v6199_v17, 16  ;;  %v6281_v31 = vld [vmem:[%s7082_s7 + $0x58] sm:$0xf]  ;;  %v6282_v38 = vld [vmem:[%s7082_s7 + $0x5c] sm:$0x1]  ;;  %6756 = vmatprep.mubr.msk.bf16.mxu0 %vm347_vm1, %v6928_v23 }
 0x108   : > { %v8032_v47 = vadd.f32 %v6598_v40, %v1360_v14  ;;  %v1358_v19 = vadd.f32 %v1243_v50, %v7796_v46  ;;  %v6599_v12 = vpop.f32.mrf.mxu0  ;;  %v4350_v33 = vor.u32 %v4349_v35, %v4345_v49  ;;  %v4360_v11 = vrot.slane %v4358_v61, 4  ;;  %v6280_v14 = vld [vmem:[%s7082_s7 + $0x54] sm:$0xe] }
 0x109   : > { %v6565_v59 = vpop.f32.mrf.mxu1  ;;  %v8050_v49 = vsel %vm7141_vm6, %v5107_v37, %v5108_v22  ;;  %v4367_v50 = vshll.u32 %v6200_v13, 16  ;;  %v4371_v18 = vshrl.u32 %v6200_v13, 16  ;;  %v4363_v35 = vrot.slane %v4361_v10, 5 }
 0x10a   : > { %v8043_v40 = vadd.f32 %v1812_v44, %v1358_v19  ;;  %v1361_v46 = vadd.f32 %v6565_v59, %v7822_v1  ;;  %v4351_v2 = vrot.slane %v4350_v33, 4  ;;  %v6334_v17 = vcombine.low %v8041_v25, %v8050_v49  ;;  %v6202_v19 = vld [vmem:[%s7082_s7 + $0x60] sm:$0xf]  ;;  %v1815_v22 = vpop.f32.mrf.mxu0 }
 0x10b   : > { %v1246_v62 = vpop.f32.mrf.mxu1  ;;  %v4369_v61 = vrot.slane %v4367_v50, 5  ;;  %v4373_v59 = vrot.slane %v4371_v18, 4  ;;  %v4377_v58 = vshll.u32 %v6201_v52, 16  ;;  %v6318_v23 = vrot.slane %v6280_v14, 9 }
 0x10c   : > { %v8054_v44 = vadd.f32 %v6599_v12, %v1361_v46  ;;  %v1359_v1 = vadd.f32 %v1246_v62, %v7835_v27  ;;  %v4356_v13 = vsel %vm7155_vm7, %v4351_v2, %v4355_v16  ;;  %v6203_v12 = vld [vmem:[%s7082_s7 + $0x64] sm:$0xf]  ;;  %v8846_v27 = vcombine.low %v7841_v32, %v7851_v28  ;;  %v6929_v2 = vld [vmem:[%s7082_s7 + $0xcc] sm:$0xff]  }
 0x10d   : > { %v8071_v37 = vcombine.low %v4346_v7, %v4356_v13  ;;  %v4364_v46 = vor.u32 %v4363_v35, %v4360_v11  ;;  %v4374_v10 = vor.u32 %v4373_v59, %v4369_v61  ;;  %v4379_v16 = vrot.slane %v4377_v58, 5  ;;  %v6283_v59 = vld [vmem:[%s7082_s7 + $0x60] sm:$0xe]  ;;  %6757 = vmatmul.mubr.msk.bf16.gmra.mxu0 %vm347_vm1, %v6929_v2 }
 0x10e   : > { %6723 = vmatmul.mubr.msk.bf16.gmra.mxu1 %vm347_vm1, %v8846_v27  ;;  %v8069_v33 = vadd.f32 %v1815_v22, %v1359_v1  ;;  %v5112_v62 = vrot.slane %v6281_v31, 5  ;;  %v5115_v52 = vrot.slane %v6282_v38, 5  ;;  %v4382_v28 = vshrl.u32 %v6202_v19, 16  ;;  %v6568_v1 = vpop.f32.mrf.mxu1  ;;  %v6602_v22 = vpop.f32.mrf.mxu0  ;;  %v6204_v38 = vld [vmem:[%s7082_s7 + $0x68] sm:$0x1] }
 0x10f   : > { %6762 = vmatprep.mubr.msk.bf16.mxu1 %vm347_vm1, %v7899_v8  ;;  %v4365_v50 = vrot.slane %v4364_v46, 4  ;;  %v4385_v32 = vshll.u32 %v6202_v19, 16  ;;  %v4391_v18 = vshll.u32 %v6203_v12, 16  ;;  %v4375_v7 = vrot.slane %v4374_v10, 4 }
 0x110   : > { %v8078_v11 = vsel %vm7141_vm6, %v6318_v23, %v5112_v62  ;;  %v5114_v8 = vrot.slane %v5112_v62, 4  ;;  %v4395_v14 = vshrl.u32 %v6203_v12, 16  ;;  %v1364_v31 = vadd.f32 %v6568_v1, %v7847_v60  ;;  %v1259_v46 = vpop.f32.mrf.mxu1  ;;  %v1828_v23 = vpop.f32.mrf.mxu0  ;;  %v6284_v60 = vld [vmem:[%s7082_s7 + $0x64] sm:$0xf]  ;;  %v6285_v62 = vld [vmem:[%s7082_s7 + $0x68] sm:$0x1] }
 0x111   : > { %v4370_v35 = vsel %vm7155_vm7, %v4365_v50, %v4369_v61  ;;  %v4384_v13 = vrot.slane %v4382_v28, 4  ;;  %v4387_v19 = vrot.slane %v4385_v32, 5  ;;  %v4380_v58 = vsel %vm7155_vm7, %v4375_v7, %v4379_v16  ;;  %v6205_v32 = vld [vmem:[%s7082_s7 + $0x6c] sm:$0xf] }
 0x112   : > { %v8089_v27 = vsel %vm7141_vm6, %v5114_v8, %v5115_v52  ;;  %v4393_v12 = vrot.slane %v4391_v18, 5  ;;  %v4397_v10 = vrot.slane %v4395_v14, 4  ;;  %v8094_v61 = vadd.f32 %v6602_v22, %v1364_v31  ;;  %v6569_v18 = vpop.f32.mrf.mxu1  ;;  %v6603_v1 = vpop.f32.mrf.mxu0 }
 0x113   : > { %v8096_v50 = vcombine.low %v4370_v35, %v4380_v58  ;;  %v6335_v28 = vcombine.low %v8078_v11, %v8089_v27  ;;  %v1362_v16 = vadd.f32 %v1259_v46, %v7864_v15  ;;  %v8847_v52 = vcombine.low %v7868_v4, %v7884_v57 }
 0x114   : > { %v4388_v7 = vor.u32 %v4387_v19, %v4384_v13  ;;  %v4398_v2 = vor.u32 %v4397_v10, %v4393_v12  ;;  %v4401_v22 = vshll.u32 %v6204_v38, 16  ;;  %v6319_v8 = vrot.slane %v6283_v59, 9  ;;  %v1262_v57 = vpop.f32.mrf.mxu1  ;;  %v6206_v19 = vld [vmem:[%s7082_s7 + $0x70] sm:$0xf]  ;;  %v1831_v10 = vpop.f32.mrf.mxu0 }
 0x115   : > { %6796 = vmatprep.mubr.msk.bf16.mxu0 %vm347_vm1, %v8847_v52  ;;  %v8108_v14 = vadd.f32 %v1828_v23, %v1362_v16  ;;  %v1365_v15 = vadd.f32 %v6569_v18, %v7880_v54  ;;  %v5119_v31 = vrot.slane %v6284_v60, 5  ;;  %v5122_v4 = vrot.slane %v6285_v62, 5  ;;  %v6207_v23 = vld [vmem:[%s7082_s7 + $0x74] sm:$0x1]  ;;  %v6287_v18 = vld [vmem:[%s7082_s7 + $0x70] sm:$0xf] }
 0x116   : > { %6763 = vmatmul.mubr.msk.bf16.vlgmr.msra.gmra.mxu1 %vm347_vm1, %v7947_v20  ;;  %v4389_v35 = vrot.slane %v4388_v7, 4  ;;  %v4399_v13 = vrot.slane %v4398_v2, 4  ;;  %v4403_v38 = vrot.slane %v4401_v22, 5  ;;  %v4406_v59 = vshrl.u32 %v6205_v32, 16 }
 0x117   : > { %6766 = vmatprep.mubr.msk.bf16.mxu1 %vm347_vm1, %v7979_v43  ;;  %v8114_v20 = vadd.f32 %v6603_v1, %v1365_v15  ;;  %v1363_v58 = vadd.f32 %v1262_v57, %v7897_v56  ;;  %v8119_v54 = vsel %vm7141_vm6, %v6319_v8, %v5119_v31  ;;  %v5121_v46 = vrot.slane %v5119_v31, 4  ;;  %v6286_v43 = vld [vmem:[%s7082_s7 + $0x6c] sm:$0xe]  ;;  %v6288_v56 = vld [vmem:[%s7082_s7 + $0x74] sm:$0x1] }
 0x118   : > { %v4394_v60 = vsel %vm7155_vm7, %v4389_v35, %v4393_v12  ;;  %v4404_v62 = vsel %vm7155_vm7, %v4399_v13, %v4403_v38  ;;  %v4408_v16 = vrot.slane %v4406_v59, 4  ;;  %v4409_v52 = vshll.u32 %v6205_v32, 16  ;;  %v6208_v8 = vld [vmem:[%s7082_s7 + $0x78] sm:$0xf] }
 0x119   : > { %v8129_v1 = vadd.f32 %v1831_v10, %v1363_v58  ;;  %v8131_v7 = vcombine.low %v4394_v60, %v4404_v62  ;;  %v8135_v2 = vsel %vm7141_vm6, %v5121_v46, %v5122_v4  ;;  %v4415_v22 = vshll.u32 %v6206_v19, 16  ;;  %v6209_v58 = vld [vmem:[%s7082_s7 + $0x7c] sm:$0xf]  ;;  %v6572_v46 = vpop.f32.mrf.mxu1  ;;  %v6606_v10 = vpop.f32.mrf.mxu0 }
 0x11a   : > { %v6336_v12 = vcombine.low %v8119_v54, %v8135_v2  ;;  %v4411_v15 = vrot.slane %v4409_v52, 5  ;;  %v4419_v31 = vshrl.u32 %v6206_v19, 16  ;;  %v4425_v57 = vshll.u32 %v6207_v23, 16 }
 0x11b   : > { %v8848_v32 = vcombine.low %v7913_v34, %v7933_v45  ;;  %v4417_v35 = vrot.slane %v4415_v22, 5  ;;  %v6320_v13 = vrot.slane %v6286_v43, 9  ;;  %v5126_v38 = vrot.slane %v6287_v18, 5  ;;  %v1275_v52 = vpop.f32.mrf.mxu1  ;;  %v1844_v18 = vpop.f32.mrf.mxu0 }
 0x11c   : > { %v5129_v59 = vrot.slane %v6288_v56, 5  ;;  %v8849_v4 = vcombine.low %v7954_v30, %v7964_v5  ;;  %v4412_v19 = vor.u32 %v4411_v15, %v4408_v16  ;;  %v4421_v23 = vrot.slane %v4419_v31, 4  ;;  %v6210_v56 = vld [vmem:[%s7082_s7 + $0x80] sm:$0x1] }
 0x11d   : > { %6797 = vmatmul.mubr.msk.bf16.vlgmr.msra.gmra.mxu0 %vm347_vm1, %v8848_v32  ;;  %v4427_v60 = vrot.slane %v4425_v57, 5  ;;  %v4430_v62 = vshrl.u32 %v6208_v8, 16  ;;  %v1368_v34 = vadd.f32 %v6572_v46, %v7905_v24  ;;  %v8154_v45 = vsel %vm7141_vm6, %v6320_v13, %v5126_v38  ;;  %v6289_v57 = vld [vmem:[%s7082_s7 + $0x78] sm:$0xe]  ;;  %v6290_v32 = vld [vmem:[%s7082_s7 + $0x7c] sm:$0xf]  ;;  %v6607_v46 = vpop.f32.mrf.mxu0 }
 0x11e   : > { %6800 = vmatprep.mubr.msk.bf16.mxu0 %vm347_vm1, %v8849_v4  ;;  %6767 = vmatmul.mubr.msk.bf16.gmra.mxu1 %vm347_vm1, %v8017_v0  ;;  %v5128_v30 = vrot.slane %v5126_v38, 4  ;;  %v4433_v5 = vshll.u32 %v6208_v8, 16  ;;  %v4413_v43 = vrot.slane %v4412_v19, 4  ;;  %v4422_v16 = vor.u32 %v4421_v23, %v4417_v35  ;;  %v6573_v4 = vpop.f32.mrf.mxu1 }
 0x11f   : > { %6770 = vmatprep.mubr.msk.bf16.mxu1 %vm347_vm1, %v8071_v37  ;;  %v4432_v22 = vrot.slane %v4430_v62, 4  ;;  %v4439_v0 = vshll.u32 %v6209_v58, 16  ;;  %v8159_v15 = vadd.f32 %v6606_v10, %v1368_v34  ;;  %v1366_v31 = vadd.f32 %v1275_v52, %v7920_v51  ;;  %v6291_v62 = vld [vmem:[%s7082_s7 + $0x80] sm:$0x1] }
 0x120   : > { %v8163_v24 = vsel %vm7141_vm6, %v5128_v30, %v5129_v59  ;;  %v4435_v8 = vrot.slane %v4433_v5, 5  ;;  %v4418_v37 = vsel %vm7155_vm7, %v4413_v43, %v4417_v35  ;;  %v4423_v13 = vrot.slane %v4422_v16, 4  ;;  %v1278_v34 = vpop.f32.mrf.mxu1  ;;  %v6211_v16 = vld [vmem:[%s7082_s7 + $0x84] sm:$0xf] }
 0x121   : > { %v6337_v38 = vcombine.low %v8154_v45, %v8163_v24  ;;  %v4441_v10 = vrot.slane %v4439_v0, 5  ;;  %v8172_v19 = vadd.f32 %v1844_v18, %v1366_v31  ;;  %v1369_v59 = vadd.f32 %v6573_v4, %v7937_v26  ;;  %v6292_v31 = vld [vmem:[%s7082_s7 + $0x84] sm:$0xe]  ;;  %v6294_v4 = vld [vmem:[%s7082_s7 + $0x8c] sm:$0x1] }
 0x122   : > { %v4436_v51 = vor.u32 %v4435_v8, %v4432_v22  ;;  %v4443_v23 = vshrl.u32 %v6209_v58, 16  ;;  %v4428_v35 = vsel %vm7155_vm7, %v4423_v13, %v4427_v60  ;;  %v4449_v30 = vshll.u32 %v6210_v56, 16  ;;  %v6212_v22 = vld [vmem:[%s7082_s7 + $0x88] sm:$0xf]  ;;  %v6213_v60 = vld [vmem:[%s7082_s7 + $0x8c] sm:$0x1]  ;;  %v1847_v56 = vpop.f32.mrf.mxu0 }
 0x123   : > { %v6321_v5 = vrot.slane %v6289_v57, 9  ;;  %v5133_v43 = vrot.slane %v6290_v32, 5  ;;  %v6240_v52 = vcombine.low %v4418_v37, %v4428_v35  ;;  %v8183_v26 = vadd.f32 %v6607_v46, %v1369_v59  ;;  %v6293_v8 = vld [vmem:[%s7082_s7 + $0x88] sm:$0xf] }
 0x124   : > { %v1367_v58 = vadd.f32 %v1278_v34, %v7950_v9  ;;  %v4437_v18 = vrot.slane %v4436_v51, 4  ;;  %v4445_v0 = vrot.slane %v4443_v23, 4  ;;  %v4451_v48 = vrot.slane %v4449_v30, 5  ;;  %v6214_v23 = vld [vmem:[%s7082_s7 + $0x90] sm:$0xf]  ;;  %v6576_v34 = vpop.f32.mrf.mxu1 }
 0x125   : > { %6801 = vmatmul.mubr.msk.bf16.gmra.mxu0 %vm347_vm1, %v6333_v3  ;;  %v8194_v21 = vsel %vm7141_vm6, %v6321_v5, %v5133_v43  ;;  %v5135_v3 = vrot.slane %v5133_v43, 4  ;;  %v5136_v49 = vrot.slane %v6291_v62, 5  ;;  %v4457_v32 = vshll.u32 %v6211_v16, 16 }
 0x126   : > { %6804 = vmatprep.mubr.msk.bf16.mxu0 %vm347_vm1, %v6334_v17  ;;  %6771 = vmatmul.mubr.msk.bf16.gmra.mxu1 %vm347_vm1, %v8096_v50  ;;  %v8199_v9 = vadd.f32 %v1847_v56, %v1367_v58  ;;  %v4442_v25 = vsel %vm7155_vm7, %v4437_v18, %v4441_v10  ;;  %v4454_v17 = vshrl.u32 %v6211_v16, 16  ;;  %v4446_v57 = vor.u32 %v4445_v0, %v4441_v10  ;;  %v1291_v56 = vpop.f32.mrf.mxu1 }
 0x127   : > { %6774 = vmatprep.mubr.msk.bf16.mxu1 %vm347_vm1, %v8131_v7  ;;  %v4463_v37 = vshll.u32 %v6212_v22, 16  ;;  %v4467_v13 = vshrl.u32 %v6212_v22, 16  ;;  %v8209_v50 = vsel %vm7141_vm6, %v5135_v3, %v5136_v49  ;;  %v4473_v59 = vshll.u32 %v6213_v60, 16  ;;  %v6610_v7 = vpop.f32.mrf.mxu0  ;;  %v6215_v3 = vld [vmem:[%s7082_s7 + $0x94] sm:$0xf] }
 0x128   : > { %v4456_v46 = vrot.slane %v4454_v17, 4  ;;  %v6322_v51 = vrot.slane %v6292_v31, 9  ;;  %v4447_v62 = vrot.slane %v4446_v57, 4  ;;  %v6338_v35 = vcombine.low %v8194_v21, %v8209_v50  ;;  %v6577_v27 = vpop.f32.mrf.mxu1  ;;  %v6299_v21 = vld [vmem:[%s7082_s7 + $0xa0] sm:$0xf] }
 0x129   : > { %v4459_v10 = vrot.slane %v4457_v32, 5  ;;  %v4465_v30 = vrot.slane %v4463_v37, 5  ;;  %v1372_v5 = vadd.f32 %v6576_v34, %v7705_v39  ;;  %v4469_v43 = vrot.slane %v4467_v13, 4  ;;  %v1860_v0 = vpop.f32.mrf.mxu0  ;;  %v6216_v13 = vld [vmem:[%s7082_s7 + $0x98] sm:$0x1]  ;;  %v8850_v34 = vld [vmem:[#allocation6_spill] sm:$0xff] }
 0x12a   : > { %v4475_v16 = vrot.slane %v4473_v59, 5  ;;  %v5140_v58 = vrot.slane %v6293_v8, 5  ;;  %v4452_v18 = vsel %vm7155_vm7, %v4447_v62, %v4451_v48  ;;  %v5143_v60 = vrot.slane %v6294_v4, 5  ;;  %v6295_v59 = vld [vmem:[%s7082_s7 + $0x90] sm:$0xe] }
 0x12b   : > { %v4460_v22 = vor.u32 %v4459_v10, %v4456_v46  ;;  %v4478_v31 = vshrl.u32 %v6214_v23, 16  ;;  %v6241_v49 = vcombine.low %v4442_v25, %v4452_v18  ;;  %v8222_v39 = vadd.f32 %v6610_v7, %v1372_v5  ;;  %v6297_v10 = vld [vmem:[%s7082_s7 + $0x98] sm:$0x1]  ;;  %v6300_v50 = vld [vmem:[%s7082_s7 + $0xa4] sm:$0x1] }
 0x12c   : > { %v4470_v17 = vor.u32 %v4469_v43, %v4465_v30  ;;  %v8226_v8 = vsel %vm7141_vm6, %v6322_v51, %v5140_v58  ;;  %v5142_v57 = vrot.slane %v5140_v58, 4  ;;  %v1370_v11 = vadd.f32 %v1291_v56, %v7729_v53 }
 0x12d   : > { %6805 = vmatmul.mubr.msk.bf16.gmra.mxu0 %vm347_vm1, %v6335_v28  ;;  %v4461_v48 = vrot.slane %v4460_v22, 4  ;;  %v6611_v28 = vpop.f32.mrf.mxu0  ;;  %v4480_v25 = vrot.slane %v4478_v31, 4  ;;  %v1373_v37 = vadd.f32 %v6577_v27, %v7750_v6  ;;  %v4481_v54 = vshll.u32 %v6214_v23, 16  ;;  %v6296_v6 = vld [vmem:[%s7082_s7 + $0x94] sm:$0xf] }
 0x12e   : > { %6808 = vmatprep.mubr.msk.bf16.mxu0 %vm347_vm1, %v6336_v12  ;;  %6775 = vmatmul.mubr.msk.bf16.gmra.mxu1 %vm347_vm1, %v6240_v52  ;;  %v4471_v32 = vrot.slane %v4470_v17, 4  ;;  %v4487_v2 = vshll.u32 %v6215_v3, 16  ;;  %v8241_v12 = vsel %vm7141_vm6, %v5142_v57, %v5143_v60  ;;  %v8243_v4 = vadd.f32 %v1860_v0, %v1370_v11  ;;  %v1294_v52 = vpop.f32.mrf.mxu1 }
 0x12f   : > { %6778 = vmatprep.mubr.msk.bf16.mxu1 %vm347_vm1, %v6241_v49  ;;  %v4466_v53 = vsel %vm7155_vm7, %v4461_v48, %v4465_v30  ;;  %v4491_v46 = vshrl.u32 %v6215_v3, 16  ;;  %v6339_v23 = vcombine.low %v8226_v8, %v8241_v12  ;;  %v8251_v62 = vadd.f32 %v6611_v28, %v1373_v37  ;;  %v6217_v30 = vld [vmem:[%s7082_s7 + $0x9c] sm:$0xf]  ;;  %v1863_v43 = vpop.f32.mrf.mxu0  ;;  %v6218_v3 = vld [vmem:[%s7082_s7 + $0xa0] sm:$0xf] }
 0x130   : > { %v4476_v51 = vsel %vm7155_vm7, %v4471_v32, %v4475_v16  ;;  %v1371_v7 = vadd.f32 %v1294_v52, %v8850_v34  ;;  %v4483_v58 = vrot.slane %v4481_v54, 5  ;;  %v4489_v18 = vrot.slane %v4487_v2, 5  ;;  %v6219_v28 = vld [vmem:[%s7082_s7 + $0xa4] sm:$0x1]  ;;  %v6298_v54 = vld [vmem:[%s7082_s7 + $0x9c] sm:$0xe] }
 0x131   : > { %v6242_v5 = vcombine.low %v4466_v53, %v4476_v51  ;;  %v4493_v22 = vrot.slane %v4491_v46, 4  ;;  %v4497_v56 = vshll.u32 %v6216_v13, 16  ;;  %v6323_v0 = vrot.slane %v6295_v59, 9  ;;  %v6580_v13 = vpop.f32.mrf.mxu1  ;;  %v6614_v45 = vpop.f32.mrf.mxu0  ;;  %v8851_v53 = vld [vmem:[#allocation7_spill] sm:$0xff] }
 0x132   : > { %v8256_v60 = vadd.f32 %v1863_v43, %v1371_v7  ;;  %v5147_v16 = vrot.slane %v6296_v6, 5  ;;  %v4484_v31 = vor.u32 %v4483_v58, %v4480_v25  ;;  %v5150_v17 = vrot.slane %v6297_v10, 5 }
 0x133   : > { %v4494_v49 = vor.u32 %v4493_v22, %v4489_v18  ;;  %v4502_v48 = vshrl.u32 %v6217_v30, 16  ;;  %v4499_v57 = vrot.slane %v4497_v56, 5  ;;  %v4505_v32 = vshll.u32 %v6217_v30, 16  ;;  %v1307_v7 = vpop.f32.mrf.mxu1  ;;  %v1876_v10 = vpop.f32.mrf.mxu0  ;;  %v6220_v22 = vld [vmem:[%s7082_s7 + $0xa8] sm:$0xf] }
 0x134   : > { %v5148_v11 = vsel %vm7141_vm6, %v6323_v0, %v5147_v16  ;;  %v5149_v27 = vrot.slane %v5147_v16, 4  ;;  %v4485_v25 = vrot.slane %v4484_v31, 4  ;;  %v1376_v52 = vadd.f32 %v6580_v13, %v8851_v53  ;;  %v6221_v13 = vld [vmem:[%s7082_s7 + $0xac] sm:$0xf]  ;;  %v6222_v53 = vld [vmem:[%s7082_s7 + $0xb0] sm:$0x1] }
 0x135   : > { %6809 = vmatmul.mubr.msk.bf16.gmra.mxu0 %vm347_vm1, %v6337_v38  ;;  %v4495_v37 = vrot.slane %v4494_v49, 4  ;;  %v4504_v24 = vrot.slane %v4502_v48, 4  ;;  %v4511_v38 = vshll.u32 %v6218_v3, 16  ;;  %v4507_v46 = vrot.slane %v4505_v32, 5  ;;  %v6581_v31 = vpop.f32.mrf.mxu1  ;;  %v8852_v48 = vld [vmem:[#allocation8_spill] sm:$0xff] }
 0x136   : > { %6812 = vmatprep.mubr.msk.bf16.mxu0 %vm347_vm1, %v6338_v35  ;;  %6779 = vmatmul.mubr.msk.bf16.gmra.mxu1 %vm347_vm1, %v6242_v5  ;;  %v5151_v2 = vsel %vm7141_vm6, %v5149_v27, %v5150_v17  ;;  %v4515_v59 = vshrl.u32 %v6218_v3, 16  ;;  %v4490_v35 = vsel %vm7155_vm7, %v4485_v25, %v4489_v18  ;;  %v8281_v5 = vadd.f32 %v6614_v45, %v1376_v52  ;;  %v6615_v18 = vpop.f32.mrf.mxu0 }
 0x137   : > { %v4500_v6 = vsel %vm7155_vm7, %v4495_v37, %v4499_v57  ;;  %v6340_v51 = vcombine.low %v5148_v11, %v5151_v2  ;;  %v4513_v34 = vrot.slane %v4511_v38, 5  ;;  %v4508_v43 = vor.u32 %v4507_v46, %v4504_v24  ;;  %v8853_v11 = vld [vmem:[#allocation9_spill] sm:$0xff]  ;;  %v8854_v46 = vld [vmem:[#allocation10_spill] sm:$0xff] }
 0x138   : > { %v6243_v30 = vcombine.low %v4490_v35, %v4500_v6  ;;  %v4517_v58 = vrot.slane %v4515_v59, 4  ;;  %v4521_v56 = vshll.u32 %v6219_v28, 16  ;;  %v6324_v0 = vrot.slane %v6298_v54, 9  ;;  %v1310_v28 = vpop.f32.mrf.mxu1  ;;  %v1879_v12 = vpop.f32.mrf.mxu0 }
 0x139   : > { %v5154_v16 = vrot.slane %v6299_v21, 5  ;;  %v5157_v3 = vrot.slane %v6300_v50, 5  ;;  %v4509_v49 = vrot.slane %v4508_v43, 4  ;;  %v1374_v57 = vadd.f32 %v1307_v7, %v8852_v48  ;;  %v6301_v21 = vld [vmem:[%s7082_s7 + $0xa8] sm:$0xe] }
 0x13a   : > { %6782 = vmatprep.mubr.msk.bf16.mxu1 %vm347_vm1, %v6243_v30  ;;  %v4518_v17 = vor.u32 %v4517_v58, %v4513_v34  ;;  %v1377_v27 = vadd.f32 %v6581_v31, %v8853_v11  ;;  %v4523_v32 = vrot.slane %v4521_v56, 5  ;;  %v4526_v45 = vshrl.u32 %v6220_v22, 16  ;;  %v6302_v50 = vld [vmem:[%s7082_s7 + $0xac] sm:$0xf]  ;;  %v6223_v30 = vld [vmem:[%s7082_s7 + $0xb4] sm:$0xf]  ;;  %v6584_v48 = vpop.f32.mrf.mxu1 }
 0x13b   : > { %v5155_v25 = vsel %vm7141_vm6, %v6324_v0, %v5154_v16  ;;  %v5156_v37 = vrot.slane %v5154_v16, 4  ;;  %v4514_v24 = vsel %vm7155_vm7, %v4509_v49, %v4513_v34  ;;  %v8296_v54 = vadd.f32 %v1876_v10, %v1374_v57  ;;  %v6303_v10 = vld [vmem:[%s7082_s7 + $0xb0] sm:$0x1]  ;;  %v6224_v31 = vld [vmem:[%s7082_s7 + $0xb8] sm:$0xf]  ;;  %v6618_v57 = vpop.f32.mrf.mxu0 }
 0x13c   : > { %v4519_v38 = vrot.slane %v4518_v17, 4  ;;  %v8298_v2 = vadd.f32 %v6615_v18, %v1377_v27  ;;  %v1375_v8 = vadd.f32 %v1310_v28, %v8854_v46  ;;  %v4529_v59 = vshll.u32 %v6220_v22, 16  ;;  %v1323_v46 = vpop.f32.mrf.mxu1 }
 0x13d   : > { %6813 = vmatmul.mubr.msk.bf16.gmra.mxu0 %vm347_vm1, %v6339_v23  ;;  %v5158_v52 = vsel %vm7141_vm6, %v5156_v37, %v5157_v3  ;;  %v4528_v23 = vrot.slane %v4526_v45, 4  ;;  %v4535_v34 = vshll.u32 %v6221_v13, 16  ;;  %v4539_v7 = vshrl.u32 %v6221_v13, 16  ;;  %v8855_v37 = vld [vmem:[#allocation11_spill] sm:$0xff]  ;;  %v6225_v13 = vld [vmem:[%s7082_s7 + $0xbc] sm:$0x1] }
 0x13e   : > { %6816 = vmatprep.mubr.msk.bf16.mxu0 %vm347_vm1, %v6340_v51  ;;  %v4524_v35 = vsel %vm7155_vm7, %v4519_v38, %v4523_v32  ;;  %v6341_v6 = vcombine.low %v5155_v25, %v5158_v52  ;;  %v8311_v43 = vadd.f32 %v1879_v12, %v1375_v8  ;;  %v4531_v58 = vrot.slane %v4529_v59, 5  ;;  %v6304_v52 = vld [vmem:[%s7082_s7 + $0xb4] sm:$0xe]  ;;  %v1892_v8 = vpop.f32.mrf.mxu0 }
 0x13f   : > { %v6244_v51 = vcombine.low %v4514_v24, %v4524_v35  ;;  %v4545_v56 = vshll.u32 %v6222_v53, 16  ;;  %v4537_v0 = vrot.slane %v4535_v34, 5  ;;  %v4541_v16 = vrot.slane %v4539_v7, 4  ;;  %v6306_v35 = vld [vmem:[%s7082_s7 + $0xbc] sm:$0x1] }
 0x140   : > { %v6325_v22 = vrot.slane %v6301_v21, 9  ;;  %v5161_v3 = vrot.slane %v6302_v50, 5  ;;  %v4532_v18 = vor.u32 %v4531_v58, %v4528_v23  ;;  %v5164_v17 = vrot.slane %v6303_v10, 5  ;;  %v6305_v50 = vld [vmem:[%s7082_s7 + $0xb8] sm:$0xf]  ;;  %v6619_v58 = vpop.f32.mrf.mxu0 }
 0x141   : > { %6783 = vmatmul.mubr.msk.bf16.gmra.mxu1 %vm347_vm1, %v6244_v51  ;;  %v4547_v49 = vrot.slane %v4545_v56, 5  ;;  %v4550_v11 = vshrl.u32 %v6223_v30, 16  ;;  %v4542_v27 = vor.u32 %v4541_v16, %v4537_v0  ;;  %v1380_v28 = vadd.f32 %v6584_v48, %v8855_v37  ;;  %v6585_v51 = vpop.f32.mrf.mxu1  ;;  %v6226_v48 = vld [vmem:[%s7082_s7 + $0xc0] sm:$0xf] }
 0x142   : > { %v5162_v32 = vsel %vm7141_vm6, %v6325_v22, %v5161_v3  ;;  %v5163_v25 = vrot.slane %v5161_v3, 4  ;;  %v4533_v45 = vrot.slane %v4532_v18, 4  ;;  %v4553_v38 = vshll.u32 %v6223_v30, 16 }
 0x143   : > { %v4552_v24 = vrot.slane %v4550_v11, 4  ;;  %v4559_v53 = vshll.u32 %v6224_v31, 16  ;;  %v4543_v12 = vrot.slane %v4542_v27, 4  ;;  %v8323_v59 = vadd.f32 %v6618_v57, %v1380_v28  ;;  %v8856_v27 = vld [vmem:[#allocation12_spill] sm:$0xff] }
 0x144   : > { %v5165_v23 = vsel %vm7141_vm6, %v5163_v25, %v5164_v17  ;;  %v4563_v21 = vshrl.u32 %v6224_v31, 16  ;;  %v4538_v34 = vsel %vm7155_vm7, %v4533_v45, %v4537_v0  ;;  %v4555_v10 = vrot.slane %v4553_v38, 5  ;;  %v1326_v0 = vpop.f32.mrf.mxu1  ;;  %v8857_v25 = vld [vmem:[#allocation13_spill] sm:$0xff]  ;;  %v8858_v45 = vld [vmem:[#allocation14_spill] sm:$0xff]  ;;  %v1895_v38 = vpop.f32.mrf.mxu0 }
 0x145   : > { %6817 = vmatmul.mubr.msk.bf16.gmra.mxu0 %vm347_vm1, %v6341_v6  ;;  %v6342_v7 = vcombine.low %v5162_v32, %v5165_v23  ;;  %v4561_v30 = vrot.slane %v4559_v53, 5  ;;  %v4548_v6 = vsel %vm7155_vm7, %v4543_v12, %v4547_v49  ;;  %v4569_v16 = vshll.u32 %v6225_v13, 16  ;;  %v6227_v53 = vld [vmem:[%s7082_s7 + $0xc4] sm:$0xf] }
 0x146   : > { %v4565_v56 = vrot.slane %v4563_v21, 4  ;;  %v6326_v22 = vrot.slane %v6304_v52, 9  ;;  %v6245_v3 = vcombine.low %v4538_v34, %v4548_v6  ;;  %v4556_v31 = vor.u32 %v4555_v10, %v4552_v24  ;;  %v6309_v6 = vld [vmem:[%s7082_s7 + $0xc8] sm:$0x1] }
 0x147   : > { %6820 = vmatprep.mubr.msk.bf16.mxu0 %vm347_vm1, %v6342_v7  ;;  %v5168_v18 = vrot.slane %v6305_v50, 5  ;;  %v5171_v17 = vrot.slane %v6306_v35, 5  ;;  %v4571_v11 = vrot.slane %v4569_v16, 5  ;;  %v1378_v32 = vadd.f32 %v1323_v46, %v8856_v27  ;;  %v6228_v46 = vld [vmem:[%s7082_s7 + $0xc8] sm:$0x1] }
 0x148   : > { %v4566_v57 = vor.u32 %v4565_v56, %v4561_v30  ;;  %v1381_v49 = vadd.f32 %v6585_v51, %v8857_v25  ;;  %6786 = vmatprep.mubr.msk.bf16.mxu1 %vm347_vm1, %v6245_v3  ;;  %v4557_v37 = vrot.slane %v4556_v31, 4  ;;  %v1379_v24 = vadd.f32 %v1326_v0, %v8858_v45  ;;  %v6307_v50 = vld [vmem:[%s7082_s7 + $0xc0] sm:$0xe]  ;;  %v6308_v51 = vld [vmem:[%s7082_s7 + $0xc4] sm:$0xf]  ;;  %v6622_v0 = vpop.f32.mrf.mxu0 }
 0x149   : > { %v5169_v28 = vsel %vm7141_vm6, %v6326_v22, %v5168_v18  ;;  %v5170_v13 = vrot.slane %v5168_v18, 4  ;;  %v8340_v12 = vadd.f32 %v1892_v8, %v1378_v32  ;;  %v4574_v21 = vshrl.u32 %v6226_v48, 16  ;;  %v6588_v18 = vpop.f32.mrf.mxu1  ;;  %v6230_v25 = vld [vmem:[%s7082_s7 + $0xd0] sm:$0xf] }
 0x14a   : > { %v4567_v52 = vrot.slane %v4566_v57, 4  ;;  %v8342_v23 = vadd.f32 %v6619_v58, %v1381_v49  ;;  %v4562_v35 = vsel %vm7155_vm7, %v4557_v37, %v4561_v30  ;;  %v8350_v7 = vadd.f32 %v1895_v38, %v1379_v24  ;;  %v6229_v57 = vld [vmem:[%s7082_s7 + $0xcc] sm:$0xf]  ;;  %v1908_v24 = vpop.f32.mrf.mxu0 }
 0x14b   : > { %v5172_v34 = vsel %vm7141_vm6, %v5170_v13, %v5171_v17  ;;  %v4577_v10 = vshll.u32 %v6226_v48, 16  ;;  %v4576_v56 = vrot.slane %v4574_v21, 4  ;;  %v4583_v16 = vshll.u32 %v6227_v53, 16  ;;  %v1339_v45 = vpop.f32.mrf.mxu1 }
 0x14c   : > { %v4572_v8 = vsel %vm7155_vm7, %v4567_v52, %v4571_v11  ;;  %v6343_v58 = vcombine.low %v5169_v28, %v5172_v34  ;;  %v4587_v31 = vshrl.u32 %v6227_v53, 16  ;;  %v4593_v30 = vshll.u32 %v6228_v46, 16  ;;  %v8859_v28 = vld [vmem:[#allocation15_spill] sm:$0xff]  ;;  %v6231_v52 = vld [vmem:[%s7082_s7 + $0xd4] sm:$0x1] }
 0x14d   : > { %v6246_v22 = vcombine.low %v4562_v35, %v4572_v8  ;;  %v4579_v3 = vrot.slane %v4577_v10, 5  ;;  %v4585_v17 = vrot.slane %v4583_v16, 5  ;;  %v6327_v48 = vrot.slane %v6307_v50, 9  ;;  %v6589_v8 = vpop.f32.mrf.mxu1 }
 0x14e   : > { %6821 = vmatmul.mubr.msk.bf16.gmra.mxu0 %vm347_vm1, %v6343_v58  ;;  %v5175_v27 = vrot.slane %v6308_v51, 5  ;;  %v5178_v32 = vrot.slane %v6309_v6, 5  ;;  %v4589_v49 = vrot.slane %v4587_v31, 4  ;;  %v4595_v37 = vrot.slane %v4593_v30, 5  ;;  %v6310_v51 = vld [vmem:[%s7082_s7 + $0xcc] sm:$0xe]  ;;  %v6623_v58 = vpop.f32.mrf.mxu0 }
 0x14f   : > { %6787 = vmatmul.mubr.msk.bf16.gmra.mxu1 %vm347_vm1, %v6246_v22  ;;  %v4580_v11 = vor.u32 %v4579_v3, %v4576_v56  ;;  %v1384_v13 = vadd.f32 %v6588_v18, %v8859_v28  ;;  %v4598_v46 = vshrl.u32 %v6229_v57, 16  ;;  %v4601_v21 = vshll.u32 %v6229_v57, 16  ;;  %v6311_v6 = vld [vmem:[%s7082_s7 + $0xd0] sm:$0xf]  ;;  %v6312_v31 = vld [vmem:[%s7082_s7 + $0xd4] sm:$0x1] }
 0x150   : > { %v5176_v38 = vsel %vm7141_vm6, %v6327_v48, %v5175_v27  ;;  %v5177_v53 = vrot.slane %v5175_v27, 4  ;;  %v4590_v35 = vor.u32 %v4589_v49, %v4585_v17  ;;  %v4607_v10 = vshll.u32 %v6230_v25, 16  ;;  %s6368_s7 = sshll.u32 %s7036_s16, 12  ;;  %s8777_s16 = scalar_lea.sflag [#allocation4], %s161_s29 }
 0x151   : > { %v4581_v50 = vrot.slane %v4580_v11, 4  ;;  %v8364_v34 = vadd.f32 %v6622_v0, %v1384_v13  ;;  %v4600_v16 = vrot.slane %v4598_v46, 4  ;;  %v4603_v22 = vrot.slane %v4601_v21, 5  ;;  %v1342_v0 = vpop.f32.mrf.mxu1  ;;  %v1911_v13 = vpop.f32.mrf.mxu0  ;;  %s8769_s11 = scalar_lea.hbm %s8820_s3, %s6368_s7 }
 0x152   : > { %v5179_v56 = vsel %vm7141_vm6, %v5177_v53, %v5178_v32  ;;  %v4611_v3 = vshrl.u32 %v6230_v25, 16  ;;  %v4591_v18 = vrot.slane %v4590_v35, 4  ;;  %v4609_v48 = vrot.slane %v4607_v10, 5  ;;  %v8861_v53 = vld [vmem:[#allocation16_spill] sm:$0xff] }
 0x153   : > { %8860 = vst [vmem:[#allocation6_spill] sm:$0xff] %v8364_v34  ;;  %v4586_v30 = vsel %vm7155_vm7, %v4581_v50, %v4585_v17  ;;  %v6344_v57 = vcombine.low %v5176_v38, %v5179_v56  ;;  %v4604_v27 = vor.u32 %v4603_v22, %v4600_v16  ;;  %v4617_v49 = vshll.u32 %v6231_v52, 16  ;;  %v6628_v21 = vpop.f32.mrf.mxu1  ;;  %v8862_v56 = vld [vmem:[#allocation17_spill] sm:$0xff]  ;;  %v8863_v22 = vld [vmem:[#allocation18_spill] sm:$0xff] }
 0x154   : > { %v4613_v11 = vrot.slane %v4611_v3, 4  ;;  %v6328_v28 = vrot.slane %v6310_v51, 9  ;;  %v4596_v34 = vsel %vm7155_vm7, %v4591_v18, %v4595_v37  ;;  %v5182_v32 = vrot.slane %v6311_v6, 5 }
 0x155   : > { %6824 = vmatprep.mubr.msk.bf16.mxu0 %vm347_vm1, %v6344_v57  ;;  %v5185_v25 = vrot.slane %v6312_v31, 5  ;;  %v1382_v46 = vadd.f32 %v1339_v45, %v8861_v53  ;;  %v6247_v17 = vcombine.low %v4586_v30, %v4596_v34  ;;  %v4605_v50 = vrot.slane %v4604_v27, 4  ;;  %v2219_v37 = vpop.f32.mrf.mxu1  ;;  %v6662_v31 = vpop.f32.mrf.mxu0 }
 0x156   : > { %v4614_v38 = vor.u32 %v4613_v11, %v4609_v48  ;;  %v4619_v35 = vrot.slane %v4617_v49, 5  ;;  %v5183_v10 = vsel %vm7141_vm6, %v6328_v28, %v5182_v32  ;;  %v5184_v52 = vrot.slane %v5182_v32, 4 }
 0x157   : > { %v8379_v51 = vadd.f32 %v1908_v24, %v1382_v46  ;;  %v1385_v16 = vadd.f32 %v6589_v8, %v8862_v56  ;;  %6790 = vmatprep.mubr.msk.bf16.mxu1 %vm347_vm1, %v6247_v17  ;;  %v4610_v6 = vsel %vm7155_vm7, %v4605_v50, %v4609_v48  ;;  %v1383_v34 = vadd.f32 %v1342_v0, %v8863_v22  ;;  %v6629_v8 = vpop.f32.mrf.mxu1  ;;  %v3009_v0 = vpop.f32.mrf.mxu0 }
 0x158   : > { %v4615_v45 = vrot.slane %v4614_v38, 4  ;;  %v2348_v3 = vadd.f32 %v6628_v21, %v7986_v36  ;;  %v5186_v30 = vsel %vm7141_vm6, %v5184_v52, %v5185_v25  ;;  %v2346_v24 = vadd.f32 %v2219_v37, %v7995_v41 }
 0x159   : > { %v8389_v18 = vadd.f32 %v6623_v58, %v1385_v16  ;;  %v6345_v27 = vcombine.low %v5183_v10, %v5186_v30  ;;  %v8394_v11 = vadd.f32 %v1911_v13, %v1383_v34  ;;  %v2349_v42 = vadd.f32 %v6629_v8, %v8007_v63  ;;  %v2222_v28 = vpop.f32.mrf.mxu1  ;;  %v6663_v58 = vpop.f32.mrf.mxu0 }
 0x15a   : > { %v4620_v57 = vsel %vm7155_vm7, %v4615_v45, %v4619_v35  ;;  %v8396_v48 = vadd.f32 %v6662_v31, %v2348_v3  ;;  %v8398_v36 = vadd.f32 %v3009_v0, %v2346_v24  ;;  %v2347_v41 = vadd.f32 %v2222_v28, %v8024_v29 }
 0x15b   : > { %v6248_v49 = vcombine.low %v4610_v6, %v4620_v57  ;;  %6825 = vmatmul.mubr.msk.bf16.gmra.mxu0 %vm347_vm1, %v6345_v27  ;;  %v8404_v55 = vadd.f32 %v6663_v58, %v2349_v42  ;;  %v6632_v13 = vpop.f32.mrf.mxu1  ;;  %v3012_v32 = vpop.f32.mrf.mxu0 }
 0x15c   : > { %v2352_v25 = vadd.f32 %v6632_v13, %v8032_v47  ;;  %v8407_v53 = vadd.f32 %v3012_v32, %v2347_v41 }
 0x15d   : > { %6791 = vmatmul.mubr.msk.bf16.gmra.mxu1 %vm347_vm1, %v6248_v49  ;;  %v2235_v46 = vpop.f32.mrf.mxu1  ;;  %v6666_v21 = vpop.f32.mrf.mxu0 }
 0x15e   : > { %v2350_v63 = vadd.f32 %v2235_v46, %v8043_v40  ;;  %v8410_v17 = vadd.f32 %v6666_v21, %v2352_v25 }
 0x15f   : > { %v6633_v50 = vpop.f32.mrf.mxu1  ;;  %v3025_v38 = vpop.f32.mrf.mxu0 }
 0x160   : > { %v2353_v29 = vadd.f32 %v6633_v50, %v8054_v44  ;;  %v8413_v35 = vadd.f32 %v3025_v38, %v2350_v63 }
 0x161   : > { %v2238_v10 = vpop.f32.mrf.mxu1  ;;  %v6667_v52 = vpop.f32.mrf.mxu0 }
 0x162   : > { %v2351_v56 = vadd.f32 %v2238_v10, %v8069_v33  ;;  %v8416_v16 = vadd.f32 %v6667_v52, %v2353_v29 }
 0x163   : > { %v6636_v47 = vpop.f32.mrf.mxu1  ;;  %v3028_v37 = vpop.f32.mrf.mxu0 }
 0x164   : > { %v2356_v6 = vadd.f32 %v6636_v47, %v8094_v61  ;;  %v8419_v45 = vadd.f32 %v3028_v37, %v2351_v56 }
 0x165   : > { %v2251_v40 = vpop.f32.mrf.mxu1  ;;  %v6670_v3 = vpop.f32.mrf.mxu0 }
 0x166   : > { %v2354_v22 = vadd.f32 %v2251_v40, %v8108_v14  ;;  %v8423_v31 = vadd.f32 %v6670_v3, %v2356_v6 }
 0x167   : > { %v6637_v34 = vpop.f32.mrf.mxu1  ;;  %v3041_v24 = vpop.f32.mrf.mxu0 }
 0x168   : > { %v2357_v44 = vadd.f32 %v6637_v34, %v8114_v20  ;;  %v8426_v8 = vadd.f32 %v3041_v24, %v2354_v22 }
 0x169   : > { %v2254_v30 = vpop.f32.mrf.mxu1  ;;  %v6671_v27 = vpop.f32.mrf.mxu0 }
 0x16a   : > { %v2355_v33 = vadd.f32 %v2254_v30, %v8129_v1  ;;  %v8429_v0 = vadd.f32 %v6671_v27, %v2357_v44 }
 0x16b   : > { %v6640_v57 = vpop.f32.mrf.mxu1  ;;  %v3044_v14 = vpop.f32.mrf.mxu0 }
 0x16c   : > { %v2360_v61 = vadd.f32 %v6640_v57, %v8159_v15  ;;  %v8432_v28 = vadd.f32 %v3044_v14, %v2355_v33 }
 0x16d   : > { %v2267_v49 = vpop.f32.mrf.mxu1  ;;  %v6674_v58 = vpop.f32.mrf.mxu0 }
 0x16e   : > { %v2358_v42 = vadd.f32 %v2267_v49, %v8172_v19  ;;  %v8435_v13 = vadd.f32 %v6674_v58, %v2360_v61 }
 0x16f   : > { %v6641_v20 = vpop.f32.mrf.mxu1  ;;  %v3057_v32 = vpop.f32.mrf.mxu0 }
 0x170   : > { %v2361_v41 = vadd.f32 %v6641_v20, %v8183_v26  ;;  %v8438_v46 = vadd.f32 %v3057_v32, %v2358_v42 }
 0x171   : > { %v2270_v1 = vpop.f32.mrf.mxu1  ;;  %v6675_v21 = vpop.f32.mrf.mxu0 }
 0x172   : > { %v2359_v25 = vadd.f32 %v2270_v1, %v8199_v9  ;;  %v8441_v50 = vadd.f32 %v6675_v21, %v2361_v41 }
 0x173   : > { %v6644_v15 = vpop.f32.mrf.mxu1  ;;  %v3060_v38 = vpop.f32.mrf.mxu0 }
 0x174   : > { %v2364_v63 = vadd.f32 %v6644_v15, %v8222_v39  ;;  %8864 = vst [vmem:[#allocation7_spill] sm:$0xff] %v8441_v50  ;;  %v8444_v10 = vadd.f32 %v3060_v38, %v2359_v25 }
 0x175   : > { %v2283_v19 = vpop.f32.mrf.mxu1  ;;  %v6678_v52 = vpop.f32.mrf.mxu0 }
 0x176   : > { %v2362_v29 = vadd.f32 %v2283_v19, %v8243_v4  ;;  %8865 = vst [vmem:[#allocation8_spill] sm:$0xff] %v8444_v10  ;;  %v8447_v47 = vadd.f32 %v6678_v52, %v2364_v63 }
 0x177   : > { %v6645_v26 = vpop.f32.mrf.mxu1  ;;  %v3073_v37 = vpop.f32.mrf.mxu0 }
 0x178   : > { %v2365_v56 = vadd.f32 %v6645_v26, %v8251_v62  ;;  %8866 = vst [vmem:[#allocation9_spill] sm:$0xff] %v8447_v47  ;;  %v8450_v40 = vadd.f32 %v3073_v37, %v2362_v29 }
 0x179   : > { %v2286_v9 = vpop.f32.mrf.mxu1  ;;  %v6679_v22 = vpop.f32.mrf.mxu0 }
 0x17a   : > { %v2363_v6 = vadd.f32 %v2286_v9, %v8256_v60  ;;  %8867 = vst [vmem:[#allocation10_spill] sm:$0xff] %v8450_v40  ;;  %v8453_v3 = vadd.f32 %v6679_v22, %v2365_v56 }
 0x17b   : > { %v6648_v39 = vpop.f32.mrf.mxu1  ;;  %v3076_v44 = vpop.f32.mrf.mxu0 }
 0x17c   : > { %v2368_v34 = vadd.f32 %v6648_v39, %v8281_v5  ;;  %8868 = vst [vmem:[#allocation11_spill] sm:$0xff] %v8453_v3  ;;  %v8456_v24 = vadd.f32 %v3076_v44, %v2363_v6 }
 0x17d   : > { %v2299_v4 = vpop.f32.mrf.mxu1  ;;  %v6682_v33 = vpop.f32.mrf.mxu0 }
 0x17e   : > { %v2366_v30 = vadd.f32 %v2299_v4, %v8296_v54  ;;  %8869 = vst [vmem:[#allocation12_spill] sm:$0xff] %v8456_v24  ;;  %v8459_v27 = vadd.f32 %v6682_v33, %v2368_v34 }
 0x17f   : > { %v6649_v62 = vpop.f32.mrf.mxu1  ;;  %v3089_v61 = vpop.f32.mrf.mxu0 }
 0x180   : > { %v2369_v57 = vadd.f32 %v6649_v62, %v8298_v2  ;;  %8870 = vst [vmem:[#allocation13_spill] sm:$0xff] %v8459_v27  ;;  %v8462_v14 = vadd.f32 %v3089_v61, %v2366_v30 }
 0x181   : > { %v2302_v60 = vpop.f32.mrf.mxu1  ;;  %v6683_v42 = vpop.f32.mrf.mxu0 }
 0x182   : > { %v2367_v49 = vadd.f32 %v2302_v60, %v8311_v43  ;;  %8871 = vst [vmem:[#allocation14_spill] sm:$0xff] %v8462_v14  ;;  %v8465_v58 = vadd.f32 %v6683_v42, %v2369_v57 }
 0x183   : > { %v6652_v5 = vpop.f32.mrf.mxu1  ;;  %v3092_v41 = vpop.f32.mrf.mxu0 }
 0x184   : > { %v2372_v20 = vadd.f32 %v6652_v5, %v8323_v59  ;;  %8872 = vst [vmem:[#allocation15_spill] sm:$0xff] %v8465_v58  ;;  %v8468_v32 = vadd.f32 %v3092_v41, %v2367_v49  ;;  %v8874_v59 = vld [vmem:[#allocation6_spill] sm:$0xff] }
 0x185   : > { %v2315_v54 = vpop.f32.mrf.mxu1  ;;  %v6686_v21 = vpop.f32.mrf.mxu0 }
 0x186   : > { %v2370_v1 = vadd.f32 %v2315_v54, %v8340_v12  ;;  %8873 = vst [vmem:[#allocation16_spill] sm:$0xff] %v8468_v32  ;;  %v8472_v63 = vadd.f32 %v6686_v21, %v2372_v20 }
 0x187   : > { %v6653_v2 = vpop.f32.mrf.mxu1  ;;  %v3105_v38 = vpop.f32.mrf.mxu0 }
 0x188   : > { %v2373_v25 = vadd.f32 %v6653_v2, %v8342_v23  ;;  %v8475_v26 = vadd.f32 %v3105_v38, %v2370_v1 }
 0x189   : > { %v2318_v15 = vpop.f32.mrf.mxu1  ;;  %v6687_v56 = vpop.f32.mrf.mxu0 }
 0x18a   : > { %v2371_v43 = vadd.f32 %v2318_v15, %v8350_v7  ;;  %v8478_v9 = vadd.f32 %v6687_v56, %v2373_v25 }
 0x18b   : > { %v6656_v19 = vpop.f32.mrf.mxu1  ;;  %v3108_v23 = vpop.f32.mrf.mxu0 }
 0x18c   : > { %v2376_v29 = vadd.f32 %v6656_v19, %v8874_v59  ;;  %v8481_v39 = vadd.f32 %v3108_v23, %v2371_v43 }
 0x18d   : > { %v2331_v52 = vpop.f32.mrf.mxu1  ;;  %v6690_v22 = vpop.f32.mrf.mxu0 }
 0x18e   : > { %v2374_v12 = vadd.f32 %v2331_v52, %v8379_v51  ;;  %v8484_v4 = vadd.f32 %v6690_v22, %v2376_v29 }
 0x18f   : > { %v6657_v37 = vpop.f32.mrf.mxu1  ;;  %v3121_v30 = vpop.f32.mrf.mxu0 }
 0x190   : > { %v2377_v6 = vadd.f32 %v6657_v37, %v8389_v18  ;;  %v8488_v62 = vadd.f32 %v3121_v30, %v2374_v12 }
 0x191   : > { %v2334_v7 = vpop.f32.mrf.mxu1  ;;  %v6691_v33 = vpop.f32.mrf.mxu0 }
 0x192   : > { %v2375_v34 = vadd.f32 %v2334_v7, %v8394_v11  ;;  %v8492_v57 = vadd.f32 %v6691_v33, %v2377_v6 }
 0x193   : > { %v8486_v44 = vpop.f32.mrf.mxu1  ;;  %v3124_v18 = vpop.f32.mrf.mxu0 }
 0x194   : > { %v8496_v61 = vadd.f32 %v3124_v18, %v2375_v34 }
 0x195   : > { %v8490_v51 = vpop.f32.mrf.mxu1  ;;  %v8500_v11 = vpop.f32.mrf.mxu0 }
 0x197   : > { %v8494_v60 = vpop.f32.mrf.mxu1  ;;  %v8502_v5 = vpop.f32.mrf.mxu0 }
 0x199   : > { %v8498_v49 = vpop.f32.mrf.mxu1  ;;  %v8506_v20 = vpop.f32.mrf.mxu0 }
 0x19b   : > { %v8504_v42 = vpop.f32.mrf.mxu1  ;;  %v8510_v41 = vpop.f32.mrf.mxu0 }
 0x19d   : > { %v8508_v54 = vpop.f32.mrf.mxu1  ;;  %v8514_v2 = vpop.f32.mrf.mxu0 }
 0x19f   : > { %v8512_v1 = vpop.f32.mrf.mxu1  ;;  %v8518_v15 = vpop.f32.mrf.mxu0 }
 0x1a1   : > { %v8516_v25 = vpop.f32.mrf.mxu1  ;;  %v8522_v43 = vpop.f32.mrf.mxu0 }
 0x1a3   : > { %v8520_v21 = vpop.f32.mrf.mxu1  ;;  %v8526_v38 = vpop.f32.mrf.mxu0 }
 0x1a5   : > { %v8524_v19 = vpop.f32.mrf.mxu1  ;;  %v8530_v29 = vpop.f32.mrf.mxu0 }
 0x1a7   : > { %v8528_v59 = vpop.f32.mrf.mxu1  ;;  %v8534_v56 = vpop.f32.mrf.mxu0 }
 0x1a9   : > { %v8532_v52 = vpop.f32.mrf.mxu1  ;;  %v8538_v37 = vpop.f32.mrf.mxu0 }
 0x1ab   : > { %v8536_v12 = vpop.f32.mrf.mxu1  ;;  %v8542_v6 = vpop.f32.mrf.mxu0 }
 0x1ad   : > { %v8540_v23 = vpop.f32.mrf.mxu1  ;;  %v8546_v22 = vpop.f32.mrf.mxu0 }
 0x1af   : > { %v8544_v7 = vpop.f32.mrf.mxu1  ;;  %v8550_v30 = vpop.f32.mrf.mxu0 }
 0x1b0   : > { %8875 = vst [vmem:[#allocation17_spill] sm:$0xff] %v8544_v7  ;;  %8877 = vst [vmem:[#allocation6_spill] sm:$0xff] %v8550_v30 }
 0x1b1   : > { %v8548_v34 = vpop.f32.mrf.mxu1  ;;  %v8554_v18 = vpop.f32.mrf.mxu0 }
 0x1b2   : > { %8876 = vst [vmem:[#allocation18_spill] sm:$0xff] %v8548_v34  ;;  %8879 = vst [vmem:[#allocation20_spill] sm:$0xff] %v8554_v18 }
 0x1b3   : > { %v8552_v33 = vpop.f32.mrf.mxu1  ;;  %v8558_v58 = vpop.f32.mrf.mxu0 }
 0x1b4   : > { %8878 = vst [vmem:[#allocation19_spill] sm:$0xff] %v8552_v33  ;;  %8881 = vst [vmem:[#allocation22_spill] sm:$0xff] %v8558_v58 }
 0x1b5   : > { %v8556_v32 = vpop.f32.mrf.mxu1  ;;  %v8562_v27 = vpop.f32.mrf.mxu0 }
 0x1b6   : > { %8880 = vst [vmem:[#allocation21_spill] sm:$0xff] %v8556_v32  ;;  %8883 = vst [vmem:[#allocation24_spill] sm:$0xff] %v8562_v27 }
 0x1b7   : > { %v8560_v14 = vpop.f32.mrf.mxu1  ;;  %v8566_v3 = vpop.f32.mrf.mxu0 }
 0x1b8   : > { %8882 = vst [vmem:[#allocation23_spill] sm:$0xff] %v8560_v14  ;;  %8885 = vst [vmem:[#allocation26_spill] sm:$0xff] %v8566_v3 }
 0x1b9   : > { %v8564_v24 = vpop.f32.mrf.mxu1  ;;  %v8570_v47 = vpop.f32.mrf.mxu0 }
 0x1ba   : > { %8884 = vst [vmem:[#allocation25_spill] sm:$0xff] %v8564_v24  ;;  %8887 = vst [vmem:[#allocation28_spill] sm:$0xff] %v8570_v47 }
 0x1bb   : > { %v8568_v40 = vpop.f32.mrf.mxu1  ;;  %v8574_v33 = vpop.f32.mrf.mxu0 }
 0x1bc   : > { %8886 = vst [vmem:[#allocation27_spill] sm:$0xff] %v8568_v40  ;;  %8889 = vst [vmem:[#allocation30_spill] sm:$0xff] %v8574_v33 }
 0x1bd   : > { %v8572_v34 = vpop.f32.mrf.mxu1  ;;  %v8578_v32 = vpop.f32.mrf.mxu0 }
 0x1be   : > { %8888 = vst [vmem:[#allocation29_spill] sm:$0xff] %v8572_v34  ;;  %8891 = vst [vmem:[#allocation32_spill] sm:$0xff] %v8578_v32 }
 0x1bf   : > { %v8576_v18 = vpop.f32.mrf.mxu1  ;;  %v8582_v14 = vpop.f32.mrf.mxu0 }
 0x1c0   : > { %8890 = vst [vmem:[#allocation31_spill] sm:$0xff] %v8576_v18  ;;  %8893 = vst [vmem:[#allocation34_spill] sm:$0xff] %v8582_v14 }
 0x1c1   : > { %v8580_v58 = vpop.f32.mrf.mxu1  ;;  %v8585_v3 = vpop.f32.mrf.mxu0 }
 0x1c2   : > { %8892 = vst [vmem:[#allocation33_spill] sm:$0xff] %v8580_v58  ;;  %8894 = vst [vmem:[#allocation35_spill] sm:$0xff] %v8585_v3 }
 0x1c3   : > { %v8588_v10 = vpop.f32.mrf.mxu0 }
 0x1c4   : > { %8895 = vst [vmem:[#allocation36_spill] sm:$0xff] %v8588_v10 }
 0x1c5   : > { %v6754_v18 = vpop.f32.mrf.mxu0 }
 0x1c6   : > { %v6720_v27 = vpop.f32.mrf.mxu1 }
 0x1c7   : > { %v3728_v24 = vadd.f32 %v6720_v27, %v8472_v63  ;;  %v4094_v14 = vpop.f32.mrf.mxu0 }
 0x1c8   : > { %v3671_v40 = vpop.f32.mrf.mxu1 }
 0x1c9   : > { %v3726_v47 = vadd.f32 %v3671_v40, %v8475_v26  ;;  %v8591_v32 = vadd.f32 %v6754_v18, %v3728_v24  ;;  %v6755_v63 = vpop.f32.mrf.mxu0  ;;  %v3704_v24 = vadd.f32 %v8486_v44, %v8396_v48  ;;  %v3705_v48 = vadd.f32 %v8494_v60, %v8404_v55 }
 0x1ca   : > { %v6721_v34 = vpop.f32.mrf.mxu1  ;;  %v3708_v55 = vadd.f32 %v8504_v42, %v8410_v17  ;;  %v3709_v17 = vadd.f32 %v8512_v1, %v8416_v16 }
 0x1cb   : > { %v3729_v33 = vadd.f32 %v6721_v34, %v8478_v9  ;;  %v8594_v50 = vadd.f32 %v4094_v14, %v3726_v47  ;;  %v4097_v10 = vpop.f32.mrf.mxu0  ;;  %v3702_v14 = vadd.f32 %v8490_v51, %v8398_v36  ;;  %v3703_v36 = vadd.f32 %v8498_v49, %v8407_v53  ;;  %v8631_v53 = vld [vmem:[%s8819_s2] ss:$0 sm:$0xff] }
 0x1cc   : > { %v3674_v30 = vpop.f32.mrf.mxu1  ;;  %v4132_v1 = vadd.f32 %v8522_v43, %v3709_v17  ;;  %v3710_v43 = vadd.f32 %v8524_v19, %v8426_v8 }
 0x1cd   : > { %v3727_v58 = vadd.f32 %v3674_v30, %v8481_v39  ;;  %v8597_v40 = vadd.f32 %v6755_v63, %v3729_v33  ;;  %v6758_v30 = vpop.f32.mrf.mxu0  ;;  %v4127_v33 = vadd.f32 %v8500_v11, %v3704_v24  ;;  %v4128_v11 = vadd.f32 %v8506_v20, %v3705_v48 }
 0x1ce   : > { %v6724_v7 = vpop.f32.mrf.mxu1 }
 0x1cf   : > { %v3732_v27 = vadd.f32 %v6724_v7, %v8484_v4  ;;  %v8602_v34 = vadd.f32 %v4097_v10, %v3727_v58 }
 0x1d0   : > { %v3687_v3 = vpop.f32.mrf.mxu1 }
 0x1d1   : > { %v3730_v26 = vadd.f32 %v3687_v3, %v8488_v62  ;;  %v8607_v4 = vadd.f32 %v6758_v30, %v3732_v27  ;;  %v4110_v3 = vpop.f32.mrf.mxu0 }
 0x1d2   : > { %v6725_v9 = vpop.f32.mrf.mxu1 }
 0x1d3   : > { %v3733_v39 = vadd.f32 %v6725_v9, %v8492_v57  ;;  %v8613_v10 = vadd.f32 %v4110_v3, %v3730_v26  ;;  %v6759_v58 = vpop.f32.mrf.mxu0  ;;  %v4125_v57 = vadd.f32 %v8502_v5, %v3702_v14  ;;  %v3706_v5 = vadd.f32 %v8508_v54, %v8413_v35 }
 0x1d4   : > { %v3690_v47 = vpop.f32.mrf.mxu1  ;;  %v4126_v9 = vadd.f32 %v8510_v41, %v3703_v36  ;;  %v4131_v35 = vadd.f32 %v8514_v2, %v3708_v55  ;;  %v3707_v41 = vadd.f32 %v8516_v25, %v8419_v45  ;;  %v3712_v2 = vadd.f32 %v8520_v21, %v8423_v31 }
 0x1d5   : > { %v3731_v7 = vadd.f32 %v3690_v47, %v8496_v61  ;;  %v8618_v51 = vadd.f32 %v6759_v58, %v3733_v39  ;;  %v4113_v18 = vpop.f32.mrf.mxu0  ;;  %v4129_v14 = vadd.f32 %v8518_v15, %v3706_v5 }
 0x1d6   : > { %v6764_v62 = vpop.f32.mrf.mxu1  ;;  %v4130_v36 = vadd.f32 %v8526_v38, %v3707_v41  ;;  %v4135_v55 = vadd.f32 %v8530_v29, %v3712_v2  ;;  %v3714_v41 = vadd.f32 %v8540_v23, %v8438_v46 }
 0x1d7   : > { %v4917_v61 = vadd.f32 %v6764_v62, %v4127_v33  ;;  %v8624_v60 = vadd.f32 %v4113_v18, %v3731_v7 }
 0x1d8   : > { %v4788_v44 = vpop.f32.mrf.mxu1 }
 0x1d9   : > { %v4915_v63 = vadd.f32 %v4788_v44, %v4125_v57 }
 0x1da   : > { %v6765_v27 = vpop.f32.mrf.mxu1 }
 0x1db   : > { %v4918_v24 = vadd.f32 %v6765_v27, %v4128_v11 }
 0x1dc   : > { %v4791_v49 = vpop.f32.mrf.mxu1 }
 0x1dd   : > { %v6798_v26 = vpop.f32.mrf.mxu0  ;;  %v4916_v47 = vadd.f32 %v4791_v49, %v4126_v9  ;;  %v4133_v9 = vadd.f32 %v8534_v56, %v3710_v43 }
 0x1de   : > { %v5483_v20 = vadd.f32 %v6798_v26, %v4917_v61  ;;  %v6768_v39 = vpop.f32.mrf.mxu1 }
 0x1df   : > { %v5354_v42 = vpop.f32.mrf.mxu0  ;;  %v4921_v16 = vadd.f32 %v6768_v39, %v4131_v35  ;;  %v3716_v35 = vadd.f32 %v8536_v12, %v8435_v13 }
 0x1e0   : > { %v5586_v54 = vadd.f32 %v8631_v53, %v5483_v20  ;;  %v5481_v30 = vadd.f32 %v5354_v42, %v4915_v63  ;;  %v4804_v3 = vpop.f32.mrf.mxu1  ;;  %v3713_v63 = vadd.f32 %v8528_v59, %v8429_v0  ;;  %v3711_v20 = vadd.f32 %v8532_v52, %v8432_v28 }
 0x1e1   : > { %v6799_v7 = vpop.f32.mrf.mxu0  ;;  %v4919_v57 = vadd.f32 %v4804_v3, %v4129_v14 }
 0x1e2   : > { %v5618_v62 = vmax.f32 %v5586_v54, 0.0  ;;  %v5584_v33 = vadd.f32 %v8631_v53, %v5481_v30  ;;  %v5484_v48 = vadd.f32 %v6799_v7, %v4918_v24  ;;  %v6769_v44 = vpop.f32.mrf.mxu1  ;;  %v4136_v39 = vadd.f32 %v8538_v37, %v3713_v63  ;;  %v8903_v63 = vld [vmem:[#allocation19_spill] sm:$0xff] }
 0x1e3   : > { %v5357_v58 = vpop.f32.mrf.mxu0  ;;  %v4922_v11 = vadd.f32 %v6769_v44, %v4132_v1  ;;  %v4134_v14 = vadd.f32 %v8542_v6, %v3711_v20  ;;  %v8904_v20 = vld [vmem:[#allocation22_spill] sm:$0xff] }
 0x1e4   : > { %5650 = vst [vmem:[%s8647_s6 + $0x10] sm:$0xff] %v5618_v62  ;;  %v5616_v45 = vmax.f32 %v5584_v33, 0.0  ;;  %v5587_v25 = vadd.f32 %v8631_v53, %v5484_v48  ;;  %v5482_v15 = vadd.f32 %v5357_v58, %v4916_v47  ;;  %v4807_v31 = vpop.f32.mrf.mxu1  ;;  %v4139_v33 = vadd.f32 %v8546_v22, %v3716_v35  ;;  %v8896_v48 = vld [vmem:[#allocation7_spill] sm:$0xff] }
 0x1e5   : > { %v6802_v61 = vpop.f32.mrf.mxu0  ;;  %v4920_v49 = vadd.f32 %v4807_v31, %v4130_v36 }
 0x1e6   : > { %5648 = vst [vmem:[%s8647_s6] sm:$0xff] %v5616_v45  ;;  %v5619_v21 = vmax.f32 %v5587_v25, 0.0  ;;  %v5585_v18 = vadd.f32 %v8631_v53, %v5482_v15  ;;  %v5487_v27 = vadd.f32 %v6802_v61, %v4921_v16  ;;  %v6772_v26 = vpop.f32.mrf.mxu1  ;;  %v8897_v16 = vld [vmem:[#allocation17_spill] sm:$0xff]  ;;  %v8898_v45 = vld [vmem:[#allocation6_spill] sm:$0xff]  ;;  %v8899_v15 = vld [vmem:[#allocation8_spill] sm:$0xff] }
 0x1e7   : > { %v5370_v5 = vpop.f32.mrf.mxu0  ;;  %v4925_v42 = vadd.f32 %v6772_v26, %v4135_v55  ;;  %v3717_v1 = vadd.f32 %v8897_v16, %v8896_v48  ;;  %v4137_v25 = vadd.f32 %v8898_v45, %v3714_v41  ;;  %v8902_v55 = vld [vmem:[#allocation9_spill] sm:$0xff]  ;;  %v8911_v48 = vld [vmem:[#allocation12_spill] sm:$0xff] }
 0x1e8   : > { %5651 = vst [vmem:[%s8647_s6 + $0x18] sm:$0xff] %v5619_v21  ;;  %v5617_v38 = vmax.f32 %v5585_v18, 0.0  ;;  %v5590_v8 = vadd.f32 %v8631_v53, %v5487_v27  ;;  %v5485_v19 = vadd.f32 %v5370_v5, %v4919_v57  ;;  %v4820_v17 = vpop.f32.mrf.mxu1  ;;  %v8900_v57 = vld [vmem:[#allocation18_spill] sm:$0xff]  ;;  %v8901_v27 = vld [vmem:[#allocation20_spill] sm:$0xff]  ;;  %v3720_v5 = vadd.f32 %v8903_v63, %v8902_v55  ;;  %v8912_v16 = vld [vmem:[#allocation25_spill] sm:$0xff] }
 0x1e9   : > { %v6803_v24 = vpop.f32.mrf.mxu0  ;;  %v4923_v47 = vadd.f32 %v4820_v17, %v4133_v9  ;;  %v3715_v36 = vadd.f32 %v8900_v57, %v8899_v15  ;;  %v8905_v17 = vld [vmem:[#allocation10_spill] sm:$0xff]  ;;  %v8913_v45 = vld [vmem:[#allocation28_spill] sm:$0xff] }
 0x1ea   : > { %5649 = vst [vmem:[%s8647_s6 + $0x8] sm:$0xff] %v5617_v38  ;;  %v5622_v29 = vmax.f32 %v5590_v8, 0.0  ;;  %v5588_v0 = vadd.f32 %v8631_v53, %v5485_v19  ;;  %v5488_v59 = vadd.f32 %v6803_v24, %v4922_v11  ;;  %v6773_v30 = vpop.f32.mrf.mxu1  ;;  %v4140_v11 = vadd.f32 %v8901_v27, %v3717_v1  ;;  %v8916_v27 = vld [vmem:[#allocation27_spill] sm:$0xff] }
 0x1eb   : > { %v5373_v54 = vpop.f32.mrf.mxu0  ;;  %v4926_v62 = vadd.f32 %v6773_v30, %v4136_v39  ;;  %v4138_v24 = vadd.f32 %v8904_v20, %v3715_v36  ;;  %v3719_v1 = vadd.f32 %v8912_v16, %v8911_v48 }
 0x1ec   : > { %5654 = vst [vmem:[%s8647_s6 + $0x30] sm:$0xff] %v5622_v29  ;;  %v5620_v56 = vmax.f32 %v5588_v0, 0.0  ;;  %v5591_v28 = vadd.f32 %v8631_v53, %v5488_v59  ;;  %v5486_v52 = vadd.f32 %v5373_v54, %v4920_v49  ;;  %v4823_v3 = vpop.f32.mrf.mxu1  ;;  %v8906_v29 = vld [vmem:[#allocation21_spill] sm:$0xff] }
 0x1ed   : > { %v6806_v7 = vpop.f32.mrf.mxu0  ;;  %v4924_v44 = vadd.f32 %v4823_v3, %v4134_v14  ;;  %v3718_v0 = vadd.f32 %v8906_v29, %v8905_v17 }
 0x1ee   : > { %5652 = vst [vmem:[%s8647_s6 + $0x20] sm:$0xff] %v5620_v56  ;;  %v5623_v37 = vmax.f32 %v5591_v28, 0.0  ;;  %v5589_v13 = vadd.f32 %v8631_v53, %v5486_v52  ;;  %v5491_v12 = vadd.f32 %v6806_v7, %v4925_v42  ;;  %v6776_v58 = vpop.f32.mrf.mxu1  ;;  %v8907_v56 = vld [vmem:[#allocation24_spill] sm:$0xff]  ;;  %v8908_v52 = vld [vmem:[#allocation11_spill] sm:$0xff] }
 0x1ef   : > { %v5386_v2 = vpop.f32.mrf.mxu0  ;;  %v4929_v18 = vadd.f32 %v6776_v58, %v4139_v33  ;;  %v4143_v28 = vadd.f32 %v8907_v56, %v3720_v5 }
 0x1f0   : > { %5655 = vst [vmem:[%s8647_s6 + $0x38] sm:$0xff] %v5623_v37  ;;  %v5621_v6 = vmax.f32 %v5589_v13, 0.0  ;;  %v5594_v46 = vadd.f32 %v8631_v53, %v5491_v12  ;;  %v5489_v23 = vadd.f32 %v5386_v2, %v4923_v47  ;;  %v4836_v61 = vpop.f32.mrf.mxu1  ;;  %v8909_v47 = vld [vmem:[#allocation23_spill] sm:$0xff] }
 0x1f1   : > { %v6807_v43 = vpop.f32.mrf.mxu0  ;;  %v4927_v9 = vadd.f32 %v4836_v61, %v4137_v25  ;;  %v3721_v14 = vadd.f32 %v8909_v47, %v8908_v52 }
 0x1f2   : > { %5653 = vst [vmem:[%s8647_s6 + $0x28] sm:$0xff] %v5621_v6  ;;  %v5626_v22 = vmax.f32 %v5594_v46, 0.0  ;;  %v5592_v31 = vadd.f32 %v8631_v53, %v5489_v23  ;;  %v5492_v21 = vadd.f32 %v6807_v43, %v4926_v62  ;;  %v6777_v38 = vpop.f32.mrf.mxu1  ;;  %v8910_v62 = vld [vmem:[#allocation26_spill] sm:$0xff] }
 0x1f3   : > { %v5389_v26 = vpop.f32.mrf.mxu0  ;;  %v4930_v30 = vadd.f32 %v6777_v38, %v4140_v11  ;;  %v4141_v33 = vadd.f32 %v8910_v62, %v3718_v0  ;;  %v4144_v25 = vadd.f32 %v8913_v45, %v3721_v14  ;;  %v8922_v14 = vld [vmem:[#allocation34_spill] sm:$0xff] }
 0x1f4   : > { %5658 = vst [vmem:[%s8647_s6 + $0x50] sm:$0xff] %v5626_v22  ;;  %v5624_v8 = vmax.f32 %v5592_v31, 0.0  ;;  %v5595_v19 = vadd.f32 %v8631_v53, %v5492_v21  ;;  %v5490_v49 = vadd.f32 %v5389_v26, %v4924_v44  ;;  %v4839_v42 = vpop.f32.mrf.mxu1  ;;  %v8914_v31 = vld [vmem:[#allocation30_spill] sm:$0xff] }
 0x1f5   : > { %v6810_v59 = vpop.f32.mrf.mxu0  ;;  %v4928_v12 = vadd.f32 %v4839_v42, %v4138_v24  ;;  %v4142_v21 = vadd.f32 %v8914_v31, %v3719_v1  ;;  %v8925_v1 = vld [vmem:[#allocation35_spill] sm:$0xff] }
 0x1f6   : > { %5656 = vst [vmem:[%s8647_s6 + $0x40] sm:$0xff] %v5624_v8  ;;  %v5627_v39 = vmax.f32 %v5595_v19, 0.0  ;;  %v5593_v35 = vadd.f32 %v8631_v53, %v5490_v49  ;;  %v5495_v54 = vadd.f32 %v6810_v59, %v4929_v18  ;;  %v6780_v7 = vpop.f32.mrf.mxu1  ;;  %v8915_v18 = vld [vmem:[#allocation13_spill] sm:$0xff]  ;;  %v8917_v19 = vld [vmem:[#allocation14_spill] sm:$0xff]  ;;  %v8919_v59 = vld [vmem:[#allocation32_spill] sm:$0xff] }
 0x1f7   : > { %v5402_v41 = vpop.f32.mrf.mxu0  ;;  %v4933_v44 = vadd.f32 %v6780_v7, %v4143_v28  ;;  %v3724_v11 = vadd.f32 %v8916_v27, %v8915_v18  ;;  %v8918_v49 = vld [vmem:[#allocation29_spill] sm:$0xff]  ;;  %v8923_v7 = vld [vmem:[#allocation16_spill] sm:$0xff] }
 0x1f8   : > { %5659 = vst [vmem:[%s8647_s6 + $0x58] sm:$0xff] %v5627_v39  ;;  %v5625_v3 = vmax.f32 %v5593_v35, 0.0  ;;  %v5598_v37 = vadd.f32 %v8631_v53, %v5495_v54  ;;  %v5493_v13 = vadd.f32 %v5402_v41, %v4927_v9  ;;  %v4852_v58 = vpop.f32.mrf.mxu1  ;;  %v3722_v9 = vadd.f32 %v8918_v49, %v8917_v19  ;;  %v8920_v39 = vld [vmem:[#allocation15_spill] sm:$0xff] }
 0x1f9   : > { %v6811_v2 = vpop.f32.mrf.mxu0  ;;  %v4931_v22 = vadd.f32 %v4852_v58, %v4141_v33  ;;  %v4147_v42 = vadd.f32 %v8919_v59, %v3724_v11  ;;  %v8921_v35 = vld [vmem:[#allocation31_spill] sm:$0xff] }
 0x1fa   : > { %5657 = vst [vmem:[%s8647_s6 + $0x48] sm:$0xff] %v5625_v3  ;;  %v5630_v6 = vmax.f32 %v5598_v37, 0.0  ;;  %v5596_v46 = vadd.f32 %v8631_v53, %v5493_v13  ;;  %v5496_v23 = vadd.f32 %v6811_v2, %v4930_v30  ;;  %v6781_v57 = vpop.f32.mrf.mxu1  ;;  %v3725_v54 = vadd.f32 %v8921_v35, %v8920_v39  ;;  %v8924_v3 = vld [vmem:[#allocation33_spill] sm:$0xff] }
 0x1fb   : > { %v5405_v15 = vpop.f32.mrf.mxu0  ;;  %v4934_v8 = vadd.f32 %v6781_v57, %v4144_v25  ;;  %v4145_v41 = vadd.f32 %v8922_v14, %v3722_v9  ;;  %v3723_v37 = vadd.f32 %v8924_v3, %v8923_v7  ;;  %v8926_v25 = vld [vmem:[#allocation36_spill] sm:$0xff] }
 0x1fc   : > { %5662 = vst [vmem:[%s8647_s6 + $0x70] sm:$0xff] %v5630_v6  ;;  %v5628_v36 = vmax.f32 %v5596_v46, 0.0  ;;  %v5599_v43 = vadd.f32 %v8631_v53, %v5496_v23  ;;  %v5494_v61 = vadd.f32 %v5405_v15, %v4928_v12  ;;  %v4855_v63 = vpop.f32.mrf.mxu1  ;;  %v4148_v2 = vadd.f32 %v8925_v1, %v3725_v54 }
 0x1fd   : > { %v6814_v55 = vpop.f32.mrf.mxu0  ;;  %v4932_v0 = vadd.f32 %v4855_v63, %v4142_v21  ;;  %v4146_v15 = vadd.f32 %v8926_v25, %v3723_v37 }
 0x1fe   : > { %5660 = vst [vmem:[%s8647_s6 + $0x60] sm:$0xff] %v5628_v36  ;;  %v5631_v5 = vmax.f32 %v5599_v43, 0.0  ;;  %v5597_v26 = vadd.f32 %v8631_v53, %v5494_v61  ;;  %v5499_v38 = vadd.f32 %v6814_v55, %v4933_v44 }
 0x1ff   : > { %v5418_v20 = vpop.f32.mrf.mxu0 }
 0x200   : > { %5663 = vst [vmem:[%s8647_s6 + $0x78] sm:$0xff] %v5631_v5  ;;  %v5629_v24 = vmax.f32 %v5597_v26, 0.0  ;;  %v5602_v17 = vadd.f32 %v8631_v53, %v5499_v38  ;;  %v5497_v29 = vadd.f32 %v5418_v20, %v4931_v22 }
 0x201   : > { %v6815_v30 = vpop.f32.mrf.mxu0  ;;  %v6784_v47 = vpop.f32.mrf.mxu1 }
 0x202   : > { %5661 = vst [vmem:[%s8647_s6 + $0x68] sm:$0xff] %v5629_v24  ;;  %v5634_v56 = vmax.f32 %v5602_v17, 0.0  ;;  %v5600_v28 = vadd.f32 %v8631_v53, %v5497_v29  ;;  %v5500_v52 = vadd.f32 %v6815_v30, %v4934_v8  ;;  %v4937_v12 = vadd.f32 %v6784_v47, %v4147_v42 }
 0x203   : > { %v5421_v13 = vpop.f32.mrf.mxu0  ;;  %v4868_v16 = vpop.f32.mrf.mxu1 }
 0x204   : > { %5666 = vst [vmem:[%s8647_s6 + $0x90] sm:$0xff] %v5634_v56  ;;  %v5632_v62 = vmax.f32 %v5600_v28, 0.0  ;;  %v5603_v33 = vadd.f32 %v8631_v53, %v5500_v52  ;;  %v5498_v48 = vadd.f32 %v5421_v13, %v4932_v0  ;;  %v4935_v6 = vadd.f32 %v4868_v16, %v4145_v41 }
 0x205   : > { %v6818_v58 = vpop.f32.mrf.mxu0  ;;  %v6785_v45 = vpop.f32.mrf.mxu1 }
 0x206   : > { %5664 = vst [vmem:[%s8647_s6 + $0x80] sm:$0xff] %v5632_v62  ;;  %v5635_v46 = vmax.f32 %v5603_v33, 0.0  ;;  %v5601_v23 = vadd.f32 %v8631_v53, %v5498_v48  ;;  %v5503_v44 = vadd.f32 %v6818_v58, %v4937_v12  ;;  %v4938_v36 = vadd.f32 %v6785_v45, %v4148_v2 }
 0x207   : > { %v5434_v57 = vpop.f32.mrf.mxu0  ;;  %v4871_v31 = vpop.f32.mrf.mxu1 }
 0x208   : > { %5667 = vst [vmem:[%s8647_s6 + $0x98] sm:$0xff] %v5635_v46  ;;  %v5633_v43 = vmax.f32 %v5601_v23, 0.0  ;;  %v5606_v61 = vadd.f32 %v8631_v53, %v5503_v44  ;;  %v5501_v22 = vadd.f32 %v5434_v57, %v4935_v6  ;;  %v4936_v18 = vadd.f32 %v4871_v31, %v4146_v15 }
 0x209   : > { %v6819_v21 = vpop.f32.mrf.mxu0 }
 0x20a   : > { %5665 = vst [vmem:[%s8647_s6 + $0x88] sm:$0xff] %v5633_v43  ;;  %v5638_v27 = vmax.f32 %v5606_v61, 0.0  ;;  %v5604_v11 = vadd.f32 %v8631_v53, %v5501_v22  ;;  %v5504_v55 = vadd.f32 %v6819_v21, %v4938_v36 }
 0x20b   : > { %v5437_v63 = vpop.f32.mrf.mxu0 }
 0x20c   : > { %5670 = vst [vmem:[%s8647_s6 + $0xb0] sm:$0xff] %v5638_v27  ;;  %v5636_v5 = vmax.f32 %v5604_v11, 0.0  ;;  %v5607_v26 = vadd.f32 %v8631_v53, %v5504_v55  ;;  %v5502_v38 = vadd.f32 %v5437_v63, %v4936_v18 }
 0x20e   : > { %5668 = vst [vmem:[%s8647_s6 + $0xa0] sm:$0xff] %v5636_v5  ;;  %v5639_v8 = vmax.f32 %v5607_v26, 0.0  ;;  %v5605_v19 = vadd.f32 %v8631_v53, %v5502_v38  ;;  %v6822_v49 = vpop.f32.mrf.mxu0 }
 0x20f   : > { %v6788_v20 = vpop.f32.mrf.mxu1 }
 0x210   : > { %5671 = vst [vmem:[%s8647_s6 + $0xb8] sm:$0xff] %v5639_v8  ;;  %v5637_v9 = vmax.f32 %v5605_v19, 0.0  ;;  %v4941_v24 = vadd.f32 %v6788_v20, %v8591_v32  ;;  %v5450_v17 = vpop.f32.mrf.mxu0 }
 0x211   : > { %v4884_v29 = vpop.f32.mrf.mxu1 }
 0x212   : > { %5669 = vst [vmem:[%s8647_s6 + $0xa8] sm:$0xff] %v5637_v9  ;;  %v5507_v0 = vadd.f32 %v6822_v49, %v4941_v24  ;;  %v4939_v59 = vadd.f32 %v4884_v29, %v8594_v50  ;;  %v6823_v39 = vpop.f32.mrf.mxu0 }
 0x213   : > { %v6789_v42 = vpop.f32.mrf.mxu1 }
 0x214   : > { %v5610_v35 = vadd.f32 %v8631_v53, %v5507_v0  ;;  %v5505_v54 = vadd.f32 %v5450_v17, %v4939_v59  ;;  %v4942_v30 = vadd.f32 %v6789_v42, %v8597_v40  ;;  %v5453_v14 = vpop.f32.mrf.mxu0 }
 0x215   : > { %v4887_v56 = vpop.f32.mrf.mxu1 }
 0x216   : > { %v5642_v28 = vmax.f32 %v5610_v35, 0.0  ;;  %v5608_v32 = vadd.f32 %v8631_v53, %v5505_v54  ;;  %v5508_v52 = vadd.f32 %v6823_v39, %v4942_v30  ;;  %v4940_v47 = vadd.f32 %v4887_v56, %v8602_v34 }
 0x218   : > { %5674 = vst [vmem:[%s8647_s6 + $0xd0] sm:$0xff] %v5642_v28  ;;  %v5640_v50 = vmax.f32 %v5608_v32, 0.0  ;;  %v5611_v41 = vadd.f32 %v8631_v53, %v5508_v52  ;;  %v5506_v7 = vadd.f32 %v5453_v14, %v4940_v47 }
 0x21a   : > { %5672 = vst [vmem:[%s8647_s6 + $0xc0] sm:$0xff] %v5640_v50  ;;  %v5643_v3 = vmax.f32 %v5611_v41, 0.0  ;;  %v5609_v37 = vadd.f32 %v8631_v53, %v5506_v7 }
 0x21b   : > { %v6826_v13 = vpop.f32.mrf.mxu0 }
 0x21c   : > { %5675 = vst [vmem:[%s8647_s6 + $0xd8] sm:$0xff] %v5643_v3  ;;  %v5641_v40 = vmax.f32 %v5609_v37, 0.0 }
 0x21d   : > { %v6792_v12 = vpop.f32.mrf.mxu1  ;;  %v5466_v33 = vpop.f32.mrf.mxu0 }
 0x21e   : > { %5673 = vst [vmem:[%s8647_s6 + $0xc8] sm:$0xff] %v5641_v40  ;;  %v4945_v62 = vadd.f32 %v6792_v12, %v8607_v4 }
 0x21f   : > { %v4900_v34 = vpop.f32.mrf.mxu1  ;;  %v6827_v2 = vpop.f32.mrf.mxu0 }
 0x220   : > { %v5511_v48 = vadd.f32 %v6826_v13, %v4945_v62  ;;  %v4943_v16 = vadd.f32 %v4900_v34, %v8613_v10 }
 0x221   : > { %v6793_v1 = vpop.f32.mrf.mxu1  ;;  %v5469_v10 = vpop.f32.mrf.mxu0 }
 0x222   : > { %v5614_v58 = vadd.f32 %v8631_v53, %v5511_v48  ;;  %v5509_v6 = vadd.f32 %v5466_v33, %v4943_v16  ;;  %v4946_v46 = vadd.f32 %v6793_v1, %v8618_v51 }
 0x223   : > { %v4903_v23 = vpop.f32.mrf.mxu1 }
 0x224   : > { %v5646_v44 = vmax.f32 %v5614_v58, 0.0  ;;  %v5612_v4 = vadd.f32 %v8631_v53, %v5509_v6  ;;  %v5512_v45 = vadd.f32 %v6827_v2, %v4946_v46  ;;  %v4944_v25 = vadd.f32 %v4903_v23, %v8624_v60 }
 0x226   : > { %5678 = vst [vmem:[%s8647_s6 + $0xf0] sm:$0xff] %v5646_v44  ;;  %v5644_v15 = vmax.f32 %v5612_v4, 0.0  ;;  %v5615_v57 = vadd.f32 %v8631_v53, %v5512_v45  ;;  %v5510_v36 = vadd.f32 %v5469_v10, %v4944_v25 }
 0x228   : > { %5676 = vst [vmem:[%s8647_s6 + $0xe0] sm:$0xff] %v5644_v15  ;;  %v5647_v51 = vmax.f32 %v5615_v57, 0.0  ;;  %v5613_v43 = vadd.f32 %v8631_v53, %v5510_v36 }
 0x22a   : > { %5679 = vst [vmem:[%s8647_s6 + $0xf8] sm:$0xff] %v5647_v51  ;;  %v5645_v60 = vmax.f32 %v5613_v43, 0.0 }
 0x22c   : > { %5677 = vst [vmem:[%s8647_s6 + $0xe8] sm:$0xff] %v5645_v60 }
 0x22d   : > { %6943 = shalt.err (!%p6940_p3)
}
 0x22e   : > { %s6944_s25 = scalar_lea.hbm %s8769_s11, 4096  ;;  %s6948_s28 = scalar_lea.hbm %s8820_s3, 8192 }
 0x22f   : > { %p6945_p4 = scmp.ne.s32.totalorder %s8769_s11, %s6944_s25  ;;  %p6949_p9 = scmp.lt.s32.totalorder %s8769_s11, %s8820_s3 }
 0x230   : > { %p6950_p10 = scmp.lt.s32.totalorder %s6948_s28, %s6944_s25 }
 0x231   : > { %p6946_p7 = pnand %p6945_p4, %p7053_p5 }
 0x232   : > { %p6951_p11 = por %p6950_p10, %p6949_p9 }
 0x233   : > { %p6947_p8 = pneg %p6946_p7 }
 0x235   : > { %p6952_p12 = pnand %p6951_p11, %p6947_p8 }
 0x237   : > { %6955 = shalt.err (!%p6952_p12)
}
 0x238   : > { %s6993_s4 = smov 128   ;;  %s6994_s5 = smov 8  }
 0x239   : > { %6841 = dma.vmem_to_hbm [thread:$0]  (%p7053_p5), %s8771_s8, 4096, %s8769_s11, %s8777_s16, %s6993_s4, %s6993_s4, %s6994_s5  }
 0x23a PF: > { %p6847_p13 = scmp.ge.s32.totalorder %s6990_s15, 2  ;;  %s5709_s6 = sand.u32 1, %s6978_s12  }
 0x23b   : > { %s5710_s7 = scalar_lea.sflag [#allocation4], %s5709_s6 }
 0x23c   : > { %p6844_p0 = pnand %p6847_p13, %p7057_p6 }
 0x23e   : > { %p6845_p1 = pneg %p6844_p0 }
 0x240   : > { %6973 = dma.done.wait (%p6845_p1), %s5710_s7, 4096  }
 0x241   : > { %6975 = vsyncadd (%p6845_p1), %s5710_s7, 4294963200  ;;  %p13_p2 = scmp.ge.s32.totalorder %s7040_s18, 4   ;;  %s8927_s12 = smov %s6982_s13 }
 0x242   : > { %s8928_s13 = smov %s6986_s14  ;;  %s8929_s14 = smov %s7051_s21 }
 0x243   : > { %s8930_s15 = smov %s7040_s18  ;;  %15 = sbr.rel (!%p13_p2) target bundleno = 3 (0x3), region = 77 }
 0x248   :  { %5715 = vsyncpa [#allocation4], 1 }
 0x249   :  { %5717 = vsyncpa [#allocation4 + $0x1], 1 }

</bundles_post_ra>
